<compile_context>
chip_gen: v7x
topology: tpu7x:2x2x1
jax: 0.10.0
libtpu: 0.0.40
codegen_flags: <defaults>
</compile_context>

<pallas_src>
import math
import functools

import jax
import jax.numpy as jnp
from jax.experimental import pallas as pl
from jax.experimental.pallas import tpu as pltpu


# ------------------------------- Pallas kernel -------------------------------

def _styled_conv_kernel(x_ref, w_ref, noise_ref, o_ref, pad_ref, *,
                        H, W, KH, KW, neg_slope):
    # x_ref     : (1, H*W, Cin)          bf16, NHWC input flattened over (H, W)
    # w_ref     : (1, KH, KW*Cin, Cout)  bf16, per-sample modulated+demodulated
    #                                    weights (sqrt(2) act gain folded in)
    # noise_ref : (1, H*W, 1)            f32, noise * noise_weight * sqrt(2)
    # o_ref     : (1, H*W, Cout)         f32, NHWC output flattened over (H, W)
    # pad_ref   : (H+2ph, W+2pw, Cin)    bf16 VMEM scratch; halo kept at zero
    cin = x_ref.shape[-1]
    ph, pw = KH // 2, KW // 2
    Wp = W + 2 * pw

    # ---- keep the scratch halo zero (interior is fully rewritten below) ----
    # Re-zeroed every step: the scratch is per-core, so a program_id()==0 guard
    # would be wrong when the "parallel" batch axis is split across TensorCores.
    # The halo is tiny (~(2H+2W)*Cin elements), so this is cheap.
    zero_rows = jnp.zeros((ph, Wp, cin), jnp.bfloat16)
    zero_cols = jnp.zeros((H, pw, cin), jnp.bfloat16)
    pad_ref[pl.ds(0, ph), :, :] = zero_rows
    pad_ref[pl.ds(ph + H, ph), :, :] = zero_rows
    pad_ref[pl.ds(ph, H), pl.ds(0, pw), :] = zero_cols
    pad_ref[pl.ds(ph, H), pl.ds(pw + W, pw), :] = zero_cols

    # ---- write the activation tile once into the padded interior (bf16) ----
    pad_ref[pl.ds(ph, H), pl.ds(pw, W), :] = x_ref[0].reshape(H, W, cin)

    # ---- 3x3 conv: per dh one deep (K = KW*Cin) MXU matmul, f32 accumulation ----
    acc = None
    for dh in range(KH):
        taps = [pad_ref[pl.ds(dh, H), pl.ds(dw, W), :] for dw in range(KW)]
        patch = jnp.concatenate(taps, axis=-1).reshape(H * W, KW * cin)   # bf16
        part = jnp.dot(patch, w_ref[0, dh],
                       preferred_element_type=jnp.float32)               # (H*W, Cout)
        acc = part if acc is None else acc + part

    # ---- noise add (lane-broadcast over Cout) + leaky relu (gain pre-folded) ----
    out = acc + noise_ref[0]                            # (H*W, Cout) + (H*W, 1)
    out = jnp.where(out >= 0.0, out, neg_slope * out)
    o_ref[0] = out.astype(o_ref.dtype)                  # lane-dense NHWC store


# ------------------------------ Wrapper (glue) -------------------------------

def styled_layer_forward(x_nchw, w_latent, params, noise_nchw):
    """x_nchw: (B, Cin, H, W); w_latent: (B, style_dim); noise_nchw: (B, 1, H, W)."""
    B, Cin, H, W = x_nchw.shape
    Cout, _, KH, KW = params["conv_weight"].shape
    S = params["style_weight"].shape[1]

    lin_scale = 1.0 / math.sqrt(S)                 # EqualizedLR linear scale
    conv_scale = 1.0 / math.sqrt(Cin * KH * KW)    # EqualizedLR conv scale
    act_gain = math.sqrt(2.0)                      # EqualizedLRLeakyReLU gain

    # ---- style transform + per-sample modulated/demodulated weights (tiny; XLA) ----
    y = w_latent @ (params["style_weight"] * lin_scale).T + params["style_bias"]   # (B, Cin)
    w_khwc = jnp.transpose(params["conv_weight"], (2, 3, 1, 0)) * conv_scale        # (KH,KW,Cin,Cout)
    w_mod = w_khwc[None] * y[:, None, None, :, None]                                # (B,KH,KW,Cin,Cout)
    demod = jax.lax.rsqrt(jnp.sum(w_mod * w_mod, axis=(1, 2, 3)) + 1e-8)            # (B, Cout)
    w_mod = w_mod * (demod * act_gain)[:, None, None, None, :]                      # gain folded
    w_slab = w_mod.reshape(B, KH, KW * Cin, Cout).astype(jnp.bfloat16)              # per-dh K-slabs

    # ---- one-shot NCHW -> NHWC-flattened relayout in the wrapper (bf16 feed) ----
    x_flat = jnp.transpose(x_nchw, (0, 2, 3, 1)).reshape(B, H * W, Cin).astype(jnp.bfloat16)
    noise = noise_nchw.reshape(B, H * W, 1) * (params["noise_weight"] * act_gain)    # gain folded

    kernel = functools.partial(_styled_conv_kernel, H=H, W=W, KH=KH, KW=KW,
                               neg_slope=0.2)

    flops = 2 * B * H * W * KH * KW * Cin * Cout
    bytes_accessed = (x_flat.size * 2 + w_slab.size * 2 + noise.size * 4
                      + B * H * W * Cout * 4)

    out_flat = pl.pallas_call(
        kernel,
        out_shape=jax.ShapeDtypeStruct((B, H * W, Cout), jnp.float32),
        grid=(B,),
        in_specs=[
            pl.BlockSpec((1, H * W, Cin), lambda b: (b, 0, 0)),
            pl.BlockSpec((1, KH, KW * Cin, Cout), lambda b: (b, 0, 0, 0)),
            pl.BlockSpec((1, H * W, 1), lambda b: (b, 0, 0)),
        ],
        out_specs=pl.BlockSpec((1, H * W, Cout), lambda b: (b, 0, 0)),
        scratch_shapes=[pltpu.VMEM((H + 2 * (KH // 2), W + 2 * (KW // 2), Cin),
                                   jnp.bfloat16)],
        compiler_params=pltpu.CompilerParams(
            dimension_semantics=("parallel",),
            vmem_limit_bytes=64 * 1024 * 1024,
        ),
        cost_estimate=pl.CostEstimate(flops=flops, transcendentals=0,
                                      bytes_accessed=bytes_accessed),
    )(x_flat, w_slab, noise)

    # One-shot XLA relayout back to NCHW (kernel itself stays transpose-free).
    return jnp.transpose(out_flat.reshape(B, H, W, Cout), (0, 3, 1, 2))


# ------------------------- Pure-JAX reference check --------------------------

def reference_forward(x_nchw, w_latent, params, noise_nchw):
    B, Cin, H, W = x_nchw.shape
    weight = params["conv_weight"]                 # (Cout, Cin, KH, KW)
    Cout, _, KH, KW = weight.shape
    S = params["style_weight"].shape[1]
    lin_scale = 1.0 / math.sqrt(S)
    conv_scale = 1.0 / math.sqrt(Cin * KH * KW)

    y = w_latent @ (params["style_weight"] * lin_scale).T + params["style_bias"]
    w_mod = conv_scale * weight[None] * y[:, None, :, None, None]     # (B,Cout,Cin,KH,KW)
    demod = jax.lax.rsqrt(jnp.sum(w_mod ** 2, axis=(2, 3, 4)) + 1e-8)
    w_mod = w_mod * demod[:, :, None, None, None]

    def conv_one(xb, wb):
        return jax.lax.conv_general_dilated(
            xb[None], wb, (1, 1), ((1, 1), (1, 1)),
            dimension_numbers=("NCHW", "OIHW", "NCHW"))[0]

    out = jax.vmap(conv_one)(x_nchw, w_mod)
    out = out + params["noise_weight"] * noise_nchw
    return jnp.where(out >= 0, out, 0.2 * out) * math.sqrt(2.0)


# ----------------------------------- main ------------------------------------

if __name__ == "__main__":
    key = jax.random.PRNGKey(0)
    B, Cin, Cout, S, H, W = 2, 4, 8, 32, 16, 16
    k1, k2, k3, k4, k5 = jax.random.split(key, 5)

    x = jax.random.normal(k1, (B, Cin, H, W), jnp.float32)
    w_lat = jax.random.normal(k2, (B, S), jnp.float32)
    params = {
        # EqualizedLRLinear(style_dim -> in_channels): weight ~ N(0,1), bias = ones
        "style_weight": jax.random.normal(k3, (Cin, S), jnp.float32),
        "style_bias": jnp.ones((Cin,), jnp.float32),
        # ModulatedConv2d weight (out, in, k, k) ~ N(0,1)
        "conv_weight": jax.random.normal(k4, (Cout, Cin, 3, 3), jnp.float32),
        # AddRandomNoise weight: module init is zeros; use a small nonzero value
        # so the noise path is exercised numerically.
        "noise_weight": jnp.float32(0.05),
    }
    # AddRandomNoise draws noise of shape (B,1,H,W); here it is an explicit input.
    noise = jax.random.normal(k5, (B, 1, H, W), jnp.float32)

    out = styled_layer_forward(x, w_lat, params, noise)
    out = jax.block_until_ready(out)

    ref = reference_forward(x, w_lat, params, noise)
    err = float(jnp.max(jnp.abs(out - ref)))
    assert out.shape == (B, Cout, H, W)
    # Tolerance reflects bf16 MXU inputs / bf16 modulated weights (f32 accumulation).
    assert jnp.allclose(out, ref, atol=5e-2, rtol=5e-2), f"max abs err {err}"

    print("KERNEL_OK")
</pallas_src>

<mosaic_0001>
module attributes {stable_mosaic.version = 11 : i64} {
  func.func @_styled_conv_kernel(%arg0: i32, %arg1: memref<1x256x4xbf16, #tpu.memory_space<vmem>>, %arg2: memref<1x3x12x8xbf16, #tpu.memory_space<vmem>>, %arg3: memref<1x256x1xf32, #tpu.memory_space<vmem>>, %arg4: memref<1x256x8xf32, #tpu.memory_space<vmem>>, %arg5: memref<18x18x4xbf16, #tpu.memory_space<vmem>>) attributes {dimension_semantics = [#tpu.dimension_semantics<parallel>], iteration_bounds = array<i64: 2>, scalar_prefetch = 0 : i64, scratch_operands = 1 : i64, tpu.core_type = #tpu.core_type<tc>, window_params = [{transform_indices = @transform_0, window_bounds = array<i64: 1, 256, 4>}, {transform_indices = @transform_1, window_bounds = array<i64: 1, 3, 12, 8>}, {transform_indices = @transform_2, window_bounds = array<i64: 1, 256, 1>}, {transform_indices = @transform_3, window_bounds = array<i64: 1, 256, 8>}]} {
    %cst = arith.constant 0.000000e+00 : bf16
    %0 = vector.broadcast %cst : bf16 to vector<1x18x4xbf16>
    %cst_0 = arith.constant 0.000000e+00 : bf16
    %1 = vector.broadcast %cst_0 : bf16 to vector<16x1x4xbf16>
    %c0 = arith.constant 0 : index
    %c0_1 = arith.constant 0 : index
    %c0_2 = arith.constant 0 : index
    %2 = vector.load %arg5[%c0, %c0_1, %c0_2] : memref<18x18x4xbf16, #tpu.memory_space<vmem>>, vector<1x18x4xbf16>
    tpu.vector_store %arg5[%c0, %c0_1, %c0_2], %0 {strides = array<i32>} : memref<18x18x4xbf16, #tpu.memory_space<vmem>>, vector<1x18x4xbf16>,
    %c17 = arith.constant 17 : index
    %c0_3 = arith.constant 0 : index
    %c0_4 = arith.constant 0 : index
    %3 = vector.load %arg5[%c17, %c0_3, %c0_4] : memref<18x18x4xbf16, #tpu.memory_space<vmem>>, vector<1x18x4xbf16>
    tpu.vector_store %arg5[%c17, %c0_3, %c0_4], %0 {strides = array<i32>} : memref<18x18x4xbf16, #tpu.memory_space<vmem>>, vector<1x18x4xbf16>,
    %c1 = arith.constant 1 : index
    %c0_5 = arith.constant 0 : index
    %c0_6 = arith.constant 0 : index
    %4 = vector.load %arg5[%c1, %c0_5, %c0_6] : memref<18x18x4xbf16, #tpu.memory_space<vmem>>, vector<16x1x4xbf16>
    tpu.vector_store %arg5[%c1, %c0_5, %c0_6], %1 {strides = array<i32>} : memref<18x18x4xbf16, #tpu.memory_space<vmem>>, vector<16x1x4xbf16>,
    %c1_7 = arith.constant 1 : index
    %c17_8 = arith.constant 17 : index
    %c0_9 = arith.constant 0 : index
    %5 = vector.load %arg5[%c1_7, %c17_8, %c0_9] : memref<18x18x4xbf16, #tpu.memory_space<vmem>>, vector<16x1x4xbf16>
    tpu.vector_store %arg5[%c1_7, %c17_8, %c0_9], %1 {strides = array<i32>} : memref<18x18x4xbf16, #tpu.memory_space<vmem>>, vector<16x1x4xbf16>,
    %c0_10 = arith.constant 0 : index
    %c0_11 = arith.constant 0 : index
    %c0_12 = arith.constant 0 : index
    %6 = vector.load %arg1[%c0_10, %c0_11, %c0_12] : memref<1x256x4xbf16, #tpu.memory_space<vmem>>, vector<1x256x4xbf16>
    %7 = vector.shape_cast %6 : vector<1x256x4xbf16> to vector<256x4xbf16>
    %8 = vector.shape_cast %7 : vector<256x4xbf16> to vector<16x16x4xbf16>
    %c1_13 = arith.constant 1 : index
    %c1_14 = arith.constant 1 : index
    %c0_15 = arith.constant 0 : index
    %9 = vector.load %arg5[%c1_13, %c1_14, %c0_15] : memref<18x18x4xbf16, #tpu.memory_space<vmem>>, vector<16x16x4xbf16>
    tpu.vector_store %arg5[%c1_13, %c1_14, %c0_15], %8 {strides = array<i32>} : memref<18x18x4xbf16, #tpu.memory_space<vmem>>, vector<16x16x4xbf16>,
    %c0_16 = arith.constant 0 : index
    %c0_17 = arith.constant 0 : index
    %c0_18 = arith.constant 0 : index
    %10 = vector.load %arg5[%c0_16, %c0_17, %c0_18] : memref<18x18x4xbf16, #tpu.memory_space<vmem>>, vector<16x16x4xbf16>
    %c0_19 = arith.constant 0 : index
    %c1_20 = arith.constant 1 : index
    %c0_21 = arith.constant 0 : index
    %11 = vector.load %arg5[%c0_19, %c1_20, %c0_21] : memref<18x18x4xbf16, #tpu.memory_space<vmem>>, vector<16x16x4xbf16>
    %c0_22 = arith.constant 0 : index
    %c2 = arith.constant 2 : index
    %c0_23 = arith.constant 0 : index
    %12 = vector.load %arg5[%c0_22, %c2, %c0_23] : memref<18x18x4xbf16, #tpu.memory_space<vmem>>, vector<16x16x4xbf16>
    %13 = tpu.concatenate %10, %11, %12 in 2 : vector<16x16x4xbf16>, vector<16x16x4xbf16>, vector<16x16x4xbf16> -> vector<16x16x12xbf16>
    %14 = vector.shape_cast %13 : vector<16x16x12xbf16> to vector<256x12xbf16>
    %c0_24 = arith.constant 0 : index
    %c0_25 = arith.constant 0 : index
    %c0_26 = arith.constant 0 : index
    %c0_27 = arith.constant 0 : index
    %15 = vector.load %arg2[%c0_24, %c0_25, %c0_26, %c0_27] : memref<1x3x12x8xbf16, #tpu.memory_space<vmem>>, vector<1x1x12x8xbf16>
    %16 = vector.shape_cast %15 : vector<1x1x12x8xbf16> to vector<12x8xbf16>
    %cst_28 = arith.constant dense<0.000000e+00> : vector<256x8xf32>
    %17 = tpu.matmul %14, %16, %cst_28 {dimension_numbers = #tpu.dot_dimension_numbers<[1], [0], [0], [1], [0, 0, 1, 1], [], []>} : vector<256x12xbf16>, vector<12x8xbf16>, vector<256x8xf32> -> vector<256x8xf32>
    %c1_29 = arith.constant 1 : index
    %c0_30 = arith.constant 0 : index
    %c0_31 = arith.constant 0 : index
    %18 = vector.load %arg5[%c1_29, %c0_30, %c0_31] : memref<18x18x4xbf16, #tpu.memory_space<vmem>>, vector<16x16x4xbf16>
    %c1_32 = arith.constant 1 : index
    %c1_33 = arith.constant 1 : index
    %c0_34 = arith.constant 0 : index
    %19 = vector.load %arg5[%c1_32, %c1_33, %c0_34] : memref<18x18x4xbf16, #tpu.memory_space<vmem>>, vector<16x16x4xbf16>
    %c1_35 = arith.constant 1 : index
    %c2_36 = arith.constant 2 : index
    %c0_37 = arith.constant 0 : index
    %20 = vector.load %arg5[%c1_35, %c2_36, %c0_37] : memref<18x18x4xbf16, #tpu.memory_space<vmem>>, vector<16x16x4xbf16>
    %21 = tpu.concatenate %18, %19, %20 in 2 : vector<16x16x4xbf16>, vector<16x16x4xbf16>, vector<16x16x4xbf16> -> vector<16x16x12xbf16>
    %22 = vector.shape_cast %21 : vector<16x16x12xbf16> to vector<256x12xbf16>
    %c0_38 = arith.constant 0 : index
    %c1_39 = arith.constant 1 : index
    %c0_40 = arith.constant 0 : index
    %c0_41 = arith.constant 0 : index
    %23 = vector.load %arg2[%c0_38, %c1_39, %c0_40, %c0_41] : memref<1x3x12x8xbf16, #tpu.memory_space<vmem>>, vector<1x1x12x8xbf16>
    %24 = vector.shape_cast %23 : vector<1x1x12x8xbf16> to vector<12x8xbf16>
    %cst_42 = arith.constant dense<0.000000e+00> : vector<256x8xf32>
    %25 = tpu.matmul %22, %24, %cst_42 {dimension_numbers = #tpu.dot_dimension_numbers<[1], [0], [0], [1], [0, 0, 1, 1], [], []>} : vector<256x12xbf16>, vector<12x8xbf16>, vector<256x8xf32> -> vector<256x8xf32>
    %26 = arith.addf %17, %25 : vector<256x8xf32>
    %c2_43 = arith.constant 2 : index
    %c0_44 = arith.constant 0 : index
    %c0_45 = arith.constant 0 : index
    %27 = vector.load %arg5[%c2_43, %c0_44, %c0_45] : memref<18x18x4xbf16, #tpu.memory_space<vmem>>, vector<16x16x4xbf16>
    %c2_46 = arith.constant 2 : index
    %c1_47 = arith.constant 1 : index
    %c0_48 = arith.constant 0 : index
    %28 = vector.load %arg5[%c2_46, %c1_47, %c0_48] : memref<18x18x4xbf16, #tpu.memory_space<vmem>>, vector<16x16x4xbf16>
    %c2_49 = arith.constant 2 : index
    %c2_50 = arith.constant 2 : index
    %c0_51 = arith.constant 0 : index
    %29 = vector.load %arg5[%c2_49, %c2_50, %c0_51] : memref<18x18x4xbf16, #tpu.memory_space<vmem>>, vector<16x16x4xbf16>
    %30 = tpu.concatenate %27, %28, %29 in 2 : vector<16x16x4xbf16>, vector<16x16x4xbf16>, vector<16x16x4xbf16> -> vector<16x16x12xbf16>
    %31 = vector.shape_cast %30 : vector<16x16x12xbf16> to vector<256x12xbf16>
    %c0_52 = arith.constant 0 : index
    %c2_53 = arith.constant 2 : index
    %c0_54 = arith.constant 0 : index
    %c0_55 = arith.constant 0 : index
    %32 = vector.load %arg2[%c0_52, %c2_53, %c0_54, %c0_55] : memref<1x3x12x8xbf16, #tpu.memory_space<vmem>>, vector<1x1x12x8xbf16>
    %33 = vector.shape_cast %32 : vector<1x1x12x8xbf16> to vector<12x8xbf16>
    %cst_56 = arith.constant dense<0.000000e+00> : vector<256x8xf32>
    %34 = tpu.matmul %31, %33, %cst_56 {dimension_numbers = #tpu.dot_dimension_numbers<[1], [0], [0], [1], [0, 0, 1, 1], [], []>} : vector<256x12xbf16>, vector<12x8xbf16>, vector<256x8xf32> -> vector<256x8xf32>
    %35 = arith.addf %26, %34 : vector<256x8xf32>
    %c0_57 = arith.constant 0 : index
    %c0_58 = arith.constant 0 : index
    %c0_59 = arith.constant 0 : index
    %36 = vector.load %arg3[%c0_57, %c0_58, %c0_59] : memref<1x256x1xf32, #tpu.memory_space<vmem>>, vector<1x256x1xf32>
    %37 = vector.shape_cast %36 : vector<1x256x1xf32> to vector<256x1xf32>
    %38 = vector.broadcast %37 : vector<256x1xf32> to vector<256x8xf32>
    %39 = arith.addf %35, %38 : vector<256x8xf32>
    %cst_60 = arith.constant 0.000000e+00 : f32
    %40 = vector.broadcast %cst_60 : f32 to vector<256x8xf32>
    %41 = arith.cmpf oge, %39, %40 : vector<256x8xf32>
    %cst_61 = arith.constant 2.000000e-01 : f32
    %42 = vector.broadcast %cst_61 : f32 to vector<256x8xf32>
    %43 = arith.mulf %42, %39 : vector<256x8xf32>
    %44 = arith.select %41, %39, %43 : vector<256x8xi1>, vector<256x8xf32>
    %c0_62 = arith.constant 0 : index
    %c0_63 = arith.constant 0 : index
    %c0_64 = arith.constant 0 : index
    %45 = vector.load %arg4[%c0_62, %c0_63, %c0_64] : memref<1x256x8xf32, #tpu.memory_space<vmem>>, vector<1x256x8xf32>
    %46 = vector.shape_cast %45 : vector<1x256x8xf32> to vector<256x8xf32>
    %47 = vector.shape_cast %44 : vector<256x8xf32> to vector<1x256x8xf32>
    tpu.vector_store %arg4[%c0_62, %c0_63, %c0_64], %47 {strides = array<i32>} : memref<1x256x8xf32, #tpu.memory_space<vmem>>, vector<1x256x8xf32>,
    return
  }
  func.func @transform_0(%arg0: i32) -> (i32, i32, i32) {
    %c0_i32 = arith.constant 0 : i32
    %c0_i32_0 = arith.constant 0 : i32
    %c0_i32_1 = arith.constant 0 : i32
    return %arg0, %c0_i32, %c0_i32_0 : i32, i32, i32
  }
  func.func @transform_1(%arg0: i32) -> (i32, i32, i32, i32) {
    %c0_i32 = arith.constant 0 : i32
    %c0_i32_0 = arith.constant 0 : i32
    %c0_i32_1 = arith.constant 0 : i32
    %c0_i32_2 = arith.constant 0 : i32
    return %arg0, %c0_i32, %c0_i32_0, %c0_i32_1 : i32, i32, i32, i32
  }
  func.func @transform_2(%arg0: i32) -> (i32, i32, i32) {
    %c0_i32 = arith.constant 0 : i32
    %c0_i32_0 = arith.constant 0 : i32
    %c0_i32_1 = arith.constant 0 : i32
    return %arg0, %c0_i32, %c0_i32_0 : i32, i32, i32
  }
  func.func @transform_3(%arg0: i32) -> (i32, i32, i32) {
    %c0_i32 = arith.constant 0 : i32
    %c0_i32_0 = arith.constant 0 : i32
    %c0_i32_1 = arith.constant 0 : i32
    return %arg0, %c0_i32, %c0_i32_0 : i32, i32, i32
  }
}

</mosaic_0001>

<bundles_post_ra>
// kernel: tpu_custom_call.1
= control target key start
LH: loop header
LB: loop body
LE: loop exit
PB: predicated region body
PF: predicated region fallthrough
CT: control target
= control target key end

     0   :  { %s6205_s0 = inlined_call_operand.hbm [shape: bf16[2,256,4], index: 0, kind: input, shape index: {}]   ;;  %s6206_s1 = inlined_call_operand.hbm [shape: bf16[2,3,12,8], index: 1, kind: input, shape index: {}]   ;;  %s6207_s2 = inlined_call_operand.hbm [shape: f32[2,256,1], index: 2, kind: input, shape index: {}]   ;;  %s6208_s3 = inlined_call_operand.hbm [shape: f32[2,256,8], index: 3, kind: output, shape index: {}]  }
   0x1   :  { %6221 = sst [smem:[#allocation24_spill]] %s6206_s1 }
   0x2   :  { %8 = vsyncpa [#allocation4], 0 }
   0x3   :  { %10 = vsyncpa [#allocation4 + $0x1], 0 }
   0x4   :  { %11 = vsyncpa [#allocation7], 0 }
   0x5   :  { %13 = vsyncpa [#allocation7 + $0x1], 0 }
   0x6   :  { %14 = vsyncpa [#allocation5], 0 }
   0x7   :  { %16 = vsyncpa [#allocation5 + $0x1], 0  ;;  %s4649_s12 = smov 0   ;;  %s4651_s13 = smov 0  }
   0x8   :  { %s4653_s14 = smov 0   ;;  %s4655_s15 = smov 0  }
   0x9 LB: > { %s4670_s16 = sadd.s32 4294967295, %s4615_s15   ;;  %s3802_s17 = sadd.s32 4294967294, %s4615_s15   ;;  %s4615_s15 = sphi %s4655_s15, %s6269_s15   ;;  %s4611_s14 = sphi %s4653_s14, %s6268_s14   ;;  %s4607_s13 = sphi %s4651_s13, %s6267_s13   ;;  %s4603_s12 = sphi %s4649_s12, %s6266_s12  }
   0xa   : > { %s4674_s18 = sadd.s32 1, %s4615_s15   ;;  %s29_s19 = sadd.s32 1, %s4611_s14 }
   0xb   : > { %s26_s20 = ssub.s32 %s4615_s15, %s4674_s18  ;;  %p36_p0 = scmp.ne.s32.totalorder %s4611_s14, %s4607_s13 }
   0xc   : > { %p27_p1 = scmp.eq.s32.totalorder %s26_s20, 0  ;;  %p37_p2 = scmp.eq.s32.totalorder %s4615_s15, 0 }
   0xd   : > { %p42_p3 = scmp.ne.s32.totalorder %s4607_s13, %s4603_s12  ;;  %p43_p4 = scmp.eq.s32.totalorder %s4670_s16, 0 }
   0xe   : > { %s4686_s21 = scalar_select %p27_p1, %s4611_s14, %s29_s19  }
   0xf   : > { %p38_p5 = por %p37_p2, %p36_p0  ;;  %p4688_p6 = por %p43_p4, %p42_p3 }
  0x10   : > { %6222 = sst [smem:[#allocation13_spill]] %s4686_s21  ;;  %p118_p7 = scmp.eq.s32.totalorder %s4670_s16, 1 }
  0x11   : > { %s6223_s22 = scalar_select %p4688_p6, 1, 0 }
  0x12   : > { %p124_p8 = scmp.eq.s32.totalorder %s3802_s17, 1  ;;  %p4271_p10 = scmp.lt.s32.totalorder %s4615_s15, 2 }
  0x13   : > { %p4695_p11 = por %p118_p7, %p36_p0  ;;  %s4704_s25 = sand.u32 1, %s4611_s14  }
  0x14   : > { %p4699_p12 = por %p124_p8, %p42_p3  ;;  %p4706_p13 = pnand %p4271_p10, %p38_p5 }
  0x15   : > { %s6224_s23 = scalar_select %p4695_p11, 1, 0 }
  0x16   : > { %s6225_s24 = scalar_select %p4699_p12, 1, 0 }
  0x17   : > { %s165_s27 = sand.u32 1, %s4615_s15   ;;  %s4246_s28 = smul.u32 24, %s4704_s25 }
  0x18   : > { %s4247_s29 = smul.u32 384, %s4615_s15  ;;  %p3812_p1 = scmp.ge.s32.totalorder %s4615_s15, 1 }
  0x19   : > { %p205_p0 = scmp.lt.s32.totalorder %s4615_s15, 3  ;;  %s6227_s1 = sld [smem:[#allocation24_spill]] }
  0x1a   : > { %s169_s6 = scalar_lea.vmem [#allocation6], %s4246_s28  ;;  %s4726_s9 = scalar_lea.sflag [#allocation7], %s165_s27 }
  0x1b   : > { %s176_s7 = sshll.u32 %s169_s6, 4  ;;  %p4722_p2 = pnand %p3812_p1, %p205_p0  ;;  %s4720_s7 = int_to_ptr.vmem [resolvable:$true] %s176_s7 }
  0x1c   : > { %p4732_p4 = pneg %p4706_p13 }
  0x1d   : > { %s6228_s8 = scalar_select %p4722_p2, 1, 0 }
  0x1f   : > { %s4718_s5 = scalar_lea.hbm %s6227_s1, %s4247_s29  ;;  %s4460_s20 = scalar_lea.hbm %s6227_s1, 768 }
  0x20   : > { %s4455_s10 = scalar_lea.hbm %s4718_s5, 384  ;;  %p4461_p8 = scmp.lt.u32.totalorder %s4718_s5, %s6227_s1 }
  0x21   : > { %p4456_p3 = scmp.ne.s32.totalorder %s4718_s5, %s4455_s10  ;;  %p4462_p10 = scmp.lt.u32.totalorder %s4460_s20, %s4455_s10 }
  0x22   : > { %p4464_p0 = scmp.lt.u32.totalorder %s4455_s10, %s4718_s5 }
  0x23   : > { %p4458_p5 = pnand %p4732_p4, %p4456_p3  ;;  %p4463_p1 = por %p4462_p10, %p4461_p8 }
  0x25   : > { %p4459_p7 = pneg %p4458_p5  ;;  %p4465_p9 = por %p4464_p0, %p4463_p1 }
  0x27   : > { %p4466_p12 = pnand %p4465_p9, %p4459_p7 }
  0x29   : > { %4469 = shalt.err (!%p4466_p12)
}
  0x2a   : > { %s4470_s27 = scalar_lea.vmem %s4720_s7, 384  ;;  %s4617_s30 = smov [#allocation6]  }
  0x2b   : > { %p4471_p3 = scmp.ne.s32.totalorder %s4720_s7, %s4470_s27  ;;  %s4475_s4 = sshll.u32 %s4617_s30, 4  ;;  %s4476_s4 = int_to_ptr.vmem [resolvable:$false] %s4475_s4 }
  0x2c   : > { %s4477_s6 = scalar_lea.vmem %s4476_s4, 768  ;;  %p4478_p6 = scmp.lt.s32.totalorder %s4720_s7, %s4476_s4 }
  0x2d   : > { %p4473_p5 = pnand %p4471_p3, %p4732_p4  ;;  %p4479_p2 = scmp.lt.s32.totalorder %s4477_s6, %s4470_s27 }
  0x2f   : > { %p4474_p11 = pneg %p4473_p5  ;;  %p4480_p8 = por %p4479_p2, %p4478_p6 }
  0x31   : > { %p4481_p10 = pnand %p4480_p8, %p4474_p11 }
  0x33   : > { %4484 = shalt.err (!%p4481_p10)
}
  0x34   : > { %s4618_s10 = smov 64   ;;  %s4619_s17 = smov 4  }
  0x35   : > { %4263 = dma.hbm_to_vmem [thread:$0]  (!%p4706_p13), %s4718_s5, 384, %s4720_s7, %s4726_s9, %s4618_s10, %s4618_s10, %s4619_s17  }
  0x36   : > { %s3805_s19 = sshll.u32 %s4704_s25, 7  ;;  %s4020_s20 = sshll.u32 %s4615_s15, 11 }
  0x37   : > { %s4764_s27 = scalar_lea.hbm %s6205_s0, %s4020_s20  ;;  %s148_s30 = scalar_lea.vmem [#allocation3], %s3805_s19 }
  0x38   : > { %s155_s4 = sshll.u32 %s148_s30, 4  ;;  %s3809_s6 = sshll.u32 %s4704_s25, 8  ;;  %s4766_s4 = int_to_ptr.vmem [resolvable:$true] %s155_s4 }
  0x39   : > { %s145_s1 = scalar_lea.sflag [#allocation4], %s4704_s25  ;;  %s4485_s21 = scalar_lea.hbm %s4764_s27, 2048 }
  0x3a   : > { %p4486_p6 = scmp.ne.s32.totalorder %s4764_s27, %s4485_s21  ;;  %s4490_s20 = scalar_lea.hbm %s6205_s0, 4096 }
  0x3b   : > { %p4491_p12 = scmp.lt.u32.totalorder %s4764_s27, %s6205_s0  ;;  %p4492_p2 = scmp.lt.u32.totalorder %s4490_s20, %s4485_s21 }
  0x3c   : > { %p4488_p9 = pnand %p4486_p6, %p4732_p4  ;;  %p4494_p1 = scmp.lt.u32.totalorder %s4485_s21, %s4764_s27 }
  0x3d   : > { %p4493_p7 = por %p4492_p2, %p4491_p12 }
  0x3e   : > { %p4489_p11 = pneg %p4488_p9 }
  0x3f   : > { %p4495_p0 = por %p4494_p1, %p4493_p7 }
  0x41   : > { %p4496_p3 = pnand %p4495_p0, %p4489_p11 }
  0x43   : > { %4499 = shalt.err (!%p4496_p3)
}
  0x44   : > { %s4500_s19 = scalar_lea.vmem %s4766_s4, 2048  ;;  %s4620_s30 = smov [#allocation3]  }
  0x45   : > { %p4501_p5 = scmp.ne.s32.totalorder %s4766_s4, %s4500_s19  ;;  %s4505_s5 = sshll.u32 %s4620_s30, 4  ;;  %s4506_s5 = int_to_ptr.vmem [resolvable:$false] %s4505_s5 }
  0x46   : > { %s4507_s7 = scalar_lea.vmem %s4506_s5, 4096  ;;  %p4508_p6 = scmp.lt.s32.totalorder %s4766_s4, %s4506_s5 }
  0x47   : > { %p4503_p8 = pnand %p4501_p5, %p4732_p4  ;;  %p4509_p9 = scmp.lt.s32.totalorder %s4507_s7, %s4500_s19 }
  0x49   : > { %p4504_p10 = pneg %p4503_p8  ;;  %p4510_p12 = por %p4509_p9, %p4508_p6 }
  0x4b   : > { %p4511_p2 = pnand %p4510_p12, %p4504_p10 }
  0x4d   : > { %4514 = shalt.err (!%p4511_p2)
}
  0x4e   : > { %4260 = dma.hbm_to_vmem [thread:$0]  (!%p4706_p13), %s4764_s27, 2048, %s4766_s4, %s145_s1, %s4618_s10, %s4618_s10, %s4619_s17  }
  0x4f   : > { %s4021_s21 = sshll.u32 %s4615_s15, 12  ;;  %s190_s19 = scalar_lea.vmem [#allocation8], %s3809_s6 }
  0x50   : > { %s4800_s29 = scalar_lea.hbm %s6207_s2, %s4021_s21  ;;  %s197_s30 = sshll.u32 %s190_s19, 4  ;;  %s4804_s30 = int_to_ptr.vmem [resolvable:$true] %s197_s30 }
  0x51   : > { %s4515_s5 = scalar_lea.hbm %s4800_s29, 4096  ;;  %s4520_s17 = scalar_lea.hbm %s6207_s2, 8192 }
  0x52   : > { %p4516_p11 = scmp.ne.s32.totalorder %s4800_s29, %s4515_s5  ;;  %p4521_p0 = scmp.lt.u32.totalorder %s4800_s29, %s6207_s2 }
  0x53   : > { %p4522_p3 = scmp.lt.u32.totalorder %s4520_s17, %s4515_s5  ;;  %p4524_p8 = scmp.lt.u32.totalorder %s4515_s5, %s4800_s29 }
  0x54   : > { %p4518_p7 = pnand %p4516_p11, %p4732_p4 }
  0x55   : > { %p4523_p5 = por %p4522_p3, %p4521_p0 }
  0x56   : > { %p4519_p1 = pneg %p4518_p7 }
  0x57   : > { %p4525_p10 = por %p4524_p8, %p4523_p5 }
  0x59   : > { %p4526_p6 = pnand %p4525_p10, %p4519_p1 }
  0x5b   : > { %4529 = shalt.err (!%p4526_p6)
}
  0x5c   : > { %s4530_s25 = scalar_lea.vmem %s4804_s30, 4096  ;;  %s4621_s6 = smov [#allocation8]  }
  0x5d   : > { %p4531_p9 = scmp.ne.s32.totalorder %s4804_s30, %s4530_s25  ;;  %s4535_s7 = sshll.u32 %s4621_s6, 4  ;;  %s4536_s7 = int_to_ptr.vmem [resolvable:$false] %s4535_s7 }
  0x5e   : > { %s4537_s21 = scalar_lea.vmem %s4536_s7, 8192  ;;  %p4538_p11 = scmp.lt.s32.totalorder %s4804_s30, %s4536_s7 }
  0x5f   : > { %p4533_p12 = pnand %p4531_p9, %p4732_p4  ;;  %p4539_p7 = scmp.lt.s32.totalorder %s4537_s21, %s4530_s25 }
  0x61   : > { %p4534_p2 = pneg %p4533_p12  ;;  %p4540_p0 = por %p4539_p7, %p4538_p11 }
  0x63   : > { %p4541_p3 = pnand %p4540_p0, %p4534_p2 }
  0x65   : > { %4544 = shalt.err (!%p4541_p3)
}
  0x66   : > { %s4622_s20 = smov 128   ;;  %s4623_s28 = smov 8  }
  0x67   : > { %4266 = dma.hbm_to_vmem [thread:$0]  (!%p4706_p13), %s4800_s29, 4096, %s4804_s30, %s4726_s9, %s4622_s20, %s4622_s20, %s4623_s28  }
  0x68   : > { %p6230_p4 = scmp.ne.s32.totalorder %s6228_s8, 0 }
  0x6a   : > { %209 = sbr.rel (%p6230_p4) target bundleno = 744 (0x2e8), region = 32 }
  0x71   : > { %s4831_s11 = sand.u32 1, %s4607_s13   ;;  %p6231_p1 = scmp.ne.s32.totalorder %s6223_s22, 0 }
  0x72   : > { %s3813_s19 = sshll.u32 %s4831_s11, 7  ;;  %s212_s5 = scalar_lea.sflag [#allocation4], %s4831_s11 }
  0x73   : > { %s4835_s1 = scalar_lea.vmem [#allocation3], %s3813_s19 }
  0x74   : > { %4590 = dma.done.wait (%p6231_p1), %s212_s5, 2048  }
  0x75   : > { %4592 = vsyncadd (%p6231_p1), %s212_s5, 4294965248  ;;  %s220_s26 = sand.u32 1, %s4670_s16   ;;  %s4248_s8 = smul.u32 24, %s4831_s11 }
  0x76   : > { %s221_s9 = scalar_lea.sflag [#allocation7], %s220_s26 }
  0x77   : > { %s4843_s29 = scalar_lea.vmem [#allocation6], %s4248_s8 }
  0x78   : > { %4594 = dma.done.wait (%p6231_p1), %s221_s9, 4480  }
  0x79   : > { %4596 = vsyncadd (%p6231_p1), %s221_s9, 4294962816  ;;  %vm267_vm0 = vcmask 27648   ;;  %vm270_vm1 = vcmask 24576   ;;  %v4624_v0 = vmov 0   ;;  %vm278_vm2 = vsmask.f32 256 }
  0x7a   : > { %268 = vst.msk [vmem:[#allocation2] sm:$0xf] %vm267_vm0, %v4624_v0  ;;  %269 = vst.msk [vmem:[#allocation2 + $0x4] sm:$0xf] %vm267_vm0, %v4624_v0  ;;  %4314 = vset.pattern.permute.xlu1 %v4624_v0  ;;  %4313 = vset.pattern.permute.xlu0 %v4624_v0  ;;  %vm328_vm3 = vsmask.f32 7938 }
  0x7b   : > { %271 = vst.msk [vmem:[#allocation2 + $0x8] sm:$0x1] %vm270_vm1, %v4624_v0  ;;  %275 = vst.msk [vmem:[#allocation2 + $0xd4] sm:$0x1] %vm270_vm1, %v4624_v0  ;;  %vm1038_vm6 = vsmask.f32 7424 }
  0x7c   : > { %273 = vst.msk [vmem:[#allocation2 + $0xcc] sm:$0xf] %vm267_vm0, %v4624_v0  ;;  %274 = vst.msk [vmem:[#allocation2 + $0xd0] sm:$0xf] %vm267_vm0, %v4624_v0  ;;  %vm1311_vm7 = vcmask 1046528   ;;  %s4625_s22 = smov 8  }
  0x7d   : > { %vm4854_vm4 = vmand %vm270_vm1, %vm278_vm2  ;;  %vm410_vm8 = vsmask.f32 4368  ;;  %v280_v3 = vld [vmem:[#allocation2 + $0xc] sm:$0x1]  ;;  %v330_v4 = vld [vmem:[#allocation2 + $0x14] sm:$0x1] }
  0x7e   : > { %vm4859_vm5 = vmand %vm270_vm1, %vm328_vm3  ;;  %v378_v5 = vld [vmem:[%s4835_s1] sm:$0xf]  ;;  %v281_v11 = vsel %vm4854_vm4, 0, %v280_v3  ;;  %v379_v14 = vld [vmem:[%s4835_s1 + $0x4] sm:$0xf]  ;;  %s4626_s30 = smov 4  }
  0x7f   : > { %282 = vst [vmem:[#allocation2 + $0xc] sm:$0x1] %v281_v11  ;;  %v331_v13 = vsel %vm4859_vm5, 0, %v330_v4  ;;  %v413_v15 = vshrl.u32 %v378_v5, 16  ;;  %v416_v16 = vshll.u32 %v378_v5, 16  ;;  %v421_v24 = vshrl.u32 %v379_v14, 16  ;;  %vm4880_vm9 = vmand %vm267_vm0, %vm328_vm3 }
  0x80   : > { %332 = vst [vmem:[#allocation2 + $0x14] sm:$0x1] %v331_v13  ;;  %v283_v21 = vld [vmem:[#allocation2 + $0x18] sm:$0x1]  ;;  %v424_v25 = vshll.u32 %v379_v14, 16  ;;  %vm4889_vm10 = vmor %vm278_vm2, %vm410_vm8  ;;  %vm1392_vm11 = vcmask 31744  }
  0x81   : > { %v846_v6 = vld [vmem:[#allocation2] sm:$0xf]  ;;  %v847_v7 = vld [vmem:[#allocation2 + $0x4] sm:$0xf]  ;;  %v415_v23 = vrot.slane %v413_v15, 7  ;;  %v284_v29 = vsel %vm4854_vm4, 0, %v283_v21 }
  0x82   : > { %v4864_v8 = vcombine.low %v846_v6, %v847_v7  ;;  %v4316_v9 = vld [vmem:[#allocation2 + $0x8] ss:$0 sps:$4 sm:$0x11]   ;;  %v894_v10 = vld [vmem:[#allocation2] sm:$0xe]  ;;  %v423_v36 = vrot.slane %v421_v24, 7 }
  0x83   : > { %v3848_v12 = vcombine.low %v894_v10, %v847_v7  ;;  %v1047_v19 = vshll.u32 %v4316_v9, 16  ;;  %v1313_v20 = vrot.slane %v4316_v9, 1  ;;  %v333_v26 = vld [vmem:[#allocation2 + $0x20] sm:$0x1]  ;;  %v418_v34 = vor.u32 %v416_v16, %v415_v23  ;;  %285 = vst [vmem:[#allocation2 + $0x18] sm:$0x1] %v284_v29 }
  0x84   : > { %v1040_v17 = vshrl.u32 %v4864_v8, 16  ;;  %v1042_v18 = vshll.u32 %v4864_v8, 16  ;;  %v334_v30 = vsel %vm4859_vm5, 0, %v333_v26  ;;  %v380_v31 = vld [vmem:[%s4835_s1 + $0x8] sm:$0xf]  ;;  %v419_v35 = vrot.slane %v415_v23, 4 }
  0x85   : > { %v1312_v22 = vrot.slane %v3848_v12, 1  ;;  %v1049_v28 = vrot.slane %v1047_v19, 1  ;;  %335 = vst [vmem:[#allocation2 + $0x20] sm:$0x1] %v334_v30  ;;  %v381_v37 = vld [vmem:[%s4835_s1 + $0xc] sm:$0xf]  ;;  %v426_v45 = vor.u32 %v424_v25, %v423_v36 }
  0x86   : > { %v1044_v27 = vrot.slane %v1042_v18, 1  ;;  %v286_v38 = vld [vmem:[#allocation2 + $0x24] sm:$0x1]  ;;  %v430_v41 = vshrl.u32 %v380_v31, 16  ;;  %v433_v42 = vshll.u32 %v380_v31, 16  ;;  %v438_v43 = vshrl.u32 %v381_v37, 16 }
  0x87   : > { %v1314_v33 = vsel %vm1311_vm7, %v1312_v22, %v1313_v20  ;;  %v336_v44 = vld [vmem:[#allocation2 + $0x2c] sm:$0x1]  ;;  %v428_v46 = vrot.slane %v423_v36, 4  ;;  %v441_v47 = vshll.u32 %v381_v37, 16  ;;  %v287_v48 = vsel %vm4854_vm4, 0, %v286_v38  ;;  %s3814_s10 = sshll.u32 %s4831_s11, 8 }
  0x88   : > { %v1045_v39 = vor.u32 %v1044_v27, %v1040_v17  ;;  %1360 = vrot.lane.b32.xlu1 %v1314_v33, %s4625_s22  ;;  %v382_v49 = vld [vmem:[%s4835_s1 + $0x10] sm:$0xf]  ;;  %v734_v51 = vld [vmem:[#allocation2 + $0xc] sm:$0xf]  ;;  %v432_v52 = vrot.slane %v430_v41, 7  ;;  %v440_v53 = vrot.slane %v438_v43, 7  ;;  %v427_v55 = vsel %vm4889_vm10, %v419_v35, %v426_v45 }
  0x89   : > { %288 = vst [vmem:[#allocation2 + $0x24] sm:$0x1] %v287_v48  ;;  %v337_v54 = vsel %vm4859_vm5, 0, %v336_v44  ;;  %v735_v56 = vsel %vm4880_vm9, %v418_v34, %v734_v51  ;;  %v738_v57 = vld [vmem:[#allocation2 + $0x14] sm:$0x1]  ;;  %v447_v59 = vshrl.u32 %v382_v49, 16 }
  0x8a   : > { %v1050_v50 = vsel %vm1038_vm6, %v1045_v39, %v1049_v28  ;;  %338 = vst [vmem:[#allocation2 + $0x2c] sm:$0x1] %v337_v54  ;;  %v383_v58 = vld [vmem:[%s4835_s1 + $0x14] sm:$0xf]  ;;  %v450_v60 = vshll.u32 %v382_v49, 16  ;;  %v739_v61 = vsel %vm4854_vm4, %v428_v46, %v738_v57  ;;  %v435_v62 = vor.u32 %v433_v42, %v432_v52  ;;  %s5909_s17 = scalar_lea.vmem [#allocation8], %s3814_s10 }
  0x8b   : > { %1231 = vrot.lane.b32.xlu0 %v1050_v50, %s4626_s30  ;;  %736 = vst [vmem:[#allocation2 + $0xc] sm:$0xf] %v735_v56  ;;  %737 = vst.msk [vmem:[#allocation2 + $0x10] sm:$0xf] %vm267_vm0, %v427_v55  ;;  %v436_v63 = vrot.slane %v432_v52, 4  ;;  %v443_v0 = vor.u32 %v441_v47, %v440_v53  ;;  %v445_v5 = vrot.slane %v440_v53, 4 }
  0x8c   : > { %v289_v3 = vld [vmem:[#allocation2 + $0x30] sm:$0x1]  ;;  %v339_v4 = vld [vmem:[#allocation2 + $0x38] sm:$0x1]  ;;  %740 = vst [vmem:[#allocation2 + $0x14] sm:$0x1] %v739_v61 }
  0x8d   : > { %v449_v6 = vrot.slane %v447_v59, 7  ;;  %v455_v7 = vshrl.u32 %v383_v58, 16  ;;  %v458_v9 = vshll.u32 %v383_v58, 16  ;;  %v444_v10 = vsel %vm4889_vm10, %v436_v63, %v443_v0  ;;  %v741_v11 = vld [vmem:[#allocation2 + $0x18] sm:$0xf]  ;;  %s6079_s27 = scalar_lea.vmem [#allocation9], %s3814_s10 }
  0x8e   : > { %v745_v12 = vld [vmem:[#allocation2 + $0x20] sm:$0x1]  ;;  %v290_v13 = vsel %vm4854_vm4, 0, %v289_v3  ;;  %v340_v14 = vsel %vm4859_vm5, 0, %v339_v4  ;;  %v742_v15 = vsel %vm4880_vm9, %v435_v62, %v741_v11  ;;  %744 = vst.msk [vmem:[#allocation2 + $0x1c] sm:$0xf] %vm267_vm0, %v444_v10 }
  0x8f   : > { %v746_v16 = vsel %vm4854_vm4, %v445_v5, %v745_v12  ;;  %v452_v17 = vor.u32 %v450_v60, %v449_v6  ;;  %291 = vst [vmem:[#allocation2 + $0x30] sm:$0x1] %v290_v13  ;;  %341 = vst [vmem:[#allocation2 + $0x38] sm:$0x1] %v340_v14  ;;  %v292_v18 = vld [vmem:[#allocation2 + $0x3c] sm:$0x1] }
  0x90   : > { %743 = vst [vmem:[#allocation2 + $0x18] sm:$0xf] %v742_v15  ;;  %747 = vst [vmem:[#allocation2 + $0x20] sm:$0x1] %v746_v16  ;;  %v453_v19 = vrot.slane %v449_v6, 4  ;;  %v457_v20 = vrot.slane %v455_v7, 7 }
  0x91   : > { %v342_v21 = vld [vmem:[#allocation2 + $0x44] sm:$0x1]  ;;  %v4920_v23 = vld [vmem:[%s4835_s1 + $0x18] sm:$0xf]  ;;  %v293_v24 = vsel %vm4854_vm4, 0, %v292_v18  ;;  %vm1425_vm12 = vcmask 64512  }
  0x92   : > { %v748_v22 = vld [vmem:[#allocation2 + $0x24] sm:$0xf]  ;;  %v343_v25 = vsel %vm4859_vm5, 0, %v342_v21  ;;  %v460_v26 = vor.u32 %v458_v9, %v457_v20  ;;  %v462_v27 = vrot.slane %v457_v20, 4  ;;  %v752_v29 = vld [vmem:[#allocation2 + $0x2c] sm:$0x1] }
  0x93   : > { %v749_v28 = vsel %vm4880_vm9, %v452_v17, %v748_v22  ;;  %v4929_v30 = vld [vmem:[%s4835_s1 + $0x1c] sm:$0xf]  ;;  %294 = vst [vmem:[#allocation2 + $0x3c] sm:$0x1] %v293_v24  ;;  %344 = vst [vmem:[#allocation2 + $0x44] sm:$0x1] %v343_v25 }
  0x94   : > { %v1460_v31 = vld [vmem:[#allocation2 + $0xc] sm:$0xf]  ;;  %v1461_v33 = vld [vmem:[#allocation2 + $0x10] sm:$0xf]  ;;  %750 = vst [vmem:[#allocation2 + $0x24] sm:$0xf] %v749_v28  ;;  %v461_v37 = vsel %vm4889_vm10, %v453_v19, %v460_v26  ;;  %v753_v38 = vsel %vm4854_vm4, %v462_v27, %v752_v29 }
  0x95   : > { %v1508_v34 = vld [vmem:[#allocation2 + $0xc] sm:$0xe]  ;;  %v4318_v35 = vld [vmem:[#allocation2 + $0x14] ss:$0 sps:$4 sm:$0x11]   ;;  %v4935_v39 = vcombine.low %v1460_v31, %v1461_v33  ;;  %v464_v42 = vshrl.u32 %v4920_v23, 16 }
  0x96   : > { %v3896_v36 = vcombine.low %v1508_v34, %v1461_v33  ;;  %v849_v41 = vld [vmem:[#allocation2 + $0x10] sm:$0xf]  ;;  %751 = vst.msk [vmem:[#allocation2 + $0x28] sm:$0xf] %vm267_vm0, %v461_v37  ;;  %754 = vst [vmem:[#allocation2 + $0x2c] sm:$0x1] %v753_v38 }
  0x97   : > { %v1925_v44 = vrot.slane %v4318_v35, 1  ;;  %v895_v45 = vld [vmem:[#allocation2 + $0xc] sm:$0xe]  ;;  %v1463_v46 = vld [vmem:[#allocation2 + $0x1c] sm:$0xf]  ;;  %v467_v49 = vshll.u32 %v4920_v23, 16 }
  0x98   : > { %v1924_v43 = vrot.slane %v3896_v36, 1  ;;  %v4939_v47 = vld [vmem:[#allocation2 + $0x14] ss:$0 sps:$4 sm:$0x11]   ;;  %v3849_v48 = vcombine.low %v895_v45, %v849_v41  ;;  %v472_v50 = vshrl.u32 %v4929_v30, 16  ;;  %v475_v51 = vshll.u32 %v4929_v30, 16 }
  0x99   : > { %v1462_v53 = vld [vmem:[#allocation2 + $0x18] sm:$0xf]  ;;  %v1316_v56 = vrot.slane %v4939_v47, 1  ;;  %v4324_v57 = vld [vmem:[#allocation2 + $0x20] ss:$0 sps:$4 sm:$0x11]  }
  0x9a   : > { %v1926_v52 = vsel %vm1311_vm7, %v1924_v43, %v1925_v44  ;;  %v1509_v54 = vld [vmem:[#allocation2 + $0x18] sm:$0xe]  ;;  %v1315_v55 = vrot.slane %v3849_v48, 1  ;;  %v1655_v59 = vshll.u32 %v4935_v39, 16  ;;  %v848_v60 = vld [vmem:[#allocation2 + $0xc] sm:$0xf]  ;;  %v4953_v14 = vcombine.low %v1462_v53, %v1463_v46 }
  0x9b   : > { %1972 = vrot.lane.b32.xlu1 %v1926_v52, %s4625_s22  ;;  %v3897_v58 = vcombine.low %v1509_v54, %v1463_v46  ;;  %v897_v61 = vld [vmem:[#allocation2 + $0x24] sm:$0xe]  ;;  %v851_v62 = vld [vmem:[#allocation2 + $0x1c] sm:$0xf]  ;;  %v1653_v63 = vshrl.u32 %v4935_v39, 16  ;;  %v4949_v0 = vrot.slane %v464_v42, 7  ;;  %v4960_v24 = vcombine.low %v848_v60, %v849_v41 }
  0x9c   : > { %v1317_v3 = vsel %vm1311_vm7, %v1315_v55, %v1316_v56  ;;  %v1928_v5 = vrot.slane %v4324_v57, 1  ;;  %v852_v6 = vld [vmem:[#allocation2 + $0x24] sm:$0xf]  ;;  %v850_v7 = vld [vmem:[#allocation2 + $0x18] sm:$0xf]  ;;  %v1657_v12 = vrot.slane %v1655_v59, 1 }
  0x9d   : > { %v1927_v4 = vrot.slane %v3897_v58, 1  ;;  %v896_v9 = vld [vmem:[#allocation2 + $0x18] sm:$0xe]  ;;  %1362 = vrot.lane.b32.xlu0 %v1317_v3, %s4625_s22  ;;  %v853_v10 = vld [vmem:[#allocation2 + $0x28] sm:$0xf]  ;;  %v1660_v13 = vshll.u32 %v4318_v35, 16  ;;  %v469_v23 = vor.u32 %v467_v49, %v4949_v0  ;;  %v4965_v29 = vcombine.low %v850_v7, %v851_v62 }
  0x9e   : > { %v3850_v11 = vcombine.low %v896_v9, %v851_v62  ;;  %v4956_v16 = vld [vmem:[#allocation2 + $0x2c] ss:$0 sps:$4 sm:$0x11]   ;;  %v3851_v17 = vcombine.low %v897_v61, %v853_v10  ;;  %v4330_v18 = vld [vmem:[#allocation2 + $0x20] ss:$0 sps:$4 sm:$0x11]   ;;  %v1658_v20 = vor.u32 %v1657_v12, %v1653_v63  ;;  %v4963_v28 = vcombine.low %v852_v6, %v853_v10 }
  0x9f   : > { %v1929_v15 = vsel %vm1311_vm7, %v1927_v4, %v1928_v5  ;;  %v1662_v21 = vrot.slane %v1660_v13, 1  ;;  %v1465_v22 = vld [vmem:[#allocation2 + $0x28] sm:$0xf]  ;;  %v1322_v26 = vrot.slane %v4956_v16, 1  ;;  %v1319_v27 = vrot.slane %v4330_v18, 1  ;;  %s4022_s4 = sshll.u32 %s4670_s16, 12 }
  0xa0   : > { %1974 = vrot.lane.b32.xlu1 %v1929_v15, %s4625_s22  ;;  %v1318_v19 = vrot.slane %v3850_v11, 1  ;;  %v1321_v25 = vrot.slane %v3851_v17, 1  ;;  %v1510_v33 = vld [vmem:[#allocation2 + $0x24] sm:$0xe]  ;;  %v1665_v35 = vshrl.u32 %v4953_v14, 16  ;;  %v1667_v41 = vshll.u32 %v4953_v14, 16  ;;  %s6152_s16 = scalar_lea.hbm %s6208_s3, %s4022_s4 }
  0xa1   : > { %v1663_v31 = vsel %vm1038_vm6, %v1658_v20, %v1662_v21  ;;  %v4968_v34 = vld [vmem:[#allocation2 + $0x2c] ss:$0 sps:$4 sm:$0x11]   ;;  %v3898_v38 = vcombine.low %v1510_v33, %v1465_v22  ;;  %v755_v42 = vld [vmem:[#allocation2 + $0x30] sm:$0xf]  ;;  %v1672_v45 = vshll.u32 %v4324_v57, 16 }
  0xa2   : > { %v1323_v36 = vsel %vm1311_vm7, %v1321_v25, %v1322_v26  ;;  %v1320_v37 = vsel %vm1311_vm7, %v1318_v19, %v1319_v27  ;;  %v1464_v43 = vld [vmem:[#allocation2 + $0x24] sm:$0xf]  ;;  %v1931_v44 = vrot.slane %v4968_v34, 1  ;;  %v470_v46 = vrot.slane %v4949_v0, 4  ;;  %v759_v54 = vld [vmem:[#allocation2 + $0x38] sm:$0x1] }
  0xa3   : > { %1366 = vrot.lane.b32.xlu0 %v1323_v36, %s4625_s22  ;;  %v474_v48 = vrot.slane %v472_v50, 7  ;;  %v1930_v49 = vrot.slane %v3898_v38, 1  ;;  %v1669_v52 = vrot.slane %v1667_v41, 1  ;;  %v756_v53 = vsel %vm4880_vm9, %v469_v23, %v755_v42  ;;  %v386_v11 = vld [vmem:[%s4835_s1 + $0x20] sm:$0xf]  ;;  %s3686_s25 = sshll.u32 %s6079_s27, 4  ;;  %s6156_s25 = int_to_ptr.vmem [resolvable:$true] %s3686_s25 }
  0xa4   : > { %1364 = vrot.lane.b32.xlu1 %v1320_v37, %s4625_s22  ;;  %v1064_v55 = vshrl.u32 %v4965_v29, 16  ;;  %v1674_v56 = vrot.slane %v1672_v45, 1  ;;  %757 = vst [vmem:[#allocation2 + $0x30] sm:$0xf] %v756_v53  ;;  %v1066_v60 = vshll.u32 %v4965_v29, 16  ;;  %v4984_v57 = vcombine.low %v1464_v43, %v1465_v22  ;;  %s3673_s21 = scalar_lea.sflag [#allocation5], %s4831_s11 }
  0xa5   : > { %v477_v58 = vor.u32 %v475_v51, %v474_v48  ;;  %v479_v59 = vrot.slane %v474_v48, 4  ;;  %v1932_v50 = vsel %vm1311_vm7, %v1930_v49, %v1931_v44  ;;  %v1670_v61 = vor.u32 %v1669_v52, %v1665_v35  ;;  %v387_v15 = vld [vmem:[%s4835_s1 + $0x24] sm:$0xf]  ;;  %v295_v17 = vld [vmem:[#allocation2 + $0x48] sm:$0x1]  ;;  %s4545_s20 = scalar_lea.vmem %s6156_s25, 4096 }
  0xa6   : > { %v1071_v62 = vshll.u32 %v4330_v18, 16  ;;  %v1068_v51 = vrot.slane %v1066_v60, 1  ;;  %v1054_v0 = vshll.u32 %v4960_v24, 16  ;;  %v1059_v5 = vshll.u32 %v4939_v47, 16  ;;  %v345_v21 = vld [vmem:[#allocation2 + $0x50] sm:$0x1]  ;;  %p4546_p13 = scmp.ne.s32.totalorder %s6156_s25, %s4545_s20 }
  0xa7   : > { %1844 = vrot.lane.b32.xlu0 %v1663_v31, %s4626_s30  ;;  %v478_v63 = vsel %vm4889_vm10, %v470_v46, %v477_v58  ;;  %v760_v30 = vsel %vm4854_vm4, %v479_v59, %v759_v54  ;;  %v1675_v3 = vsel %vm1038_vm6, %v1670_v61, %v1674_v56  ;;  %v1076_v7 = vshrl.u32 %v4963_v28, 16  ;;  %v762_v41 = vld [vmem:[#allocation2 + $0x3c] sm:$0xf]  ;;  %p6262_p5 = scmp.ne.s32.totalorder %s6224_s23, 0  ;;  %s4627_s28 = smov [#allocation9]  }
  0xa8   : > { %1976 = vrot.lane.b32.xlu1 %v1932_v50, %s4625_s22  ;;  %758 = vst.msk [vmem:[#allocation2 + $0x34] sm:$0xf] %vm267_vm0, %v478_v63  ;;  %761 = vst [vmem:[#allocation2 + $0x38] sm:$0x1] %v760_v30  ;;  %v1073_v4 = vrot.slane %v1071_v62, 1  ;;  %v1069_v6 = vor.u32 %v1068_v51, %v1064_v55  ;;  %v1078_v9 = vshll.u32 %v4963_v28, 16 }
  0xa9   : > { %v1083_v10 = vshll.u32 %v4956_v16, 16  ;;  %v1679_v12 = vshll.u32 %v4984_v57, 16  ;;  %v1684_v13 = vshll.u32 %v4968_v34, 16  ;;  %v1052_v18 = vshrl.u32 %v4960_v24, 16  ;;  %p4547_p8 = pnand %p4546_p13, %p6262_p5  ;;  %s4549_s19 = sshll.u32 %s4627_s28, 4  ;;  %s4550_s19 = int_to_ptr.vmem [resolvable:$false] %s4549_s19 }
  0xaa   : > { %v1056_v19 = vrot.slane %v1054_v0, 1  ;;  %v1061_v47 = vrot.slane %v1059_v5, 1  ;;  %v1080_v20 = vrot.slane %v1078_v9, 1  ;;  %v1074_v25 = vsel %vm1038_vm6, %v1069_v6, %v1073_v4  ;;  %v766_v0 = vld [vmem:[#allocation2 + $0x44] sm:$0x1]  ;;  %s4551_s5 = scalar_lea.vmem %s4550_s19, 8192  ;;  %p4552_p6 = scmp.lt.s32.totalorder %s6156_s25, %s4550_s19 }
  0xab   : > { %1846 = vrot.lane.b32.xlu0 %v1675_v3, %s4626_s30  ;;  %v1466_v22 = vld [vmem:[#allocation2 + $0x30] sm:$0xf]  ;;  %v1085_v16 = vrot.slane %v1083_v10, 1  ;;  %v1677_v26 = vshrl.u32 %v4984_v57, 16  ;;  %v1681_v31 = vrot.slane %v1679_v12, 1  ;;  %v481_v33 = vshrl.u32 %v386_v11, 16  ;;  %p4548_p10 = pneg %p4547_p8  ;;  %p4553_p9 = scmp.lt.s32.totalorder %s4551_s5, %s4545_s20 }
  0xac   : > { %v1511_v23 = vld [vmem:[#allocation2 + $0x30] sm:$0xe]  ;;  %v1081_v27 = vor.u32 %v1080_v20, %v1076_v7  ;;  %v484_v34 = vshll.u32 %v386_v11, 16  ;;  %v5008_v36 = vrot.slane %v1684_v13, 1  ;;  %v489_v37 = vshrl.u32 %v387_v15, 16 }
  0xad   : > { %v854_v35 = vld [vmem:[#allocation2 + $0x30] sm:$0xf]  ;;  %v492_v38 = vshll.u32 %v387_v15, 16  ;;  %v296_v43 = vsel %vm4854_vm4, 0, %v295_v17  ;;  %v1057_v45 = vor.u32 %v1056_v19, %v1052_v18  ;;  %v483_v46 = vrot.slane %v481_v33, 7  ;;  %p4554_p12 = por %p4553_p9, %p4552_p6 }
  0xae   : > { %v898_v42 = vld [vmem:[#allocation2 + $0x30] sm:$0xe]  ;;  %297 = vst [vmem:[#allocation2 + $0x48] sm:$0x1] %v296_v43  ;;  %v346_v48 = vsel %vm4859_vm5, 0, %v345_v21  ;;  %v1086_v54 = vsel %vm1038_vm6, %v1081_v27, %v1085_v16  ;;  %v491_v55 = vrot.slane %v489_v37, 7 }
  0xaf   : > { %v1467_v44 = vld [vmem:[#allocation2 + $0x34] sm:$0xf]  ;;  %1235 = vrot.lane.b32.xlu0 %v1074_v25, %s4626_s30  ;;  %v4336_v52 = vld [vmem:[#allocation2 + $0x38] ss:$0 sps:$4 sm:$0x11]   ;;  %v486_v58 = vor.u32 %v484_v34, %v483_v46  ;;  %v487_v59 = vrot.slane %v483_v46, 4  ;;  %v1062_v21 = vsel %vm1038_vm6, %v1057_v45, %v1061_v47  ;;  %p4555_p2 = pnand %p4554_p12, %p4548_p10 }
  0xb0   : > { %v5015_v49 = vcombine.low %v1466_v22, %v1467_v44  ;;  %v3899_v53 = vcombine.low %v1511_v23, %v1467_v44  ;;  %v855_v56 = vld [vmem:[#allocation2 + $0x34] sm:$0xf]  ;;  %347 = vst [vmem:[#allocation2 + $0x50] sm:$0x1] %v346_v48  ;;  %v1934_v63 = vrot.slane %v4336_v52, 1  ;;  %v1696_v3 = vshll.u32 %v4336_v52, 16 }
  0xb1   : > { %v5018_v60 = vcombine.low %v854_v35, %v855_v56  ;;  %v5020_v50 = vld [vmem:[#allocation2 + $0x38] ss:$0 sps:$4 sm:$0x11]   ;;  %v3852_v61 = vcombine.low %v898_v42, %v855_v56  ;;  %v494_v4 = vor.u32 %v492_v38, %v491_v55  ;;  %v496_v5 = vrot.slane %v491_v55, 4  ;;  %v388_v7 = vld [vmem:[%s4835_s1 + $0x28] sm:$0xf] }
  0xb2   : > { %v1933_v62 = vrot.slane %v3899_v53, 1  ;;  %v1689_v30 = vshrl.u32 %v5015_v49, 16  ;;  %v1691_v51 = vshll.u32 %v5015_v49, 16  ;;  %v763_v6 = vsel %vm4880_vm9, %v486_v58, %v762_v41  ;;  %v389_v13 = vld [vmem:[%s4835_s1 + $0x2c] sm:$0xf] }
  0xb3   : > { %1237 = vrot.lane.b32.xlu0 %v1086_v54, %s4626_s30  ;;  %764 = vst [vmem:[#allocation2 + $0x3c] sm:$0xf] %v763_v6  ;;  %v1088_v11 = vshrl.u32 %v5018_v60, 16  ;;  %v1090_v12 = vshll.u32 %v5018_v60, 16  ;;  %v1698_v15 = vrot.slane %v1696_v3, 1  ;;  %v495_v17 = vsel %vm4889_vm10, %v487_v59, %v494_v4 }
  0xb4   : > { %v1935_v9 = vsel %vm1311_vm7, %v1933_v62, %v1934_v63  ;;  %v1693_v10 = vrot.slane %v1691_v51, 1  ;;  %v767_v18 = vsel %vm4854_vm4, %v496_v5, %v766_v0  ;;  %v1095_v19 = vshll.u32 %v5020_v50, 16  ;;  %v298_v20 = vld [vmem:[#allocation2 + $0x54] sm:$0x1]  ;;  %765 = vst.msk [vmem:[#allocation2 + $0x40] sm:$0xf] %vm267_vm0, %v495_v17 }
  0xb5   : > { %1978 = vrot.lane.b32.xlu1 %v1935_v9, %s4625_s22  ;;  %v1682_v22 = vor.u32 %v1681_v31, %v1677_v26  ;;  %768 = vst [vmem:[#allocation2 + $0x44] sm:$0x1] %v767_v18  ;;  %v1092_v25 = vrot.slane %v1090_v12, 1  ;;  %v348_v16 = vld [vmem:[#allocation2 + $0x5c] sm:$0x1]  ;;  %v498_v34 = vshrl.u32 %v388_v7, 16 }
  0xb6   : > { %v1694_v23 = vor.u32 %v1693_v10, %v1689_v30  ;;  %v390_v27 = vld [vmem:[%s4835_s1 + $0x30] sm:$0xf]  ;;  %v1097_v33 = vrot.slane %v1095_v19, 1  ;;  %v501_v35 = vshll.u32 %v388_v7, 16  ;;  %v506_v37 = vshrl.u32 %v389_v13, 16 }
  0xb7   : > { %v5042_v38 = vld [vmem:[%s4835_s1 + $0x34] sm:$0xf]  ;;  %v1093_v42 = vor.u32 %v1092_v25, %v1088_v11  ;;  %v5045_v43 = vrot.slane %v3852_v61, 1  ;;  %v509_v47 = vshll.u32 %v389_v13, 16  ;;  %v500_v26 = vrot.slane %v498_v34, 7 }
  0xb8   : > { %v1699_v41 = vsel %vm1038_vm6, %v1694_v23, %v1698_v15  ;;  %v508_v31 = vrot.slane %v506_v37, 7  ;;  %v299_v44 = vsel %vm4854_vm4, 0, %v298_v20  ;;  %v349_v45 = vsel %vm4859_vm5, 0, %v348_v16  ;;  %v769_v52 = vld [vmem:[#allocation2 + $0x48] sm:$0xf] }
  0xb9   : > { %1233 = vrot.lane.b32.xlu1 %v1062_v21, %s4626_s30  ;;  %1850 = vrot.lane.b32.xlu0 %v1699_v41, %s4626_s30  ;;  %v1687_v46 = vsel %vm1038_vm6, %v1682_v22, %v5008_v36  ;;  %v1098_v48 = vsel %vm1038_vm6, %v1093_v42, %v1097_v33  ;;  %v773_v53 = vld [vmem:[#allocation2 + $0x50] sm:$0x1]  ;;  %300 = vst [vmem:[#allocation2 + $0x54] sm:$0x1] %v299_v44  ;;  %350 = vst [vmem:[#allocation2 + $0x5c] sm:$0x1] %v349_v45 }
  0xba   : > { %v515_v54 = vshrl.u32 %v390_v27, 16  ;;  %v523_v55 = vshrl.u32 %v5042_v38, 16  ;;  %v1468_v56 = vld [vmem:[#allocation2 + $0x3c] sm:$0xf]  ;;  %v503_v61 = vor.u32 %v501_v35, %v500_v26  ;;  %v511_v62 = vor.u32 %v509_v47, %v508_v31 }
  0xbb   : > { %v856_v58 = vld [vmem:[#allocation2 + $0x3c] sm:$0xf]  ;;  %v504_v63 = vrot.slane %v500_v26, 4  ;;  %v513_v30 = vrot.slane %v508_v31, 4  ;;  %v518_v3 = vshll.u32 %v390_v27, 16  ;;  %v1325_v12 = vrot.slane %v5020_v50, 1 }
  0xbc   : > { %v1512_v59 = vld [vmem:[#allocation2 + $0x3c] sm:$0xe]  ;;  %v517_v0 = vrot.slane %v515_v54, 7  ;;  %v1469_v36 = vld [vmem:[#allocation2 + $0x40] sm:$0xf]  ;;  %v770_v5 = vsel %vm4880_vm9, %v503_v61, %v769_v52  ;;  %v525_v18 = vrot.slane %v523_v55, 7 }
  0xbd   : > { %v899_v51 = vld [vmem:[#allocation2 + $0x3c] sm:$0xe]  ;;  %1848 = vrot.lane.b32.xlu1 %v1687_v46, %s4626_s30  ;;  %1239 = vrot.lane.b32.xlu0 %v1098_v48, %s4626_s30  ;;  %v857_v4 = vld [vmem:[#allocation2 + $0x40] sm:$0xf]  ;;  %v5061_v6 = vcombine.low %v1468_v56, %v1469_v36  ;;  %v3900_v10 = vcombine.low %v1512_v59, %v1469_v36  ;;  %v512_v11 = vsel %vm4889_vm10, %v504_v63, %v511_v62  ;;  %v526_v26 = vshll.u32 %v5042_v38, 16 }
  0xbe   : > { %v5063_v7 = vld [vmem:[#allocation2 + $0x44] ss:$0 sps:$4 sm:$0x11]   ;;  %v5065_v9 = vcombine.low %v856_v58, %v857_v4  ;;  %771 = vst [vmem:[#allocation2 + $0x48] sm:$0xf] %v770_v5  ;;  %v774_v15 = vsel %vm4854_vm4, %v513_v30, %v773_v53  ;;  %v3853_v17 = vcombine.low %v899_v51, %v857_v4  ;;  %v520_v22 = vor.u32 %v518_v3, %v517_v0 }
  0xbf   : > { %v5070_v13 = vld [vmem:[#allocation2 + $0x44] ss:$0 sps:$4 sm:$0x11]   ;;  %772 = vst.msk [vmem:[#allocation2 + $0x4c] sm:$0xf] %vm267_vm0, %v512_v11  ;;  %v1701_v19 = vshrl.u32 %v5061_v6, 16  ;;  %v528_v56 = vor.u32 %v526_v26, %v525_v18  ;;  %v1326_v4 = vsel %vm1311_vm7, %v5045_v43, %v1325_v12 }
  0xc0   : > { %v1703_v20 = vshll.u32 %v5061_v6, 16  ;;  %v1708_v21 = vshll.u32 %v5063_v7, 16  ;;  %775 = vst [vmem:[#allocation2 + $0x50] sm:$0x1] %v774_v15  ;;  %v1100_v23 = vshrl.u32 %v5065_v9, 16  ;;  %v1102_v50 = vshll.u32 %v5065_v9, 16 }
  0xc1   : > { %v1107_v25 = vshll.u32 %v5070_v13, 16  ;;  %v521_v16 = vrot.slane %v517_v0, 4  ;;  %v776_v27 = vld [vmem:[#allocation2 + $0x54] sm:$0xf]  ;;  %v1936_v35 = vrot.slane %v3900_v10, 1  ;;  %v1937_v37 = vrot.slane %v5063_v7, 1 }
  0xc2   : > { %v1705_v33 = vrot.slane %v1703_v20, 1  ;;  %v1710_v34 = vrot.slane %v1708_v21, 1  ;;  %v1104_v41 = vrot.slane %v1102_v50, 1  ;;  %v5082_v47 = vrot.slane %v3853_v17, 1  ;;  %v780_v31 = vld [vmem:[#allocation2 + $0x5c] sm:$0x1] }
  0xc3   : > { %v1109_v42 = vrot.slane %v1107_v25, 1  ;;  %v1328_v45 = vrot.slane %v5070_v13, 1  ;;  %v530_v46 = vrot.slane %v525_v18, 4  ;;  %v777_v48 = vsel %vm4880_vm9, %v520_v22, %v776_v27  ;;  %v301_v52 = vld [vmem:[#allocation2 + $0x60] sm:$0x1] }
  0xc4   : > { %v1706_v44 = vor.u32 %v1705_v33, %v1701_v19  ;;  %v1105_v53 = vor.u32 %v1104_v41, %v1100_v23  ;;  %778 = vst [vmem:[#allocation2 + $0x54] sm:$0xf] %v777_v48  ;;  %v529_v36 = vsel %vm4889_vm10, %v521_v16, %v528_v56  ;;  %v302_v11 = vsel %vm4854_vm4, 0, %v301_v52  ;;  %v351_v15 = vld [vmem:[#allocation2 + $0x68] sm:$0x1] }
  0xc5   : > { %v1470_v54 = vld [vmem:[#allocation2 + $0x48] sm:$0xf]  ;;  %v781_v38 = vsel %vm4854_vm4, %v530_v46, %v780_v31  ;;  %779 = vst.msk [vmem:[#allocation2 + $0x58] sm:$0xf] %vm267_vm0, %v529_v36  ;;  %v392_v17 = vld [vmem:[%s4835_s1 + $0x38] sm:$0xf]  ;;  %v1938_v27 = vsel %vm1311_vm7, %v1936_v35, %v1937_v37 }
  0xc6   : > { %v1513_v55 = vld [vmem:[#allocation2 + $0x48] sm:$0xe]  ;;  %v1711_v59 = vsel %vm1038_vm6, %v1706_v44, %v1710_v34  ;;  %v1471_v61 = vld [vmem:[#allocation2 + $0x4c] sm:$0xf]  ;;  %v1110_v30 = vsel %vm1038_vm6, %v1105_v53, %v1109_v42  ;;  %782 = vst [vmem:[#allocation2 + $0x5c] sm:$0x1] %v781_v38 }
  0xc7   : > { %v858_v58 = vld [vmem:[#allocation2 + $0x48] sm:$0xf]  ;;  %v859_v62 = vld [vmem:[#allocation2 + $0x4c] sm:$0xf]  ;;  %1852 = vrot.lane.b32.xlu1 %v1711_v59, %s4626_s30  ;;  %v5093_v51 = vcombine.low %v1470_v54, %v1471_v61  ;;  %v3901_v3 = vcombine.low %v1513_v55, %v1471_v61  ;;  %1241 = vrot.lane.b32.xlu0 %v1110_v30, %s4626_s30  ;;  %303 = vst [vmem:[#allocation2 + $0x60] sm:$0x1] %v302_v11 }
  0xc8   : > { %v900_v63 = vld [vmem:[#allocation2 + $0x48] sm:$0xe]  ;;  %v4347_v0 = vld [vmem:[#allocation2 + $0x50] ss:$0 sps:$4 sm:$0x11]   ;;  %v5101_v5 = vcombine.low %v858_v58, %v859_v62  ;;  %v352_v56 = vsel %vm4859_vm5, 0, %v351_v15 }
  0xc9   : > { %v5103_v7 = vld [vmem:[#allocation2 + $0x50] ss:$0 sps:$4 sm:$0x11]   ;;  %v3854_v10 = vcombine.low %v900_v63, %v859_v62  ;;  %v1713_v18 = vshrl.u32 %v5093_v51, 16  ;;  %v1715_v19 = vshll.u32 %v5093_v51, 16  ;;  %v1720_v20 = vshll.u32 %v4347_v0, 16 }
  0xca   : > { %v1939_v43 = vrot.slane %v3901_v3, 1  ;;  %v2476_v12 = vld [vmem:[#allocation2 + $0x18] sm:$0xf]  ;;  %v5110_v21 = vld [vmem:[#allocation2 + $0x1c] sm:$0xf]  ;;  %v1940_v22 = vrot.slane %v4347_v0, 1  ;;  %v1329_v62 = vsel %vm1311_vm7, %v5082_v47, %v1328_v45 }
  0xcb   : > { %v1112_v23 = vshrl.u32 %v5101_v5, 16  ;;  %v1114_v50 = vshll.u32 %v5101_v5, 16  ;;  %v1119_v25 = vshll.u32 %v5103_v7, 16  ;;  %v5115_v16 = vld [vmem:[#allocation2 + $0x18] sm:$0xe]  ;;  %1368 = vrot.lane.b32.xlu1 %v1326_v4, %s4625_s22  ;;  %v1717_v33 = vrot.slane %v1715_v19, 1 }
  0xcc   : > { %v1722_v34 = vrot.slane %v1720_v20, 1  ;;  %v2478_v41 = vld [vmem:[#allocation2 + $0x24] sm:$0xf]  ;;  %v5119_v42 = vld [vmem:[#allocation2 + $0x28] sm:$0xf]  ;;  %v1330_v46 = vrot.slane %v3854_v10, 1  ;;  %v5128_v59 = vcombine.low %v2476_v12, %v5110_v21  ;;  %v1941_v38 = vsel %vm1311_vm7, %v1939_v43, %v1940_v22 }
  0xcd   : > { %v1472_v26 = vld [vmem:[#allocation2 + $0x54] sm:$0xf]  ;;  %v1116_v31 = vrot.slane %v1114_v50, 1  ;;  %v1121_v44 = vrot.slane %v1119_v25, 1  ;;  %v1331_v48 = vrot.slane %v5103_v7, 1  ;;  %v1718_v53 = vor.u32 %v1717_v33, %v1713_v18 }
  0xce   : > { %v393_v52 = vld [vmem:[%s4835_s1 + $0x3c] sm:$0xf]  ;;  %v532_v58 = vshrl.u32 %v392_v17, 16  ;;  %v5125_v35 = vld [vmem:[#allocation2 + $0x5c] ss:$0 sps:$4 sm:$0x11]   ;;  %v3980_v0 = vcombine.low %v5115_v16, %v5110_v21  ;;  %v5151_v13 = vcombine.low %v2478_v41, %v5119_v42 }
  0xcf   : > { %v860_v54 = vld [vmem:[#allocation2 + $0x54] sm:$0xf]  ;;  %353 = vst [vmem:[#allocation2 + $0x68] sm:$0x1] %v352_v56  ;;  %v535_v37 = vshll.u32 %v392_v17, 16  ;;  %1980 = vrot.lane.b32.xlu1 %v1938_v27, %s4625_s22  ;;  %v1723_v61 = vsel %vm1038_vm6, %v1718_v53, %v1722_v34  ;;  %v1732_v36 = vshll.u32 %v5125_v35, 16  ;;  %v1117_v47 = vor.u32 %v1116_v31, %v1112_v23 }
  0xd0   : > { %v1514_v55 = vld [vmem:[#allocation2 + $0x54] sm:$0xe]  ;;  %v1473_v63 = vld [vmem:[#allocation2 + $0x58] sm:$0xf]  ;;  %1854 = vrot.lane.b32.xlu0 %v1723_v61, %s4626_s30  ;;  %v534_v10 = vrot.slane %v532_v58, 7  ;;  %v540_v11 = vshrl.u32 %v393_v52, 16 }
  0xd1   : > { %v5137_v30 = vld [vmem:[#allocation2 + $0x58] sm:$0xf]  ;;  %v5142_v3 = vcombine.low %v1472_v26, %v1473_v63  ;;  %v5148_v7 = vld [vmem:[#allocation2 + $0x5c] ss:$0 sps:$4 sm:$0x11]   ;;  %v3902_v45 = vcombine.low %v1514_v55, %v1473_v63  ;;  %v1734_v18 = vrot.slane %v1732_v36, 1  ;;  %v1122_v26 = vsel %vm1038_vm6, %v1117_v47, %v1121_v44 }
  0xd2   : > { %v5146_v4 = vcombine.low %v860_v54, %v5137_v30  ;;  %v1943_v19 = vrot.slane %v5125_v35, 1  ;;  %v783_v20 = vld [vmem:[#allocation2 + $0x60] sm:$0xf]  ;;  %v1131_v22 = vshll.u32 %v5148_v7, 16  ;;  %v537_v23 = vor.u32 %v535_v37, %v534_v10  ;;  %v901_v41 = vld [vmem:[#allocation2 + $0x54] sm:$0xe] }
  0xd3   : > { %v1725_v15 = vshrl.u32 %v5142_v3, 16  ;;  %v1727_v17 = vshll.u32 %v5142_v3, 16  ;;  %1982 = vrot.lane.b32.xlu1 %v1941_v38, %s4625_s22  ;;  %v5160_v50 = vld [vmem:[#allocation2 + $0x20] ss:$0 sps:$4 sm:$0x11]   ;;  %v538_v27 = vrot.slane %v534_v10, 4  ;;  %v1332_v38 = vsel %vm1311_vm7, %v1330_v46, %v1331_v48 }
  0xd4   : > { %v1124_v43 = vshrl.u32 %v5146_v4, 16  ;;  %v1126_v12 = vshll.u32 %v5146_v4, 16  ;;  %1370 = vrot.lane.b32.xlu0 %v1329_v62, %s4625_s22  ;;  %v542_v33 = vrot.slane %v540_v11, 7  ;;  %v543_v34 = vshll.u32 %v393_v52, 16  ;;  %v304_v61 = vld [vmem:[#allocation2 + $0x6c] sm:$0x1] }
  0xd5   : > { %v1729_v25 = vrot.slane %v1727_v17, 1  ;;  %v1133_v53 = vrot.slane %v1131_v22, 1  ;;  %v784_v54 = vsel %vm4880_vm9, %v537_v23, %v783_v20  ;;  %v1942_v58 = vrot.slane %v3902_v45, 1  ;;  %v354_v63 = vld [vmem:[#allocation2 + $0x74] sm:$0x1] }
  0xd6   : > { %v1128_v31 = vrot.slane %v1126_v12, 1  ;;  %v787_v55 = vld [vmem:[#allocation2 + $0x68] sm:$0x1]  ;;  %v545_v35 = vor.u32 %v543_v34, %v542_v33  ;;  %v547_v37 = vrot.slane %v542_v33, 4  ;;  %785 = vst [vmem:[#allocation2 + $0x60] sm:$0xf] %v784_v54  ;;  %v3855_v46 = vcombine.low %v901_v41, %v5137_v30 }
  0xd7   : > { %v1730_v56 = vor.u32 %v1729_v25, %v1725_v15  ;;  %v2669_v62 = vshrl.u32 %v5128_v59, 16  ;;  %v2671_v44 = vshll.u32 %v5128_v59, 16  ;;  %v394_v36 = vld [vmem:[%s4835_s1 + $0x40] sm:$0xf]  ;;  %v395_v48 = vld [vmem:[%s4835_s1 + $0x44] sm:$0xf]  ;;  %v1944_v30 = vsel %vm1311_vm7, %v1942_v58, %v1943_v19 }
  0xd8   : > { %v1129_v52 = vor.u32 %v1128_v31, %v1124_v43  ;;  %1243 = vrot.lane.b32.xlu0 %v1122_v26, %s4626_s30  ;;  %v546_v45 = vsel %vm4889_vm10, %v538_v27, %v545_v35  ;;  %v788_v10 = vsel %vm4854_vm4, %v547_v37, %v787_v55  ;;  %v307_v11 = vld [vmem:[#allocation2 + $0x78] sm:$0x1]  ;;  %v357_v15 = vld [vmem:[#allocation2 + $0x80] sm:$0x1]  ;;  %v2676_v20 = vshll.u32 %v5160_v50, 16 }
  0xd9   : > { %v1735_v47 = vsel %vm1038_vm6, %v1730_v56, %v1734_v18  ;;  %786 = vst.msk [vmem:[#allocation2 + $0x64] sm:$0xf] %vm267_vm0, %v546_v45  ;;  %789 = vst [vmem:[#allocation2 + $0x68] sm:$0x1] %v788_v10  ;;  %v2673_v18 = vrot.slane %v2671_v44, 1  ;;  %v305_v43 = vsel %vm4854_vm4, 0, %v304_v61 }
  0xda   : > { %1856 = vrot.lane.b32.xlu1 %v1735_v47, %s4626_s30  ;;  %v1134_v17 = vsel %vm1038_vm6, %v1129_v52, %v1133_v53  ;;  %v396_v12 = vld [vmem:[%s4835_s1 + $0x48] sm:$0xf]  ;;  %306 = vst [vmem:[#allocation2 + $0x6c] sm:$0x1] %v305_v43  ;;  %v355_v22 = vsel %vm4859_vm5, 0, %v354_v63  ;;  %v549_v23 = vshrl.u32 %v394_v36, 16 }
  0xdb   : > { %v552_v25 = vshll.u32 %v394_v36, 16  ;;  %v2674_v27 = vor.u32 %v2673_v18, %v2669_v62  ;;  %v2678_v33 = vrot.slane %v2676_v20, 1  ;;  %356 = vst [vmem:[#allocation2 + $0x74] sm:$0x1] %v355_v22  ;;  %v557_v34 = vshrl.u32 %v395_v48, 16 }
  0xdc   : > { %v560_v41 = vshll.u32 %v395_v48, 16  ;;  %v397_v26 = vld [vmem:[%s4835_s1 + $0x4c] sm:$0xf]  ;;  %1245 = vrot.lane.b32.xlu0 %v1134_v17, %s4626_s30  ;;  %v551_v31 = vrot.slane %v549_v23, 7  ;;  %v308_v53 = vsel %vm4854_vm4, 0, %v307_v11  ;;  %v358_v19 = vsel %vm4859_vm5, 0, %v357_v15 }
  0xdd   : > { %v566_v54 = vshrl.u32 %v396_v12, 16  ;;  %v5194_v55 = vld [vmem:[#allocation2 + $0x24] sm:$0xe]  ;;  %v1474_v56 = vld [vmem:[#allocation2 + $0x60] sm:$0xf]  ;;  %v5197_v58 = vrot.slane %v3855_v46, 1  ;;  %v5208_v15 = vsel %vm1038_vm6, %v2674_v27, %v2678_v33 }
  0xde   : > { %1372 = vrot.lane.b32.xlu1 %v1332_v38, %s4625_s22  ;;  %v1334_v35 = vrot.slane %v5148_v7, 1  ;;  %v559_v37 = vrot.slane %v557_v34, 7  ;;  %309 = vst [vmem:[#allocation2 + $0x78] sm:$0x1] %v308_v53  ;;  %359 = vst [vmem:[#allocation2 + $0x80] sm:$0x1] %v358_v19  ;;  %v554_v44 = vor.u32 %v552_v25, %v551_v31  ;;  %v3981_v20 = vcombine.low %v5194_v55, %v5119_v42 }
  0xdf   : > { %v569_v61 = vshll.u32 %v396_v12, 16  ;;  %v2480_v52 = vld [vmem:[#allocation2 + $0x30] sm:$0xf]  ;;  %v1515_v62 = vld [vmem:[#allocation2 + $0x60] sm:$0xe]  ;;  %v555_v63 = vrot.slane %v551_v31, 4 }
  0xe0   : > { %v568_v36 = vrot.slane %v566_v54, 7  ;;  %v574_v47 = vshrl.u32 %v397_v26, 16  ;;  %v562_v45 = vor.u32 %v560_v41, %v559_v37  ;;  %v564_v10 = vrot.slane %v559_v37, 4  ;;  %v5205_v46 = vld [vmem:[#allocation2 + $0x34] sm:$0xf] }
  0xe1   : > { %v577_v48 = vshll.u32 %v397_v26, 16  ;;  %v5203_v38 = vrot.slane %v3980_v0, 1  ;;  %v1475_v11 = vld [vmem:[#allocation2 + $0x64] sm:$0xf]  ;;  %v790_v16 = vld [vmem:[#allocation2 + $0x6c] sm:$0xf] }
  0xe2   : > { %v572_v17 = vrot.slane %v568_v36, 4  ;;  %v576_v18 = vrot.slane %v574_v47, 7  ;;  %1984 = vrot.lane.b32.xlu1 %v1944_v30, %s4625_s22  ;;  %v5213_v43 = vcombine.low %v1474_v56, %v1475_v11  ;;  %v4358_v12 = vld [vmem:[#allocation2 + $0x68] ss:$0 sps:$4 sm:$0x11]   ;;  %v3903_v22 = vcombine.low %v1515_v62, %v1475_v11 }
  0xe3   : > { %v563_v21 = vsel %vm4889_vm10, %v555_v63, %v562_v45  ;;  %v571_v0 = vor.u32 %v569_v61, %v568_v36  ;;  %v791_v23 = vsel %vm4880_vm9, %v554_v44, %v790_v16  ;;  %v794_v25 = vld [vmem:[#allocation2 + $0x74] sm:$0x1]  ;;  %v4368_v42 = vld [vmem:[#allocation2 + $0x2c] ss:$0 sps:$4 sm:$0x11]   ;;  %v5221_v30 = vcombine.low %v2480_v52, %v5205_v46 }
  0xe4   : > { %793 = vst.msk [vmem:[#allocation2 + $0x70] sm:$0xf] %vm267_vm0, %v563_v21  ;;  %v579_v27 = vor.u32 %v577_v48, %v576_v18  ;;  %v581_v33 = vrot.slane %v576_v18, 4  ;;  %v1737_v34 = vshrl.u32 %v5213_v43, 16  ;;  %v1739_v41 = vshll.u32 %v5213_v43, 16 }
  0xe5   : > { %6240 = vst [vmem:[#allocation14_spill] sm:$0xff] %v5221_v30  ;;  %v1744_v26 = vshll.u32 %v4358_v12, 16  ;;  %v1945_v31 = vrot.slane %v3903_v22, 1  ;;  %792 = vst [vmem:[#allocation2 + $0x6c] sm:$0xf] %v791_v23  ;;  %v1946_v19 = vrot.slane %v4358_v12, 1  ;;  %v795_v54 = vsel %vm4854_vm4, %v564_v10, %v794_v25 }
  0xe6   : > { %v5225_v53 = vld [vmem:[#allocation2 + $0x38] ss:$0 sps:$4 sm:$0x11]   ;;  %v580_v55 = vsel %vm4889_vm10, %v572_v17, %v579_v27  ;;  %v801_v37 = vld [vmem:[#allocation2 + $0x80] sm:$0x1]  ;;  %v2941_v61 = vrot.slane %v5160_v50, 1 }
  0xe7   : > { %v797_v56 = vld [vmem:[#allocation2 + $0x78] sm:$0xf]  ;;  %v1741_v52 = vrot.slane %v1739_v41, 1  ;;  %v1746_v62 = vrot.slane %v1744_v26, 1  ;;  %796 = vst [vmem:[#allocation2 + $0x74] sm:$0x1] %v795_v54  ;;  %v802_v63 = vsel %vm4854_vm4, %v581_v33, %v801_v37  ;;  %v1947_v47 = vsel %vm1311_vm7, %v1945_v31, %v1946_v19 }
  0xe8   : > { %v798_v44 = vsel %vm4880_vm9, %v571_v0, %v797_v56  ;;  %800 = vst.msk [vmem:[#allocation2 + $0x7c] sm:$0xf] %vm267_vm0, %v580_v55  ;;  %v310_v36 = vld [vmem:[#allocation2 + $0x84] sm:$0x1]  ;;  %803 = vst [vmem:[#allocation2 + $0x80] sm:$0x1] %v802_v63  ;;  %1986 = vrot.lane.b32.xlu1 %v1947_v47, %s4625_s22 }
  0xe9   : > { %799 = vst [vmem:[#allocation2 + $0x78] sm:$0xf] %v798_v44  ;;  %v2681_v45 = vshrl.u32 %v5151_v13, 16  ;;  %v2683_v50 = vshll.u32 %v5151_v13, 16  ;;  %v2688_v10 = vshll.u32 %v4368_v42, 16  ;;  %v1742_v11 = vor.u32 %v1741_v52, %v1737_v34 }
  0xea   : > { %v360_v48 = vld [vmem:[#allocation2 + $0x8c] sm:$0x1]  ;;  %v2943_v17 = vrot.slane %v3981_v20, 1  ;;  %v2944_v18 = vrot.slane %v4368_v42, 1  ;;  %v2695_v12 = vshll.u32 %v5221_v30, 16  ;;  %v2693_v0 = vshrl.u32 %v5221_v30, 16 }
  0xeb   : > { %v398_v22 = vld [vmem:[%s4835_s1 + $0x50] sm:$0xf]  ;;  %v2685_v21 = vrot.slane %v2683_v50, 1  ;;  %v2690_v16 = vrot.slane %v2688_v10, 1  ;;  %v311_v23 = vsel %vm4854_vm4, 0, %v310_v36  ;;  %v1747_v25 = vsel %vm1038_vm6, %v1742_v11, %v1746_v62 }
  0xec   : > { %v1477_v27 = vld [vmem:[#allocation2 + $0x70] sm:$0xf]  ;;  %v2700_v33 = vshll.u32 %v5225_v53, 16  ;;  %312 = vst [vmem:[#allocation2 + $0x84] sm:$0x1] %v311_v23  ;;  %v361_v20 = vsel %vm4859_vm5, 0, %v360_v48  ;;  %1858 = vrot.lane.b32.xlu0 %v1747_v25, %s4626_s30  ;;  %v1335_v34 = vsel %vm1311_vm7, %v5197_v58, %v1334_v35  ;;  %2860 = vrot.lane.b32.xlu1 %v5208_v15, %s4626_s30  ;;  %v2942_v58 = vsel %vm1311_vm7, %v5203_v38, %v2941_v61 }
  0xed   : > { %v5250_v42 = vld [vmem:[#allocation2 + $0x30] sm:$0xe]  ;;  %v1476_v41 = vld [vmem:[#allocation2 + $0x6c] sm:$0xf]  ;;  %v2697_v31 = vrot.slane %v2695_v12, 1  ;;  %v583_v19 = vshrl.u32 %v398_v22, 16  ;;  %v2686_v56 = vor.u32 %v2685_v21, %v2681_v45  ;;  %v5266_v35 = vsel %vm1311_vm7, %v2943_v17, %v2944_v18 }
  0xee   : > { %v1516_v26 = vld [vmem:[#allocation2 + $0x6c] sm:$0xe]  ;;  %362 = vst [vmem:[#allocation2 + $0x8c] sm:$0x1] %v361_v20  ;;  %v5259_v54 = vcombine.low %v1476_v41, %v1477_v27  ;;  %v586_v37 = vshll.u32 %v398_v22, 16  ;;  %v5272_v45 = vrot.slane %v2700_v33, 1  ;;  %v3982_v17 = vcombine.low %v5250_v42, %v5205_v46 }
  0xef   : > { %v3904_v55 = vcombine.low %v1516_v26, %v1477_v27  ;;  %v2482_v52 = vld [vmem:[#allocation2 + $0x3c] sm:$0xf]  ;;  %v5261_v62 = vld [vmem:[#allocation2 + $0x40] sm:$0xf]  ;;  %v5268_v44 = vrot.slane %v583_v19, 7  ;;  %v5278_v11 = vor.u32 %v2697_v31, %v2693_v0  ;;  %v5287_v21 = vsel %vm1038_vm6, %v2686_v56, %v2690_v16 }
  0xf0   : > { %v4363_v7 = vld [vmem:[#allocation2 + $0x74] ss:$0 sps:$4 sm:$0x11]   ;;  %v1749_v15 = vshrl.u32 %v5259_v54, 16  ;;  %v1751_v63 = vshll.u32 %v5259_v54, 16  ;;  %1374 = vrot.lane.b32.xlu0 %v1335_v34, %s4625_s22  ;;  %v5292_v42 = vcombine.low %v2482_v52, %v5261_v62  ;;  %vm2076_vm13 = vcmask 97280  }
  0xf1   : > { %v1948_v36 = vrot.slane %v3904_v55, 1  ;;  %v1478_v47 = vld [vmem:[#allocation2 + $0x78] sm:$0xf]  ;;  %v399_v50 = vld [vmem:[%s4835_s1 + $0x54] sm:$0xf]  ;;  %v1756_v48 = vshll.u32 %v4363_v7, 16  ;;  %v588_v25 = vor.u32 %v586_v37, %v5268_v44 }
  0xf2   : > { %v5275_v10 = vld [vmem:[#allocation2 + $0x3c] sm:$0xe]  ;;  %v1949_v38 = vrot.slane %v4363_v7, 1  ;;  %v1753_v18 = vrot.slane %v1751_v63, 1  ;;  %v1517_v23 = vld [vmem:[#allocation2 + $0x78] sm:$0xe] }
  0xf3   : > { %v1479_v61 = vld [vmem:[#allocation2 + $0x7c] sm:$0xf]  ;;  %v5284_v22 = vld [vmem:[#allocation2 + $0x80] ss:$0 sps:$4 sm:$0x11]   ;;  %v1758_v33 = vrot.slane %v1756_v48, 1  ;;  %v3983_v63 = vcombine.low %v5275_v10, %v5261_v62 }
  0xf4   : > { %v5282_v12 = vcombine.low %v1478_v47, %v1479_v61  ;;  %v313_v27 = vld [vmem:[#allocation2 + $0x90] sm:$0x1]  ;;  %v1950_v0 = vsel %vm1311_vm7, %v1948_v36, %v1949_v38  ;;  %v3905_v20 = vcombine.low %v1517_v23, %v1479_v61  ;;  %v804_v34 = vld [vmem:[#allocation2 + $0x84] sm:$0xf]  ;;  %v363_v46 = vld [vmem:[#allocation2 + $0x98] sm:$0x1]  ;;  %v1754_v41 = vor.u32 %v1753_v18, %v1749_v15 }
  0xf5   : > { %6242 = vst [vmem:[#allocation16_spill] sm:$0xff] %v5292_v42  ;;  %1988 = vrot.lane.b32.xlu1 %v1950_v0, %s4625_s22  ;;  %v1768_v31 = vshll.u32 %v5284_v22, 16  ;;  %v400_v19 = vld [vmem:[%s4835_s1 + $0x58] sm:$0xf]  ;;  %v589_v55 = vrot.slane %v5268_v44, 4  ;;  %v591_v56 = vshrl.u32 %v399_v50, 16  ;;  %v805_v47 = vsel %vm4880_vm9, %v588_v25, %v804_v34 }
  0xf6   : > { %6241 = vst [vmem:[#allocation15_spill] sm:$0xff] %v5282_v12  ;;  %v1761_v16 = vshrl.u32 %v5282_v12, 16  ;;  %v1763_v26 = vshll.u32 %v5282_v12, 16  ;;  %v594_v37 = vshll.u32 %v399_v50, 16  ;;  %v401_v7 = vld [vmem:[%s4835_s1 + $0x5c] sm:$0xf]  ;;  %v1759_v52 = vsel %vm1038_vm6, %v1754_v41, %v1758_v33 }
  0xf7   : > { %v1770_v36 = vrot.slane %v1768_v31, 1  ;;  %1860 = vrot.lane.b32.xlu0 %v1759_v52, %s4626_s30  ;;  %v1951_v48 = vrot.slane %v3905_v20, 1  ;;  %v593_v38 = vrot.slane %v591_v56, 7  ;;  %806 = vst [vmem:[#allocation2 + $0x84] sm:$0xf] %v805_v47  ;;  %v314_v44 = vsel %vm4854_vm4, 0, %v313_v27 }
  0xf8   : > { %v1765_v15 = vrot.slane %v1763_v26, 1  ;;  %v364_v50 = vsel %vm4859_vm5, 0, %v363_v46  ;;  %v808_v18 = vld [vmem:[#allocation2 + $0x8c] sm:$0x1]  ;;  %315 = vst [vmem:[#allocation2 + $0x90] sm:$0x1] %v314_v44 }
  0xf9   : > { %2988 = vrot.lane.b32.xlu1 %v2942_v58, %s4625_s22  ;;  %365 = vst [vmem:[#allocation2 + $0x98] sm:$0x1] %v364_v50  ;;  %v600_v23 = vshrl.u32 %v400_v19, 16  ;;  %v603_v33 = vshll.u32 %v400_v19, 16  ;;  %v608_v25 = vshrl.u32 %v401_v7, 16  ;;  %v1952_v20 = vrot.slane %v5284_v22, 1 }
  0xfa   : > { %v1766_v61 = vor.u32 %v1765_v15, %v1761_v16  ;;  %v5312_v0 = vld [vmem:[#allocation2 + $0x44] ss:$0 sps:$4 sm:$0x11]   ;;  %v596_v34 = vor.u32 %v594_v37, %v593_v38  ;;  %v598_v41 = vrot.slane %v593_v38, 4  ;;  %v611_v26 = vshll.u32 %v401_v7, 16 }
  0xfb   : > { %v2484_v27 = vld [vmem:[#allocation2 + $0x48] sm:$0xf]  ;;  %v602_v46 = vrot.slane %v600_v23, 7  ;;  %v610_v16 = vrot.slane %v608_v25, 7  ;;  %v2946_v56 = vrot.slane %v3982_v17, 1  ;;  %v2947_v22 = vrot.slane %v5225_v53, 1 }
  0xfc   : > { %v1771_v31 = vsel %vm1038_vm6, %v1766_v61, %v1770_v36  ;;  %v5316_v58 = vld [vmem:[#allocation2 + $0x4c] sm:$0xf]  ;;  %v597_v19 = vsel %vm4889_vm10, %v589_v55, %v596_v34  ;;  %v809_v52 = vsel %vm4854_vm4, %v598_v41, %v808_v18  ;;  %v2707_v37 = vshll.u32 %v5292_v42, 16  ;;  %v5325_v7 = vld [vmem:[#allocation2 + $0x50] ss:$0 sps:$4 sm:$0x11]  }
  0xfd   : > { %1862 = vrot.lane.b32.xlu0 %v1771_v31, %s4626_s30  ;;  %2990 = vrot.lane.b32.xlu1 %v5266_v35, %s4625_s22  ;;  %807 = vst.msk [vmem:[#allocation2 + $0x88] sm:$0xf] %vm267_vm0, %v597_v19  ;;  %810 = vst [vmem:[#allocation2 + $0x8c] sm:$0x1] %v809_v52  ;;  %v605_v17 = vor.u32 %v603_v33, %v602_v46  ;;  %v606_v15 = vrot.slane %v602_v46, 4  ;;  %v613_v55 = vor.u32 %v611_v26, %v610_v16  ;;  %vm2109_vm14 = vcmask 1045504  }
  0xfe   : > { %v615_v36 = vrot.slane %v610_v16, 4  ;;  %v316_v47 = vld [vmem:[#allocation2 + $0x9c] sm:$0x1]  ;;  %v366_v38 = vld [vmem:[#allocation2 + $0xa4] sm:$0x1]  ;;  %v2703_v53 = vsel %vm1038_vm6, %v5278_v11, %v5272_v45  ;;  %v2705_v44 = vshrl.u32 %v5292_v42, 16  ;;  %v5335_v50 = vcombine.low %v2484_v27, %v5316_v58 }
  0xff   : > { %v5338_v61 = vld [vmem:[%s4835_s1 + $0x60] sm:$0xf]  ;;  %v5341_v35 = vld [vmem:[%s4835_s1 + $0x64] sm:$0xf]  ;;  %v5343_v18 = vld [vmem:[#allocation2 + $0x48] sm:$0xe]  ;;  %v614_v23 = vsel %vm4889_vm10, %v606_v15, %v613_v55  ;;  %v1953_v11 = vsel %vm1311_vm7, %v1951_v48, %v1952_v20  ;;  %v5355_v31 = vsel %vm1311_vm7, %v2946_v56, %v2947_v22 }
 0x100   : > { %6243 = vst [vmem:[#allocation17_spill] sm:$0xff] %v5335_v50  ;;  %v2709_v33 = vrot.slane %v2707_v37, 1  ;;  %v2712_v25 = vshll.u32 %v5312_v0, 16  ;;  %v319_v34 = vld [vmem:[#allocation2 + $0xa8] sm:$0x1]  ;;  %v2949_v46 = vrot.slane %v3983_v63, 1 }
 0x101   : > { %v2486_v41 = vld [vmem:[#allocation2 + $0x54] sm:$0xf]  ;;  %v5348_v45 = vld [vmem:[#allocation2 + $0x58] sm:$0xf]  ;;  %2862 = vrot.lane.b32.xlu0 %v5287_v21, %s4626_s30  ;;  %v811_v26 = vld [vmem:[#allocation2 + $0x90] sm:$0xf]  ;;  %2864 = vrot.lane.b32.xlu1 %v2703_v53, %s4626_s30 }
 0x102   : > { %814 = vst.msk [vmem:[#allocation2 + $0x94] sm:$0xf] %vm267_vm0, %v614_v23  ;;  %v815_v27 = vld [vmem:[#allocation2 + $0x98] sm:$0x1]  ;;  %v2950_v16 = vrot.slane %v5312_v0, 1  ;;  %v812_v21 = vsel %vm4880_vm9, %v605_v17, %v811_v26  ;;  %v2719_v10 = vshll.u32 %v5335_v50, 16 }
 0x103   : > { %v1480_v19 = vld [vmem:[#allocation2 + $0x84] sm:$0xf]  ;;  %v816_v48 = vsel %vm4854_vm4, %v615_v36, %v815_v27  ;;  %v369_v56 = vld [vmem:[#allocation2 + $0xb0] sm:$0x1]  ;;  %813 = vst [vmem:[#allocation2 + $0x90] sm:$0xf] %v812_v21 }
 0x104   : > { %v1518_v52 = vld [vmem:[#allocation2 + $0x84] sm:$0xe]  ;;  %817 = vst [vmem:[#allocation2 + $0x98] sm:$0x1] %v816_v48  ;;  %v2724_v63 = vshll.u32 %v5325_v7, 16  ;;  %v317_v0 = vsel %vm4854_vm4, 0, %v316_v47  ;;  %v5384_v47 = vor.u32 %v2709_v33, %v2705_v44  ;;  %v2951_v20 = vsel %vm1311_vm7, %v2949_v46, %v2950_v16 }
 0x105   : > { %v367_v22 = vsel %vm4859_vm5, 0, %v366_v38  ;;  %v5375_v37 = vrot.slane %v2712_v25, 1  ;;  %318 = vst [vmem:[#allocation2 + $0x9c] sm:$0x1] %v317_v0  ;;  %v617_v17 = vshrl.u32 %v5338_v61, 16  ;;  %v620_v15 = vshll.u32 %v5338_v61, 16  ;;  %1990 = vrot.lane.b32.xlu0 %v1953_v11, %s4625_s22 }
 0x106   : > { %368 = vst [vmem:[#allocation2 + $0xa4] sm:$0x1] %v367_v22  ;;  %v625_v55 = vshrl.u32 %v5341_v35, 16  ;;  %v5381_v36 = vld [vmem:[%s4835_s1 + $0x68] sm:$0xf]  ;;  %v628_v38 = vshll.u32 %v5341_v35, 16  ;;  %v5390_v25 = vcombine.low %v2486_v41, %v5348_v45 }
 0x107   : > { %v1481_v53 = vld [vmem:[#allocation2 + $0x88] sm:$0xf]  ;;  %v320_v23 = vsel %vm4854_vm4, 0, %v319_v34  ;;  %v4374_v61 = vld [vmem:[#allocation2 + $0x8c] ss:$0 sps:$4 sm:$0x11]  }
 0x108   : > { %6244 = vst [vmem:[#allocation18_spill] sm:$0xff] %v5390_v25  ;;  %v5392_v26 = vcombine.low %v1480_v19, %v1481_v53  ;;  %v3906_v27 = vcombine.low %v1518_v52, %v1481_v53  ;;  %v619_v21 = vrot.slane %v617_v17, 7  ;;  %v627_v48 = vrot.slane %v625_v55, 7  ;;  %321 = vst [vmem:[#allocation2 + $0xa8] sm:$0x1] %v320_v23 }
 0x109   : > { %v2721_v0 = vrot.slane %v2719_v10, 1  ;;  %v5394_v11 = vrot.slane %v2724_v63, 1  ;;  %v370_v44 = vsel %vm4859_vm5, 0, %v369_v56  ;;  %v5399_v35 = vld [vmem:[%s4835_s1 + $0x6c] sm:$0xf]  ;;  %v634_v33 = vshrl.u32 %v5381_v36, 16 }
 0x10a   : > { %6245 = vst [vmem:[#allocation19_spill] sm:$0xff] %v5392_v26  ;;  %v1773_v34 = vshrl.u32 %v5392_v26, 16  ;;  %v1775_v41 = vshll.u32 %v5392_v26, 16  ;;  %v1780_v19 = vshll.u32 %v4374_v61, 16  ;;  %v1954_v22 = vrot.slane %v3906_v27, 1 }
 0x10b   : > { %v1483_v52 = vld [vmem:[#allocation2 + $0x94] sm:$0xf]  ;;  %371 = vst [vmem:[#allocation2 + $0xb0] sm:$0x1] %v370_v44  ;;  %v1955_v17 = vrot.slane %v4374_v61, 1  ;;  %v623_v55 = vrot.slane %v619_v21, 4  ;;  %v630_v10 = vor.u32 %v628_v38, %v627_v48  ;;  %v622_v42 = vor.u32 %v620_v15, %v619_v21 }
 0x10c   : > { %v637_v63 = vshll.u32 %v5381_v36, 16  ;;  %v2529_v53 = vld [vmem:[#allocation2 + $0x54] sm:$0xe]  ;;  %v1777_v23 = vrot.slane %v1775_v41, 1  ;;  %v1782_v56 = vrot.slane %v1780_v19, 1  ;;  %v632_v38 = vrot.slane %v627_v48, 4 }
 0x10d   : > { %v1482_v62 = vld [vmem:[#allocation2 + $0x90] sm:$0xf]  ;;  %v1956_v30 = vsel %vm1311_vm7, %v1954_v22, %v1955_v17  ;;  %v5409_v26 = vld [vmem:[#allocation2 + $0x98] ss:$0 sps:$4 sm:$0x11]   ;;  %v631_v61 = vsel %vm4889_vm10, %v623_v55, %v630_v10  ;;  %v636_v16 = vrot.slane %v634_v33, 7  ;;  %v3985_v55 = vcombine.low %v2529_v53, %v5348_v45  ;;  %v5427_v10 = vpop.permute.xlu0 %1231 }
 0x10e   : > { %v5407_v12 = vcombine.low %v1482_v62, %v1483_v52  ;;  %v1519_v27 = vld [vmem:[#allocation2 + $0x90] sm:$0xe]  ;;  %v1778_v44 = vor.u32 %v1777_v23, %v1773_v34  ;;  %1992 = vrot.lane.b32.xlu1 %v1956_v30, %s4625_s22  ;;  %v818_v41 = vld [vmem:[#allocation2 + $0x9c] sm:$0xf]  ;;  %821 = vst.msk [vmem:[#allocation2 + $0xa0] sm:$0xf] %vm267_vm0, %v631_v61  ;;  %v5429_v23 = vpop.permute.xlu1 %1360 }
 0x10f   : > { %v3907_v36 = vcombine.low %v1519_v27, %v1483_v52  ;;  %v822_v46 = vld [vmem:[#allocation2 + $0xa4] sm:$0x1]  ;;  %v642_v15 = vshrl.u32 %v5399_v35, 16  ;;  %v1792_v19 = vshll.u32 %v5409_v26, 16  ;;  %v6247_v22 = vshrl.u32 %v5335_v50, 16 }
 0x110   : > { %6246 = vst [vmem:[#allocation20_spill] sm:$0xff] %v5407_v12  ;;  %v1785_v62 = vshrl.u32 %v5407_v12, 16  ;;  %v1787_v21 = vshll.u32 %v5407_v12, 16  ;;  %v1783_v34 = vsel %vm1038_vm6, %v1778_v44, %v1782_v56  ;;  %v819_v30 = vsel %vm4880_vm9, %v622_v42, %v818_v41  ;;  %v825_v33 = vld [vmem:[#allocation2 + $0xa8] sm:$0xf] }
 0x111   : > { %v2722_v48 = vor.u32 %v2721_v0, %v6247_v22  ;;  %v823_v52 = vsel %vm4854_vm4, %v632_v38, %v822_v46  ;;  %v4390_v17 = vld [vmem:[#allocation2 + $0x5c] ss:$0 sps:$4 sm:$0x11]   ;;  %1864 = vrot.lane.b32.xlu0 %v1783_v34, %s4626_s30  ;;  %v1794_v0 = vrot.slane %v1792_v19, 1  ;;  %v1958_v56 = vrot.slane %v5409_v26, 1 }
 0x112   : > { %v1789_v27 = vrot.slane %v1787_v21, 1  ;;  %820 = vst [vmem:[#allocation2 + $0x9c] sm:$0xf] %v819_v30  ;;  %824 = vst [vmem:[#allocation2 + $0xa4] sm:$0x1] %v823_v52  ;;  %v639_v42 = vor.u32 %v637_v63, %v636_v16  ;;  %2992 = vrot.lane.b32.xlu1 %v5355_v31, %s4625_s22  ;;  %v1957_v61 = vrot.slane %v3907_v36, 1  ;;  %v6248_v26 = vcombine.low %v5343_v18, %v5316_v58 }
 0x113   : > { %v640_v38 = vrot.slane %v636_v16, 4  ;;  %v644_v44 = vrot.slane %v642_v15, 7  ;;  %v645_v45 = vshll.u32 %v5399_v35, 16  ;;  %v2488_v53 = vld [vmem:[#allocation2 + $0x60] sm:$0xf]  ;;  %v2953_v63 = vrot.slane %v5325_v7, 1 }
 0x114   : > { %v1790_v41 = vor.u32 %v1789_v27, %v1785_v62  ;;  %v826_v46 = vsel %vm4880_vm9, %v639_v42, %v825_v33  ;;  %v829_v21 = vld [vmem:[#allocation2 + $0xb0] sm:$0x1]  ;;  %v2952_v19 = vrot.slane %v6248_v26, 1  ;;  %v5442_v22 = vld [vmem:[#allocation2 + $0x64] sm:$0xf]  ;;  %v2731_v16 = vshll.u32 %v5390_v25, 16 }
 0x115   : > { %v647_v31 = vor.u32 %v645_v45, %v644_v44  ;;  %v649_v36 = vrot.slane %v644_v44, 4  ;;  %827 = vst [vmem:[#allocation2 + $0xa8] sm:$0xf] %v826_v46  ;;  %v2736_v35 = vshll.u32 %v4390_v17, 16  ;;  %v2715_v62 = vsel %vm1038_vm6, %v5384_v47, %v5375_v37  ;;  %v322_v58 = vld [vmem:[#allocation2 + $0xb4] sm:$0x1]  ;;  %v5460_v47 = vpop.permute.xlu1 %1972 }
 0x116   : > { %v1795_v15 = vsel %vm1038_vm6, %v1790_v41, %v1794_v0  ;;  %v2955_v34 = vrot.slane %v3985_v55, 1  ;;  %v2956_v30 = vrot.slane %v4390_v17, 1  ;;  %2994 = vrot.lane.b32.xlu1 %v2951_v20, %s4625_s22  ;;  %v1485_v7 = vld [vmem:[#allocation2 + $0xa0] sm:$0xf]  ;;  %v5456_v33 = vcombine.low %v2488_v53, %v5442_v22  ;;  %v372_v37 = vld [vmem:[#allocation2 + $0xbc] sm:$0x1]  ;;  %v5462_v17 = vpop.permute.xlu0 %1362 }
 0x117   : > { %1866 = vrot.lane.b32.xlu0 %v1795_v15, %s4626_s30  ;;  %v648_v18 = vsel %vm4889_vm10, %v640_v38, %v647_v31  ;;  %v830_v52 = vsel %vm4854_vm4, %v649_v36, %v829_v21  ;;  %v5458_v27 = vld [vmem:[#allocation2 + $0x68] ss:$0 sps:$4 sm:$0x11]   ;;  %v2727_v20 = vsel %vm1038_vm6, %v2722_v48, %v5394_v11  ;;  %v2729_v55 = vshrl.u32 %v5390_v25, 16  ;;  %v408_v25 = vld [vmem:[%s4835_s1 + $0x78] sm:$0xf] }
 0x118   : > { %6249 = vst [vmem:[#allocation21_spill] sm:$0xff] %v5456_v33  ;;  %828 = vst.msk [vmem:[#allocation2 + $0xac] sm:$0xf] %vm267_vm0, %v648_v18  ;;  %v2733_v0 = vrot.slane %v2731_v16, 1  ;;  %v5468_v42 = vrot.slane %v2736_v35, 1  ;;  %v1959_v44 = vsel %vm1311_vm7, %v1957_v61, %v1958_v56  ;;  %v5473_v41 = vsel %vm1311_vm7, %v2952_v19, %v2953_v63 }
 0x119   : > { %831 = vst [vmem:[#allocation2 + $0xb0] sm:$0x1] %v830_v52  ;;  %v406_v38 = vld [vmem:[%s4835_s1 + $0x70] sm:$0xf]  ;;  %v1484_v45 = vld [vmem:[#allocation2 + $0x9c] sm:$0xf]  ;;  %v5478_v21 = vsel %vm1311_vm7, %v2955_v34, %v2956_v30 }
 0x11a   : > { %v1520_v53 = vld [vmem:[#allocation2 + $0x9c] sm:$0xe]  ;;  %v5475_v46 = vcombine.low %v1484_v45, %v1485_v7  ;;  %v4385_v11 = vld [vmem:[#allocation2 + $0xa4] ss:$0 sps:$4 sm:$0x11]   ;;  %v2741_v26 = vshrl.u32 %v5456_v33, 16  ;;  %2868 = vrot.lane.b32.xlu1 %v2727_v20, %s4626_s30  ;;  %v5494_v20 = vpop.permute.xlu0 %1366 }
 0x11b   : > { %v3908_v48 = vcombine.low %v1520_v53, %v1485_v7  ;;  %2866 = vrot.lane.b32.xlu0 %v2715_v62, %s4626_s30  ;;  %v2743_v56 = vshll.u32 %v5456_v33, 16  ;;  %v323_v61 = vsel %vm4854_vm4, 0, %v322_v58  ;;  %v373_v19 = vsel %vm4859_vm5, 0, %v372_v37  ;;  %v407_v63 = vld [vmem:[%s4835_s1 + $0x74] sm:$0xf]  ;;  %v5492_v37 = vpop.permute.xlu1 %1974 }
 0x11c   : > { %6250 = vst [vmem:[#allocation22_spill] sm:$0xff] %v5475_v46  ;;  %v651_v31 = vshrl.u32 %v406_v38, 16  ;;  %v1797_v36 = vshrl.u32 %v5475_v46, 16  ;;  %v1799_v16 = vshll.u32 %v5475_v46, 16  ;;  %v1804_v35 = vshll.u32 %v4385_v11, 16 }
 0x11d   : > { %v1960_v15 = vrot.slane %v3908_v48, 1  ;;  %324 = vst [vmem:[#allocation2 + $0xb4] sm:$0x1] %v323_v61  ;;  %374 = vst [vmem:[#allocation2 + $0xbc] sm:$0x1] %v373_v19  ;;  %v1961_v30 = vrot.slane %v4385_v11, 1  ;;  %v5496_v33 = vor.u32 %v2733_v0, %v2729_v55 }
 0x11e   : > { %v325_v62 = vld [vmem:[#allocation2 + $0xc0] sm:$0x1]  ;;  %v375_v34 = vld [vmem:[#allocation2 + $0xc8] sm:$0x1]  ;;  %v2748_v58 = vshll.u32 %v5458_v27, 16  ;;  %v653_v18 = vrot.slane %v651_v31, 7 }
 0x11f   : > { %v1486_v7 = vld [vmem:[#allocation2 + $0xa8] sm:$0xf]  ;;  %v654_v52 = vshll.u32 %v406_v38, 16  ;;  %v1801_v45 = vrot.slane %v1799_v16, 1  ;;  %v1806_v53 = vrot.slane %v1804_v35, 1  ;;  %v659_v48 = vshrl.u32 %v407_v63, 16  ;;  %1994 = vrot.lane.b32.xlu0 %v1959_v44, %s4625_s22 }
 0x120   : > { %v1962_v61 = vsel %vm1311_vm7, %v1960_v15, %v1961_v30  ;;  %v1487_v11 = vld [vmem:[#allocation2 + $0xac] sm:$0xf]  ;;  %v1521_v19 = vld [vmem:[#allocation2 + $0xa8] sm:$0xe]  ;;  %v2745_v46 = vrot.slane %v2743_v56, 1  ;;  %v662_v31 = vshll.u32 %v407_v63, 16  ;;  %v5510_v15 = vpop.permute.xlu0 %1844 }
 0x121   : > { %v656_v50 = vor.u32 %v654_v52, %v653_v18  ;;  %v1802_v38 = vor.u32 %v1801_v45, %v1797_v36  ;;  %1996 = vrot.lane.b32.xlu1 %v1962_v61, %s4625_s22  ;;  %v5502_v12 = vcombine.low %v1486_v7, %v1487_v11  ;;  %v5504_v16 = vld [vmem:[#allocation2 + $0xb0] ss:$0 sps:$4 sm:$0x11]   ;;  %v657_v55 = vrot.slane %v653_v18, 4  ;;  %v409_v45 = vld [vmem:[%s4835_s1 + $0x7c] sm:$0xf] }
 0x122   : > { %v661_v0 = vrot.slane %v659_v48, 7  ;;  %v326_v44 = vsel %vm4854_vm4, 0, %v325_v62  ;;  %v376_v35 = vsel %vm4859_vm5, 0, %v375_v34  ;;  %v668_v56 = vshrl.u32 %v408_v25, 16  ;;  %v5518_v48 = vpop.permute.xlu1 %1364 }
 0x123   : > { %v1807_v63 = vsel %vm1038_vm6, %v1802_v38, %v1806_v53  ;;  %v1809_v36 = vshrl.u32 %v5502_v12, 16  ;;  %v1811_v30 = vshll.u32 %v5502_v12, 16  ;;  %v1816_v7 = vshll.u32 %v5504_v16, 16  ;;  %327 = vst [vmem:[#allocation2 + $0xc0] sm:$0x1] %v326_v44 }
 0x124   : > { %377 = vst [vmem:[#allocation2 + $0xc8] sm:$0x1] %v376_v35  ;;  %1868 = vrot.lane.b32.xlu0 %v1807_v63, %s4626_s30  ;;  %v2746_v62 = vor.u32 %v2745_v46, %v2741_v26  ;;  %v2750_v18 = vrot.slane %v2748_v58, 1  ;;  %v664_v2 = vor.u32 %v662_v31, %v661_v0  ;;  %v666_v52 = vrot.slane %v661_v0, 4  ;;  %v832_v34 = vld [vmem:[#allocation2 + $0xb4] sm:$0xf]  ;;  %v5532_v63 = vpop.permute.xlu0 %1846 }
 0x125   : > { %v1813_v61 = vrot.slane %v1811_v30, 1  ;;  %v1818_v53 = vrot.slane %v1816_v7, 1  ;;  %2996 = vrot.lane.b32.xlu1 %v5473_v41, %s4625_s22  ;;  %v3909_v38 = vcombine.low %v1521_v19, %v1487_v11  ;;  %v833_v44 = vsel %vm4880_vm9, %v656_v50, %v832_v34  ;;  %v836_v35 = vld [vmem:[#allocation2 + $0xbc] sm:$0x1]  ;;  %v2530_v19 = vld [vmem:[#allocation2 + $0x60] sm:$0xe] }
 0x126   : > { %v665_v46 = vsel %vm4889_vm10, %v657_v55, %v664_v2  ;;  %834 = vst [vmem:[#allocation2 + $0xb4] sm:$0xf] %v833_v44  ;;  %v837_v26 = vsel %vm4854_vm4, %v666_v52, %v836_v35  ;;  %v1394_v58 = vsel %vm1392_vm11, %v4864_v8, %v5427_v10  ;;  %v670_v31 = vrot.slane %v668_v56, 7  ;;  %v2492_v30 = vld [vmem:[#allocation2 + $0x78] sm:$0xf] }
 0x127   : > { %v1814_v0 = vor.u32 %v1813_v61, %v1809_v36  ;;  %835 = vst.msk [vmem:[#allocation2 + $0xb8] sm:$0xf] %vm267_vm0, %v665_v46  ;;  %838 = vst [vmem:[#allocation2 + $0xbc] sm:$0x1] %v837_v26  ;;  %v671_v41 = vshll.u32 %v408_v25, 16  ;;  %v676_v11 = vshrl.u32 %v409_v45, 16  ;;  %v1427_v56 = vsel %vm1425_vm12, %v1394_v58, %v5429_v23 }
 0x128   : > { %v679_v50 = vshll.u32 %v409_v45, 16  ;;  %v674_v55 = vrot.slane %v670_v31, 4  ;;  %v5539_v25 = vld [vmem:[#allocation2 + $0x7c] sm:$0xf]  ;;  %v2739_v36 = vsel %vm1038_vm6, %v5496_v33, %v5468_v42  ;;  %v1963_v2 = vrot.slane %v3909_v38, 1  ;;  %4110 = vmatprep.mubr.msk.bf16.mxu0 %vm2076_vm13, %v1427_v56  ;;  %v5563_v58 = vpop.permute.xlu0 %1235 }
 0x129   : > { %v1819_v7 = vsel %vm1038_vm6, %v1814_v0, %v1818_v53  ;;  %2998 = vrot.lane.b32.xlu1 %v5478_v21, %s4625_s22  ;;  %v673_v8 = vor.u32 %v671_v41, %v670_v31  ;;  %v678_v10 = vrot.slane %v676_v11, 7  ;;  %v2751_v52 = vsel %vm1038_vm6, %v2746_v62, %v2750_v18  ;;  %v5547_v21 = vpop.permute.xlu1 %1976  ;;  %v2490_v35 = vld [vmem:[#allocation2 + $0x6c] sm:$0xf]  ;;  %v2491_v46 = vld [vmem:[#allocation2 + $0x70] sm:$0xf] }
 0x12a   : > { %1870 = vrot.lane.b32.xlu0 %v1819_v7, %s4626_s30  ;;  %v839_v34 = vld [vmem:[#allocation2 + $0xc0] sm:$0xf]  ;;  %v1964_v61 = vrot.slane %v5504_v16, 1  ;;  %v3986_v33 = vcombine.low %v2530_v19, %v5442_v22  ;;  %v5553_v42 = vld [vmem:[#allocation2 + $0x74] ss:$0 sps:$4 sm:$0x11]   ;;  %v5561_v32 = vcombine.low %v2492_v30, %v5539_v25  ;;  %v5567_v31 = vcombine.low %v2490_v35, %v2491_v46 }
 0x12b   : > { %v843_v45 = vld [vmem:[#allocation2 + $0xc8] sm:$0x1]  ;;  %v681_v23 = vor.u32 %v679_v50, %v678_v10  ;;  %v683_v53 = vrot.slane %v678_v10, 4  ;;  %v840_v44 = vsel %vm4880_vm9, %v673_v8, %v839_v34  ;;  %v2531_v62 = vld [vmem:[#allocation2 + $0x6c] sm:$0xe]  ;;  %v2005_v30 = vsel %vm1392_vm11, %v4935_v39, %v5510_v15 }
 0x12c   : > { %841 = vst [vmem:[#allocation2 + $0xc0] sm:$0xf] %v840_v44  ;;  %6251 = vst [vmem:[#allocation23_spill] sm:$0xff] %v5561_v32  ;;  %v5569_v0 = vld [vmem:[#allocation2 + $0x80] ss:$0 sps:$4 sm:$0x11]   ;;  %v1965_v40 = vsel %vm1311_vm7, %v1963_v2, %v1964_v61  ;;  %v3987_v50 = vcombine.low %v2531_v62, %v2491_v46  ;;  %v2037_v46 = vsel %vm1425_vm12, %v2005_v30, %v5460_v47  ;;  %v5592_v62 = vpop.permute.xlu0 %1237 }
 0x12d   : > { %2872 = vrot.lane.b32.xlu1 %v2751_v52, %s4626_s30  ;;  %v1488_v18 = vld [vmem:[#allocation2 + $0xb4] sm:$0xf]  ;;  %v682_v16 = vsel %vm4889_vm10, %v674_v55, %v681_v23  ;;  %v844_v26 = vsel %vm4854_vm4, %v683_v53, %v843_v45  ;;  %v2958_v19 = vrot.slane %v3986_v33, 1  ;;  %v2959_v55 = vrot.slane %v5458_v27, 1  ;;  %v862_v8 = vld [vmem:[#allocation2 + $0x60] sm:$0xf]  ;;  %v5579_v10 = vpop.permute.xlu1 %1978  ;;  %4076 = vmatprep.mubr.msk.bf16.mxu1 %vm2076_vm13, %v2037_v46 }
 0x12e   : > { %v1522_v38 = vld [vmem:[#allocation2 + $0xb4] sm:$0xe]  ;;  %2870 = vrot.lane.b32.xlu0 %v2739_v36, %s4626_s30  ;;  %v1489_v22 = vld [vmem:[#allocation2 + $0xb8] sm:$0xf]  ;;  %842 = vst.msk [vmem:[#allocation2 + $0xc4] sm:$0xf] %vm267_vm0, %v682_v16 }
 0x12f   : > { %845 = vst [vmem:[#allocation2 + $0xc8] sm:$0x1] %v844_v26  ;;  %v5572_v41 = vcombine.low %v1488_v18, %v1489_v22  ;;  %v4396_v1 = vld [vmem:[#allocation2 + $0xbc] ss:$0 sps:$4 sm:$0x11]   ;;  %v3910_v11 = vcombine.low %v1522_v38, %v1489_v22  ;;  %v2767_v7 = vshll.u32 %v5561_v32, 16  ;;  %v2960_v30 = vsel %vm1311_vm7, %v2958_v19, %v2959_v55 }
 0x130   : > { %v1828_v2 = vshll.u32 %v4396_v1, 16  ;;  %v5583_v34 = vld [vmem:[#allocation2 + $0x64] sm:$0xf]  ;;  %v1967_v27 = vrot.slane %v4396_v1, 1  ;;  %v2753_v45 = vshrl.u32 %v5567_v31, 16  ;;  %v2755_v39 = vshll.u32 %v5567_v31, 16 }
 0x131   : > { %v1821_v56 = vshrl.u32 %v5572_v41, 16  ;;  %v1823_v36 = vshll.u32 %v5572_v41, 16  ;;  %v1966_v52 = vrot.slane %v3910_v11, 1  ;;  %v2760_v15 = vshll.u32 %v5553_v42, 16  ;;  %v4408_v61 = vld [vmem:[%s4843_s29 + $0x8] sm:$0x3f]  }
 0x132   : > { %1998 = vrot.lane.b32.xlu0 %v1965_v40, %s4625_s22  ;;  %v1830_v53 = vrot.slane %v1828_v2, 1  ;;  %v2961_v35 = vrot.slane %v3987_v50, 1  ;;  %v902_v33 = vld [vmem:[#allocation2 + $0x60] sm:$0xe]  ;;  %v2962_v38 = vrot.slane %v5553_v42, 1  ;;  %v2765_v16 = vshrl.u32 %v5561_v32, 16  ;;  %4242 = vmatprep.subr.msk.bf16.mxu1 %vm2109_vm14, %v4408_v61 }
 0x133   : > { %v1825_v23 = vrot.slane %v1823_v36, 1  ;;  %v1490_v44 = vld [vmem:[#allocation2 + $0xc0] sm:$0xf]  ;;  %v1968_v18 = vsel %vm1311_vm7, %v1966_v52, %v1967_v27  ;;  %v2772_v26 = vshll.u32 %v5569_v0, 16  ;;  %v2769_v47 = vrot.slane %v2767_v7, 1 }
 0x134   : > { %v5598_v22 = vld [vmem:[#allocation2 + $0x68] ss:$0 sps:$4 sm:$0x11]   ;;  %2000 = vrot.lane.b32.xlu1 %v1968_v18, %s4625_s22  ;;  %v5605_v11 = vcombine.low %v862_v8, %v5583_v34  ;;  %v2757_v36 = vrot.slane %v2755_v39, 1  ;;  %v2762_v52 = vrot.slane %v2760_v15, 1  ;;  %v2111_v7 = vsel %vm2109_vm14, %v4408_v61, 0  ;;  %v5630_v18 = vpop.permute.xlu0 %1850 }
 0x135   : > { %v1826_v40 = vor.u32 %v1825_v23, %v1821_v56  ;;  %v5602_v1 = vld [vmem:[#allocation2 + $0xc4] sm:$0xf]  ;;  %v1234_v56 = vpop.permute.xlu1 %1233  ;;  %v2007_v8 = vsel %vm1392_vm11, %v4953_v14, %v5532_v63  ;;  %v864_v27 = vld [vmem:[#allocation2 + $0x6c] sm:$0xf]  ;;  %v5619_v23 = vld [vmem:[#allocation2 + $0x70] sm:$0xf]  ;;  %4075 = vmatpush3.bf16.msra.mxu1 %v2111_v7  ;;  %v3856_v15 = vcombine.low %v902_v33, %v5583_v34  ;;  %v2963_v61 = vsel %vm1311_vm7, %v2961_v35, %v2962_v38 }
 0x136   : > { %v5608_v42 = vcombine.low %v1490_v44, %v5602_v1  ;;  %v5610_v50 = vld [vmem:[#allocation2 + $0xc8] ss:$0 sps:$4 sm:$0x11]   ;;  %v2770_v14 = vor.u32 %v2769_v47, %v2765_v16  ;;  %v2774_v63 = vrot.slane %v2772_v26, 1  ;;  %v1138_v44 = vshll.u32 %v5605_v11, 16 }
 0x137   : > { %v1831_v2 = vsel %vm1038_vm6, %v1826_v40, %v1830_v53  ;;  %v1840_v39 = vshll.u32 %v5610_v50, 16  ;;  %v1523_v53 = vld [vmem:[#allocation2 + $0xc0] sm:$0xe]  ;;  %v4415_v46 = vld [vmem:[%s4843_s29] sm:$0x3f]   ;;  %v1143_v32 = vshll.u32 %v5598_v22, 16  ;;  %v5634_v7 = vcombine.low %v864_v27, %v5619_v23 }
 0x138   : > { %1872 = vrot.lane.b32.xlu0 %v1831_v2, %s4626_s30  ;;  %v1833_v19 = vshrl.u32 %v5608_v42, 16  ;;  %v1835_v55 = vshll.u32 %v5608_v42, 16  ;;  %3000 = vrot.lane.b32.xlu1 %v2960_v30, %s4625_s22  ;;  %v2532_v34 = vld [vmem:[#allocation2 + $0x78] sm:$0xe]  ;;  %v2758_v33 = vor.u32 %v2757_v36, %v2753_v45  ;;  %v1136_v30 = vshrl.u32 %v5605_v11, 16 }
 0x139   : > { %v1842_v2 = vrot.slane %v1840_v39, 1  ;;  %v5637_v35 = vld [vmem:[#allocation2 + $0x74] ss:$0 sps:$4 sm:$0x11]   ;;  %v2039_v38 = vsel %vm1425_vm12, %v2007_v8, %v5492_v37  ;;  %4243 = vmatprep.subr.msk.bf16.mxu0 %vm2109_vm14, %v4415_v46  ;;  %v3911_v26 = vcombine.low %v1523_v53, %v5602_v1  ;;  %v1336_v47 = vrot.slane %v3856_v15, 1  ;;  %v1849_v45 = vpop.permute.xlu1 %1848  ;;  %4244 = vmatprep.subr.msk.bf16.mxu1 %vm2109_vm14, %v4415_v46 }
 0x13a   : > { %v1837_v40 = vrot.slane %v1835_v55, 1  ;;  %v1337_v55 = vrot.slane %v5598_v22, 1  ;;  %4077 = vmatmul.mubr.msk.bf16.vlgmr.msra.gmra.mrb[0].mxu1 %vm2076_vm13, %v2039_v38  ;;  %v2494_v27 = vld [vmem:[#allocation2 + $0x84] sm:$0xf]  ;;  %v2495_v39 = vld [vmem:[#allocation2 + $0x88] sm:$0xf]  ;;  %v2775_v36 = vsel %vm1038_vm6, %v2770_v14, %v2774_v63  ;;  %v3988_v8 = vcombine.low %v2532_v34, %v5539_v25 }
 0x13b   : > { %v1140_v37 = vrot.slane %v1138_v44, 1  ;;  %v1145_v15 = vrot.slane %v1143_v32, 1  ;;  %v1150_v22 = vshll.u32 %v5634_v7, 16  ;;  %v1396_v53 = vsel %vm1392_vm11, %v4960_v24, %v1234_v56  ;;  %v5661_v63 = vld [vmem:[#allocation2 + $0x8c] ss:$0 sps:$4 sm:$0x11]   ;;  %v1240_v32 = vpop.permute.xlu0 %1239 }
 0x13c   : > { %v1838_v16 = vor.u32 %v1837_v40, %v1833_v19  ;;  %3002 = vrot.lane.b32.xlu1 %v2963_v61, %s4625_s22  ;;  %v2312_v19 = vsel %vm2109_vm14, %v4415_v46, 0  ;;  %v1155_v61 = vshll.u32 %v5637_v35, 16  ;;  %v1398_v14 = vsel %vm1392_vm11, %v4965_v29, %v5563_v58  ;;  %v2533_v44 = vld [vmem:[#allocation2 + $0x84] sm:$0xe]  ;;  %v5666_v34 = vld [vmem:[#allocation2 + $0x94] sm:$0xf] }
 0x13d   : > { %4109 = vmatpush3.bf16.msra.mxu0 %v2312_v19  ;;  %v5659_v25 = vcombine.low %v2494_v27, %v2495_v39  ;;  %4177 = vmatpush3.bf16.msra.mxu1 %v2312_v19  ;;  %v2763_v46 = vsel %vm1038_vm6, %v2758_v33, %v2762_v52  ;;  %v1969_v40 = vrot.slane %v3911_v26, 1  ;;  %v1970_v24 = vrot.slane %v5610_v50, 1 }
 0x13e   : > { %v1843_v1 = vsel %vm1038_vm6, %v1838_v16, %v1842_v2  ;;  %v1338_v56 = vsel %vm1311_vm7, %v1336_v47, %v1337_v55  ;;  %v2496_v2 = vld [vmem:[#allocation2 + $0x90] sm:$0xf]  ;;  %v2964_v29 = vrot.slane %v3988_v8, 1  ;;  %v2965_v58 = vrot.slane %v5569_v0, 1  ;;  %v1853_v55 = vpop.permute.xlu1 %1852  ;;  %v867_v8 = vld [vmem:[#allocation2 + $0x7c] sm:$0xf] }
 0x13f   : > { %1874 = vrot.lane.b32.xlu0 %v1843_v1, %s4626_s30  ;;  %v1429_v38 = vsel %vm1425_vm12, %v1396_v53, %v5462_v17  ;;  %v2009_v16 = vsel %vm1392_vm11, %v4984_v57, %v1849_v45  ;;  %v1148_v52 = vshrl.u32 %v5634_v7, 16  ;;  %v1152_v33 = vrot.slane %v1150_v22, 1  ;;  %v5678_v47 = vld [vmem:[#allocation2 + $0x98] ss:$0 sps:$4 sm:$0x11]  }
 0x140   : > { %2876 = vrot.lane.b32.xlu1 %v2775_v36, %s4626_s30  ;;  %v3989_v50 = vcombine.low %v2533_v44, %v2495_v39  ;;  %4111 = vmatmul.mubr.msk.bf16.vlgmr.msra.gmra.mrb[0].mxu0 %vm2076_vm13, %v1429_v38  ;;  %v1431_v26 = vsel %vm1425_vm12, %v1398_v14, %v5518_v48  ;;  %v1157_v0 = vrot.slane %v1155_v61, 1  ;;  %v2779_v17 = vshll.u32 %v5659_v25, 16  ;;  %v866_v36 = vld [vmem:[#allocation2 + $0x78] sm:$0xf] }
 0x141   : > { %v2784_v27 = vshll.u32 %v5661_v63, 16  ;;  %4114 = vmatprep.mubr.msk.bf16.mxu0 %vm2076_vm13, %v1431_v26  ;;  %v5685_v57 = vcombine.low %v2496_v2, %v5666_v34  ;;  %v1971_v39 = vsel %vm1311_vm7, %v1969_v40, %v1970_v24  ;;  %v1141_v45 = vor.u32 %v1140_v37, %v1136_v30  ;;  %v904_v24 = vld [vmem:[#allocation2 + $0x78] sm:$0xe] }
 0x142   : > { %v2011_v48 = vsel %vm1392_vm11, %v5015_v49, %v5630_v18  ;;  %v2041_v19 = vsel %vm1425_vm12, %v2009_v16, %v5547_v21  ;;  %v2966_v1 = vsel %vm1311_vm7, %v2964_v29, %v2965_v58  ;;  %v2777_v22 = vshrl.u32 %v5659_v25, 16  ;;  %v5701_v49 = vpop.permute.xlu0 %1241  ;;  %v903_v21 = vld [vmem:[#allocation2 + $0x6c] sm:$0xe]  ;;  %v1369_v44 = vpop.permute.xlu1 %1368  ;;  %v868_v29 = vld [vmem:[#allocation2 + $0x84] sm:$0xf] }
 0x143   : > { %2874 = vrot.lane.b32.xlu0 %v2763_v46, %s4626_s30  ;;  %v1400_v53 = vsel %vm1392_vm11, %v4963_v28, %v5592_v62  ;;  %v2791_v30 = vshll.u32 %v5685_v57, 16  ;;  %4080 = vmatprep.mubr.msk.bf16.mxu1 %vm2076_vm13, %v2041_v19  ;;  %v2967_v18 = vrot.slane %v3989_v50, 1  ;;  %v2968_v37 = vrot.slane %v5661_v63, 1  ;;  %v5715_v58 = vld [vmem:[#allocation2 + $0x88] sm:$0xf] }
 0x144   : > { %1376 = vrot.lane.b32.xlu1 %v1338_v56, %s4625_s22  ;;  %v2789_v61 = vshrl.u32 %v5685_v57, 16  ;;  %v2796_v14 = vshll.u32 %v5678_v47, 16  ;;  %v2781_v46 = vrot.slane %v2779_v17, 1  ;;  %v5707_v28 = vcombine.low %v866_v36, %v867_v8  ;;  %v4421_v16 = vld [vmem:[#allocation2 + $0x80] ss:$0 sps:$4 sm:$0x11]  }
 0x145   : > { %v2793_v40 = vrot.slane %v2791_v30, 1  ;;  %v2043_v62 = vsel %vm1425_vm12, %v2011_v48, %v5579_v10  ;;  %v1146_v56 = vsel %vm1038_vm6, %v1141_v45, %v1145_v15  ;;  %v1153_v2 = vor.u32 %v1152_v33, %v1148_v52  ;;  %v5733_v19 = vld [vmem:[#allocation2 + $0x8c] ss:$0 sps:$4 sm:$0x11]   ;;  %v2499_v30 = vld [vmem:[#allocation2 + $0xa0] sm:$0xf] }
 0x146   : > { %4081 = vmatmul.mubr.msk.bf16.gmra.mrb[4].mxu1 %vm2076_vm13, %v2043_v62  ;;  %v1402_v63 = vsel %vm1392_vm11, %v5018_v60, %v1240_v32  ;;  %v3857_v38 = vcombine.low %v903_v21, %v5619_v23  ;;  %v1433_v10 = vsel %vm1425_vm12, %v1400_v53, %v5494_v20  ;;  %v2969_v15 = vsel %vm1311_vm7, %v2967_v18, %v2968_v37  ;;  %v2534_v60 = vld [vmem:[#allocation2 + $0x90] sm:$0xe]  ;;  %v1981_v32 = vpop.permute.xlu1 %1980  ;;  %v1855_v20 = vpop.permute.xlu0 %1854  ;;  %v5741_v21 = vld [vmem:[#allocation2 + $0xac] sm:$0xf] }
 0x147   : > { %2002 = vrot.lane.b32.xlu0 %v1971_v39, %s4625_s22  ;;  %v1435_v50 = vsel %vm1425_vm12, %v1402_v63, %v1369_v44  ;;  %v2794_v52 = vor.u32 %v2793_v40, %v2789_v61  ;;  %v2798_v33 = vrot.slane %v2796_v14, 1  ;;  %v3858_v26 = vcombine.low %v904_v24, %v867_v8 }
 0x148   : > { %3004 = vrot.lane.b32.xlu1 %v2966_v1, %s4625_s22  ;;  %4115 = vmatmul.mubr.msk.bf16.gmra.mrb[4].mxu0 %vm2076_vm13, %v1433_v10  ;;  %v2782_v17 = vor.u32 %v2781_v46, %v2777_v22  ;;  %v2786_v39 = vrot.slane %v2784_v27, 1  ;;  %v1162_v23 = vshll.u32 %v5707_v28, 16  ;;  %v5727_v45 = vcombine.low %v868_v29, %v5715_v58  ;;  %v2498_v1 = vld [vmem:[#allocation2 + $0x9c] sm:$0xf] }
 0x149   : > { %v1158_v48 = vsel %vm1038_vm6, %v1153_v2, %v1157_v0  ;;  %v1340_v36 = vrot.slane %v5637_v35, 1  ;;  %v2013_v8 = vsel %vm1392_vm11, %v5061_v6, %v1853_v55  ;;  %4118 = vmatprep.mubr.msk.bf16.mxu0 %vm2076_vm13, %v1435_v50  ;;  %v1339_v27 = vrot.slane %v3857_v38, 1  ;;  %v2500_v55 = vld [vmem:[#allocation2 + $0xa8] sm:$0xf]  ;;  %v2535_v46 = vld [vmem:[#allocation2 + $0x9c] sm:$0xe] }
 0x14a   : > { %v1167_v22 = vshll.u32 %v4421_v16, 16  ;;  %v3990_v53 = vcombine.low %v2534_v60, %v5666_v34  ;;  %v2045_v18 = vsel %vm1425_vm12, %v2013_v8, %v1981_v32  ;;  %v2799_v0 = vsel %vm1038_vm6, %v2794_v52, %v2798_v33  ;;  %v1983_v6 = vpop.permute.xlu1 %1982  ;;  %v1371_v40 = vpop.permute.xlu0 %1370  ;;  %v5763_v50 = vld [vmem:[#allocation2 + $0xb0] ss:$0 sps:$4 sm:$0x11]  }
 0x14b   : > { %1247 = vrot.lane.b32.xlu0 %v1146_v56, %s4626_s30  ;;  %v1342_v35 = vrot.slane %v3858_v26, 1  ;;  %v1343_v37 = vrot.slane %v4421_v16, 1  ;;  %4084 = vmatprep.mubr.msk.bf16.mxu1 %vm2076_vm13, %v2045_v18  ;;  %v2787_v61 = vsel %vm1038_vm6, %v2782_v17, %v2786_v39  ;;  %v1160_v14 = vshrl.u32 %v5707_v28, 16  ;;  %v4427_v33 = vld [vmem:[#allocation2 + $0xa4] ss:$0 sps:$4 sm:$0x11]  }
 0x14c   : > { %3006 = vrot.lane.b32.xlu1 %v2969_v15, %s4625_s22  ;;  %v1164_v34 = vrot.slane %v1162_v23, 1  ;;  %v1174_v44 = vshll.u32 %v5727_v45, 16  ;;  %v1404_v62 = vsel %vm1392_vm11, %v5065_v9, %v5701_v49  ;;  %v2971_v24 = vrot.slane %v5678_v47, 1  ;;  %v870_v17 = vld [vmem:[#allocation2 + $0x90] sm:$0xf] }
 0x14d   : > { %v5751_v56 = vcombine.low %v2498_v1, %v2499_v30  ;;  %v2015_v2 = vsel %vm1392_vm11, %v5093_v51, %v1855_v20  ;;  %v2970_v63 = vrot.slane %v3990_v53, 1  ;;  %v1437_v38 = vsel %vm1425_vm12, %v1404_v62, %v1371_v40  ;;  %v5784_v40 = vld [vmem:[#allocation2 + $0xa0] sm:$0xf] }
 0x14e   : > { %v2047_v29 = vsel %vm1425_vm12, %v2015_v2, %v1983_v6  ;;  %v5759_v16 = vcombine.low %v2500_v55, %v5741_v21  ;;  %v1169_v10 = vrot.slane %v1167_v22, 1  ;;  %v1344_v9 = vsel %vm1311_vm7, %v1342_v35, %v1343_v37  ;;  %v1857_v39 = vpop.permute.xlu1 %1856  ;;  %v1244_v8 = vpop.permute.xlu0 %1243  ;;  %v906_v35 = vld [vmem:[#allocation2 + $0x90] sm:$0xe]  ;;  %v905_v55 = vld [vmem:[#allocation2 + $0x84] sm:$0xe] }
 0x14f   : > { %1249 = vrot.lane.b32.xlu0 %v1158_v48, %s4626_s30  ;;  %v1179_v47 = vshll.u32 %v5733_v19, 16  ;;  %v3991_v49 = vcombine.low %v2535_v46, %v2499_v30  ;;  %4085 = vmatmul.mubr.msk.bf16.gmra.mrb[8].mxu1 %vm2076_vm13, %v2047_v29  ;;  %v1165_v51 = vor.u32 %v1164_v34, %v1160_v14  ;;  %v1172_v15 = vshrl.u32 %v5727_v45, 16  ;;  %v871_v48 = vld [vmem:[#allocation2 + $0x94] sm:$0xf]  ;;  %v872_v46 = vld [vmem:[#allocation2 + $0x9c] sm:$0xf] }
 0x150   : > { %2880 = vrot.lane.b32.xlu1 %v2799_v0, %s4626_s30  ;;  %4119 = vmatmul.mubr.msk.bf16.gmra.mrb[8].mxu0 %vm2076_vm13, %v1437_v38  ;;  %v1176_v52 = vrot.slane %v1174_v44, 1  ;;  %v2815_v26 = vshll.u32 %v5759_v16, 16  ;;  %v1341_v60 = vsel %vm1311_vm7, %v1339_v27, %v1340_v36  ;;  %v2803_v32 = vshll.u32 %v5751_v56, 16  ;;  %v4433_v44 = vld [vmem:[#allocation2 + $0x98] ss:$0 sps:$4 sm:$0x11]  }
 0x151   : > { %v2972_v23 = vsel %vm1311_vm7, %v2970_v63, %v2971_v24  ;;  %v2974_v20 = vrot.slane %v4427_v33, 1  ;;  %v2973_v1 = vrot.slane %v3991_v49, 1  ;;  %v2813_v22 = vshrl.u32 %v5759_v16, 16  ;;  %v2536_v38 = vld [vmem:[#allocation2 + $0xa8] sm:$0xe] }
 0x152   : > { %v2817_v53 = vrot.slane %v2815_v26, 1  ;;  %v2820_v30 = vshll.u32 %v5763_v50, 16  ;;  %v1170_v36 = vsel %vm1038_vm6, %v1165_v51, %v1169_v10  ;;  %v1177_v27 = vor.u32 %v1176_v52, %v1172_v15  ;;  %v1373_v34 = vpop.permute.xlu1 %1372  ;;  %v5792_v49 = vld [vmem:[#allocation2 + $0xc4] sm:$0xf]  ;;  %v2502_v26 = vld [vmem:[#allocation2 + $0xb4] sm:$0xf] }
 0x153   : > { %2878 = vrot.lane.b32.xlu0 %v2787_v61, %s4626_s30  ;;  %v1181_v18 = vrot.slane %v1179_v47, 1  ;;  %v2808_v0 = vshll.u32 %v4427_v33, 16  ;;  %v2801_v37 = vshrl.u32 %v5751_v56, 16  ;;  %v2805_v6 = vrot.slane %v2803_v32, 1  ;;  %v2504_v47 = vld [vmem:[#allocation2 + $0xc0] sm:$0xf] }
 0x154   : > { %1380 = vrot.lane.b32.xlu1 %v1344_v9, %s4625_s22  ;;  %v5779_v61 = vcombine.low %v870_v17, %v871_v48  ;;  %v1406_v14 = vsel %vm1392_vm11, %v5101_v5, %v1244_v8  ;;  %v2975_v24 = vsel %vm1311_vm7, %v2973_v1, %v2974_v20  ;;  %v2818_v2 = vor.u32 %v2817_v53, %v2813_v22  ;;  %v2537_v20 = vld [vmem:[#allocation2 + $0xb4] sm:$0xe]  ;;  %v1246_v53 = vpop.permute.xlu0 %1245 }
 0x155   : > { %v1439_v62 = vsel %vm1425_vm12, %v1406_v14, %v1373_v34  ;;  %v2822_v63 = vrot.slane %v2820_v30, 1  ;;  %v3860_v29 = vcombine.low %v906_v35, %v871_v48  ;;  %v1182_v5 = vsel %vm1038_vm6, %v1177_v27, %v1181_v18 }
 0x156   : > { %4122 = vmatprep.mubr.msk.bf16.mxu0 %vm2076_vm13, %v1439_v62  ;;  %v2810_v10 = vrot.slane %v2808_v0, 1  ;;  %v3859_v9 = vcombine.low %v905_v55, %v5715_v58  ;;  %v2806_v51 = vor.u32 %v2805_v6, %v2801_v37  ;;  %v1186_v15 = vshll.u32 %v5779_v61, 16  ;;  %v1985_v32 = vpop.permute.xlu1 %1984  ;;  %v4452_v0 = vld [vmem:[%s4843_s29 + $0x10] sm:$0x3f]  }
 0x157   : > { %1378 = vrot.lane.b32.xlu0 %v1341_v60, %s4625_s22  ;;  %v2017_v52 = vsel %vm1392_vm11, %v5142_v3, %v1857_v39  ;;  %v5798_v33 = vcombine.low %v872_v46, %v5784_v40  ;;  %v2503_v60 = vld [vmem:[#allocation2 + $0xb8] sm:$0xf]  ;;  %v1346_v17 = vrot.slane %v5733_v19, 1  ;;  %v3992_v58 = vcombine.low %v2536_v38, %v5741_v21  ;;  %v5811_v21 = vld [vmem:[#allocation2 + $0xa4] ss:$0 sps:$4 sm:$0x11]   ;;  %4245 = vmatprep.subr.msk.bf16.mxu0 %vm2109_vm14, %v4452_v0 }
 0x158   : > { %3008 = vrot.lane.b32.xlu1 %v2972_v23, %s4625_s22  ;;  %v2049_v23 = vsel %vm1425_vm12, %v2017_v52, %v1985_v32  ;;  %v2823_v48 = vsel %vm1038_vm6, %v2818_v2, %v2822_v63  ;;  %v1348_v8 = vrot.slane %v3860_v29, 1  ;;  %v1349_v3 = vrot.slane %v4433_v44, 1  ;;  %v4439_v6 = vld [vmem:[#allocation2 + $0xbc] ss:$0 sps:$4 sm:$0x11]  }
 0x159   : > { %4088 = vmatprep.mubr.msk.bf16.mxu1 %vm2076_vm13, %v2049_v23  ;;  %v5807_v39 = vcombine.low %v2504_v47, %v5792_v49  ;;  %v1345_v1 = vrot.slane %v3859_v9, 1  ;;  %v1184_v19 = vshrl.u32 %v5779_v61, 16  ;;  %v1191_v22 = vshll.u32 %v4433_v44, 16  ;;  %v5821_v44 = vld [vmem:[#allocation2 + $0xc8] ss:$0 sps:$4 sm:$0x11]  }
 0x15a   : > { %v5813_v30 = vcombine.low %v2502_v26, %v2503_v60  ;;  %v1188_v27 = vrot.slane %v1186_v15, 1  ;;  %v1198_v18 = vshll.u32 %v5798_v33, 16  ;;  %v2976_v35 = vrot.slane %v3992_v58, 1  ;;  %v1987_v34 = vpop.permute.xlu1 %1986  ;;  %v874_v63 = vld [vmem:[#allocation2 + $0xa8] sm:$0xf] }
 0x15b   : > { %1251 = vrot.lane.b32.xlu0 %v1170_v36, %s4626_s30  ;;  %v2811_v36 = vsel %vm1038_vm6, %v2806_v51, %v2810_v10  ;;  %v2977_v37 = vrot.slane %v5763_v50, 1  ;;  %v3993_v55 = vcombine.low %v2537_v20, %v2503_v60  ;;  %v1350_v14 = vsel %vm1311_vm7, %v1348_v8, %v1349_v3  ;;  %v875_v10 = vld [vmem:[#allocation2 + $0xac] sm:$0xf]  ;;  %v907_v60 = vld [vmem:[#allocation2 + $0x9c] sm:$0xe] }
 0x15c   : > { %3010 = vrot.lane.b32.xlu1 %v2975_v24, %s4625_s22  ;;  %v2839_v46 = vshll.u32 %v5807_v39, 16  ;;  %v1347_v62 = vsel %vm1311_vm7, %v1345_v1, %v1346_v17  ;;  %v1193_v24 = vrot.slane %v1191_v22, 1  ;;  %v2827_v2 = vshll.u32 %v5813_v30, 16  ;;  %v908_v1 = vld [vmem:[#allocation2 + $0xa8] sm:$0xe] }
 0x15d   : > { %v1189_v50 = vor.u32 %v1188_v27, %v1184_v19  ;;  %v1196_v29 = vshrl.u32 %v5798_v33, 16  ;;  %v1200_v38 = vrot.slane %v1198_v18, 1  ;;  %v2978_v9 = vsel %vm1311_vm7, %v2976_v35, %v2977_v37  ;;  %v876_v37 = vld [vmem:[#allocation2 + $0xb4] sm:$0xf] }
 0x15e   : > { %v2832_v47 = vshll.u32 %v4439_v6, 16  ;;  %v1859_v51 = vpop.permute.xlu0 %1858  ;;  %v2979_v15 = vrot.slane %v3993_v55, 1  ;;  %v2980_v52 = vrot.slane %v4439_v6, 1  ;;  %v2837_v32 = vshrl.u32 %v5807_v39, 16  ;;  %v2861_v23 = vpop.permute.xlu1 %2860  ;;  %v5848_v6 = vld [vmem:[#allocation2 + $0xb8] sm:$0xf] }
 0x15f   : > { %1253 = vrot.lane.b32.xlu0 %v1182_v5, %s4626_s30  ;;  %v1203_v5 = vshll.u32 %v5811_v21, 16  ;;  %v2019_v26 = vsel %vm1392_vm11, %v5213_v43, %v1859_v51  ;;  %v2841_v17 = vrot.slane %v2839_v46, 1  ;;  %v2844_v58 = vshll.u32 %v5821_v44, 16  ;;  %v4445_v46 = vld [vmem:[#allocation2 + $0xb0] ss:$0 sps:$4 sm:$0x11]  }
 0x160   : > { %2884 = vrot.lane.b32.xlu1 %v2823_v48, %s4626_s30  ;;  %v2825_v20 = vshrl.u32 %v5813_v30, 16  ;;  %v2829_v48 = vrot.slane %v2827_v2, 1  ;;  %v2051_v8 = vsel %vm1425_vm12, %v2019_v26, %v1987_v34  ;;  %v5839_v3 = vcombine.low %v874_v63, %v875_v10  ;;  %v2538_v2 = vld [vmem:[#allocation2 + $0xc0] sm:$0xe] }
 0x161   : > { %v1194_v19 = vsel %vm1038_vm6, %v1189_v50, %v1193_v24  ;;  %v1201_v43 = vor.u32 %v1200_v38, %v1196_v29  ;;  %v1205_v22 = vrot.slane %v1203_v5, 1  ;;  %4089 = vmatmul.mubr.msk.bf16.gmra.mrb[12].mxu1 %vm2076_vm13, %v2051_v8  ;;  %v2981_v27 = vsel %vm1311_vm7, %v2979_v15, %v2980_v52  ;;  %v5862_v52 = vld [vmem:[#allocation2 + $0xbc] ss:$0 sps:$4 sm:$0x11]  }
 0x162   : > { %v3861_v18 = vcombine.low %v907_v60, %v5784_v40  ;;  %v1375_v35 = vpop.permute.xlu0 %1374  ;;  %v2846_v34 = vrot.slane %v2844_v58, 1  ;;  %v2830_v24 = vor.u32 %v2829_v48, %v2825_v20  ;;  %v3125_v40 = vsel %vm2109_vm14, %v4452_v0, 0 }
 0x163   : > { %2882 = vrot.lane.b32.xlu0 %v2811_v36, %s4626_s30  ;;  %v1408_v36 = vsel %vm1392_vm11, %v5146_v4, %v1246_v53  ;;  %v2834_v4 = vrot.slane %v2832_v47, 1  ;;  %v1210_v53 = vshll.u32 %v5839_v3, 16  ;;  %v1206_v63 = vsel %vm1038_vm6, %v1201_v43, %v1205_v22  ;;  %4143 = vmatpush3.bf16.msra.mxu0 %v3125_v40 }
 0x164   : > { %1384 = vrot.lane.b32.xlu1 %v1350_v14, %s4625_s22  ;;  %v1441_v55 = vsel %vm1425_vm12, %v1408_v36, %v1375_v35  ;;  %v2842_v14 = vor.u32 %v2841_v17, %v2837_v32  ;;  %v5857_v50 = vcombine.low %v876_v37, %v5848_v6  ;;  %v1351_v38 = vrot.slane %v3861_v18, 1  ;;  %v4451_v37 = vld [vmem:[#allocation2 + $0xd4] ss:$0 sps:$4 sm:$0x11]  }
 0x165   : > { %4123 = vmatmul.mubr.msk.bf16.gmra.mrb[12].mxu0 %vm2076_vm13, %v1441_v55  ;;  %v1352_v5 = vrot.slane %v5811_v21, 1  ;;  %v1355_v15 = vrot.slane %v4445_v46, 1  ;;  %v3994_v0 = vcombine.low %v2538_v2, %v5792_v49  ;;  %v2835_v26 = vsel %vm1038_vm6, %v2830_v24, %v2834_v4  ;;  %v2539_v21 = vld [vmem:[#allocation2 + $0xcc] sm:$0xe] }
 0x166   : > { %v2847_v47 = vsel %vm1038_vm6, %v2842_v14, %v2846_v34  ;;  %v1208_v60 = vshrl.u32 %v5839_v3, 16  ;;  %v1212_v32 = vrot.slane %v1210_v53, 1  ;;  %v1215_v17 = vshll.u32 %v4445_v46, 16 }
 0x167   : > { %1382 = vrot.lane.b32.xlu0 %v1347_v62, %s4625_s22  ;;  %v3862_v62 = vcombine.low %v908_v1, %v875_v10  ;;  %v1989_v29 = vpop.permute.xlu1 %1988  ;;  %v2506_v10 = vld [vmem:[#allocation2 + $0xcc] sm:$0xf]  ;;  %v3021_v20 = vsel %vm1392_vm11, %v5128_v59, %v2861_v23  ;;  %v1222_v8 = vshll.u32 %v5857_v50, 16  ;;  %v2982_v36 = vrot.slane %v3994_v0, 1 }
 0x168   : > { %3012 = vrot.lane.b32.xlu1 %v2978_v9, %s4625_s22  ;;  %v2507_v9 = vld [vmem:[#allocation2 + $0xd0] sm:$0xf]  ;;  %v1217_v23 = vrot.slane %v1215_v17, 1  ;;  %v1227_v18 = vshll.u32 %v5862_v52, 16  ;;  %v1353_v55 = vsel %vm1311_vm7, %v1351_v38, %v1352_v5  ;;  %v1220_v14 = vshrl.u32 %v5857_v50, 16 }
 0x169   : > { %v1354_v51 = vrot.slane %v3862_v62, 1  ;;  %v1861_v58 = vpop.permute.xlu0 %1860  ;;  %v5873_v1 = vcombine.low %v2506_v10, %v2507_v9  ;;  %v3995_v59 = vcombine.low %v2539_v21, %v2507_v9  ;;  %v1224_v34 = vrot.slane %v1222_v8, 1  ;;  %v909_v9 = vld [vmem:[#allocation2 + $0xb4] sm:$0xe] }
 0x16a   : > { %v2021_v48 = vsel %vm1392_vm11, %v5259_v54, %v1861_v58  ;;  %v1213_v54 = vor.u32 %v1212_v32, %v1208_v60  ;;  %v2986_v24 = vrot.slane %v4451_v37, 1  ;;  %v1229_v2 = vrot.slane %v1227_v18, 1 }
 0x16b   : > { %1255 = vrot.lane.b32.xlu0 %v1194_v19, %s4626_s30  ;;  %v2989_v49 = vpop.permute.xlu1 %2988  ;;  %v2053_v19 = vsel %vm1425_vm12, %v2021_v48, %v1989_v29  ;;  %v1356_v22 = vsel %vm1311_vm7, %v1354_v51, %v1355_v15  ;;  %v2985_v62 = vrot.slane %v3995_v59, 1  ;;  %v2856_v40 = vshll.u32 %v4451_v37, 16  ;;  %v6252_v15 = vld [vmem:[#allocation15_spill] sm:$0xff]  ;;  %v3320_v37 = vld [vmem:[%s5909_s17] sm:$0xff] }
 0x16c   : > { %3014 = vrot.lane.b32.xlu1 %v2981_v27, %s4625_s22  ;;  %v3053_v43 = vsel %vm1425_vm12, %v3021_v20, %v2989_v49  ;;  %v2983_v27 = vrot.slane %v5821_v44, 1  ;;  %4092 = vmatprep.mubr.msk.bf16.mxu1 %vm2076_vm13, %v2053_v19  ;;  %v2851_v44 = vshll.u32 %v5873_v1, 16  ;;  %v1218_v53 = vsel %vm1038_vm6, %v1213_v54, %v1217_v23  ;;  %v3321_v20 = vld [vmem:[%s5909_s17 + $0x8] sm:$0xff]  ;;  %v3322_v19 = vld [vmem:[%s5909_s17 + $0x10] sm:$0xff] }
 0x16d   : > { %4144 = vmatprep.mubr.msk.bf16.mxu0 %vm2076_vm13, %v3053_v43  ;;  %v1225_v29 = vor.u32 %v1224_v34, %v1220_v14  ;;  %v2849_v38 = vshrl.u32 %v5873_v1, 16  ;;  %v2987_v51 = vsel %vm1311_vm7, %v2985_v62, %v2986_v24  ;;  %v2858_v17 = vrot.slane %v2856_v40, 1  ;;  %v6254_v59 = vld [vmem:[#allocation19_spill] sm:$0xff]  ;;  %v3326_v34 = vld [vmem:[%s5909_s17 + $0x30] sm:$0xff]  ;;  %v3328_v24 = vld [vmem:[%s5909_s17 + $0x40] sm:$0xff] }
 0x16e   : > { %v2984_v46 = vsel %vm1311_vm7, %v2982_v36, %v2983_v27  ;;  %v2853_v5 = vrot.slane %v2851_v44, 1  ;;  %v1358_v8 = vrot.slane %v5862_v52, 1  ;;  %v6253_v36 = vld [vmem:[#allocation14_spill] sm:$0xff]  ;;  %v3323_v44 = vld [vmem:[%s5909_s17 + $0x18] sm:$0xff]  ;;  %v3325_v40 = vld [vmem:[%s5909_s17 + $0x28] sm:$0xff] }
 0x16f   : > { %1257 = vrot.lane.b32.xlu0 %v1206_v63, %s4626_s30  ;;  %v1863_v35 = vpop.permute.xlu0 %1862  ;;  %v2991_v4 = vpop.permute.xlu1 %2990  ;;  %v3324_v52 = vld [vmem:[%s5909_s17 + $0x20] sm:$0xff] }
 0x170   : > { %2888 = vrot.lane.b32.xlu1 %v2847_v47, %s4626_s30  ;;  %v2023_v0 = vsel %vm1392_vm11, %v6252_v15, %v1863_v35  ;;  %v2854_v32 = vor.u32 %v2853_v5, %v2849_v38  ;;  %v3330_v5 = vld [vmem:[%s5909_s17 + $0x50] sm:$0xff]  ;;  %v6257_v15 = vld [vmem:[#allocation17_spill] sm:$0xff] }
 0x173   : > { %2886 = vrot.lane.b32.xlu0 %v2835_v26, %s4626_s30  ;;  %v2863_v63 = vpop.permute.xlu0 %2862  ;;  %v3863_v26 = vcombine.low %v909_v9, %v5848_v6  ;;  %v2865_v21 = vpop.permute.xlu1 %2864  ;;  %v2859_v6 = vsel %vm1038_vm6, %v2854_v32, %v2858_v17  ;;  %v3332_v32 = vld [vmem:[%s5909_s17 + $0x60] sm:$0xff] }
 0x174   : > { %1388 = vrot.lane.b32.xlu1 %v1356_v22, %s4625_s22  ;;  %v3023_v10 = vsel %vm1392_vm11, %v5151_v13, %v2863_v63  ;;  %v1230_v13 = vsel %vm1038_vm6, %v1225_v29, %v1229_v2  ;;  %v3025_v27 = vsel %vm1392_vm11, %v6253_v36, %v2865_v21  ;;  %v6256_v63 = vld [vmem:[#allocation20_spill] sm:$0xff]  ;;  %v3329_v21 = vld [vmem:[%s5909_s17 + $0x48] sm:$0xff] }
 0x175   : > { %v3055_v47 = vsel %vm1425_vm12, %v3023_v10, %v2991_v4  ;;  %v1357_v48 = vrot.slane %v3863_v26, 1  ;;  %v6255_v4 = vld [vmem:[#allocation16_spill] sm:$0xff]  ;;  %v6258_v26 = vld [vmem:[#allocation22_spill] sm:$0xff] }
 0x176   : > { %4145 = vmatmul.mubr.msk.bf16.vlgmr.msra.gmra.mrb[0].mxu0 %vm2076_vm13, %v3055_v47  ;;  %v3327_v47 = vld [vmem:[%s5909_s17 + $0x38] sm:$0xff] }
 0x177   : > { %1386 = vrot.lane.b32.xlu0 %v1353_v55, %s4625_s22  ;;  %v1991_v60 = vpop.permute.xlu0 %1990  ;;  %v1359_v43 = vsel %vm1311_vm7, %v1357_v48, %v1358_v8  ;;  %v3331_v8 = vld [vmem:[%s5909_s17 + $0x58] sm:$0xff] }
 0x178   : > { %3016 = vrot.lane.b32.xlu1 %v2984_v46, %s4625_s22  ;;  %v2055_v58 = vsel %vm1425_vm12, %v2023_v0, %v1991_v60 }
 0x179   : > { %4093 = vmatmul.mubr.msk.bf16.gmra.mrb[16].mxu1 %vm2076_vm13, %v2055_v58 }
 0x17b   : > { %1259 = vrot.lane.b32.xlu0 %v1218_v53, %s4626_s30 }
 0x17c   : > { %3018 = vrot.lane.b32.xlu1 %v2987_v51, %s4625_s22 }
 0x17f   : > { %1261 = vrot.lane.b32.xlu0 %v1230_v13, %s4626_s30 }
 0x180   : > { %3359 = vperm.xlu1 %4314, %v3321_v20   ;;  %v1993_v49 = vpop.permute.xlu1 %1992 }
 0x183   : > { %2890 = vrot.lane.b32.xlu0 %v2859_v6, %s4626_s30  ;;  %v1865_v22 = vpop.permute.xlu0 %1864  ;;  %v3334_v6 = vld [vmem:[%s5909_s17 + $0x70] sm:$0xff] }
 0x184   : > { %3364 = vperm.xlu1 %4314, %v3322_v19   ;;  %v2025_v54 = vsel %vm1392_vm11, %v6254_v59, %v1865_v22  ;;  %v2993_v23 = vpop.permute.xlu1 %2992  ;;  %v6259_v22 = vld [vmem:[#allocation18_spill] sm:$0xff] }
 0x185   : > { %v2057_v18 = vsel %vm1425_vm12, %v2025_v54, %v1993_v49  ;;  %v3057_v35 = vsel %vm1425_vm12, %v3025_v27, %v2993_v23  ;;  %v3336_v49 = vld [vmem:[%s5909_s17 + $0x80] sm:$0xff]  ;;  %v3338_v54 = vld [vmem:[%s5909_s17 + $0x90] sm:$0xff] }
 0x186   : > { %4096 = vmatprep.mubr.msk.bf16.mxu1 %vm2076_vm13, %v2057_v18  ;;  %4148 = vmatprep.mubr.msk.bf16.mxu0 %vm2076_vm13, %v3057_v35  ;;  %v3335_v18 = vld [vmem:[%s5909_s17 + $0x78] sm:$0xff] }
 0x187   : > { %1390 = vrot.lane.b32.xlu0 %v1359_v43, %s4625_s22  ;;  %v3333_v43 = vld [vmem:[%s5909_s17 + $0x68] sm:$0xff] }
 0x188   : > { %3374 = vperm.xlu1 %4314, %v3324_v52   ;;  %v2995_v14 = vpop.permute.xlu1 %2994 }
 0x189   : > { %v1867_v55 = vpop.permute.xlu0 %1866 }
 0x18a   : > { %v2027_v29 = vsel %vm1392_vm11, %v6256_v63, %v1867_v55  ;;  %v3340_v55 = vld [vmem:[%s5909_s17 + $0xa0] sm:$0xff] }
 0x18b   : > { %3354 = vperm.xlu0 %4313, %v3320_v37   ;;  %v3344_v63 = vld [vmem:[%s5909_s17 + $0xc0] sm:$0xff] }
 0x18c   : > { %3384 = vperm.xlu1 %4314, %v3326_v34   ;;  %v2869_v62 = vpop.permute.xlu1 %2868 }
 0x18d   : > { %v2867_v46 = vpop.permute.xlu0 %2866  ;;  %v3029_v0 = vsel %vm1392_vm11, %v6257_v15, %v2869_v62 }
 0x18e   : > { %v3027_v53 = vsel %vm1392_vm11, %v6255_v4, %v2867_v46 }
 0x18f   : > { %3369 = vperm.xlu0 %4313, %v3323_v44   ;;  %v3059_v2 = vsel %vm1425_vm12, %v3027_v53, %v2995_v14  ;;  %v3337_v14 = vld [vmem:[%s5909_s17 + $0x88] sm:$0xff]  ;;  %v6260_v44 = vld [vmem:[#allocation21_spill] sm:$0xff] }
 0x190   : > { %4149 = vmatmul.mubr.msk.bf16.gmra.mrb[4].mxu0 %vm2076_vm13, %v3059_v2  ;;  %3394 = vperm.xlu1 %4314, %v3328_v24   ;;  %v3342_v24 = vld [vmem:[%s5909_s17 + $0xb0] sm:$0xff]  ;;  %v3339_v2 = vld [vmem:[%s5909_s17 + $0x98] sm:$0xff] }
 0x191   : > { %v1995_v38 = vpop.permute.xlu0 %1994 }
 0x192   : > { %v2059_v10 = vsel %vm1425_vm12, %v2027_v29, %v1995_v38 }
 0x193   : > { %v1997_v9 = vpop.permute.xlu1 %1996  ;;  %3379 = vperm.xlu0 %4313, %v3325_v40   ;;  %4097 = vmatmul.mubr.msk.bf16.gmra.mrb[20].mxu1 %vm2076_vm13, %v2059_v10  ;;  %v3343_v10 = vld [vmem:[%s5909_s17 + $0xb8] sm:$0xff] }
 0x194   : > { %3404 = vperm.xlu1 %4314, %v3330_v5   ;;  %v3346_v5 = vld [vmem:[%s5909_s17 + $0xd0] sm:$0xff] }
 0x196   : > { %v1869_v51 = vpop.permute.xlu0 %1868 }
 0x197   : > { %v2029_v60 = vsel %vm1392_vm11, %v6258_v26, %v1869_v51  ;;  %v2997_v13 = vpop.permute.xlu1 %2996  ;;  %3389 = vperm.xlu0 %4313, %v3327_v47   ;;  %v3345_v26 = vld [vmem:[%s5909_s17 + $0xc8] sm:$0xff] }
 0x198   : > { %v2061_v17 = vsel %vm1425_vm12, %v2029_v60, %v1997_v9  ;;  %v3061_v58 = vsel %vm1425_vm12, %v3029_v0, %v2997_v13  ;;  %3414 = vperm.xlu1 %4314, %v3332_v32   ;;  %v3348_v0 = vld [vmem:[%s5909_s17 + $0xe0] sm:$0xff] }
 0x199   : > { %4100 = vmatprep.mubr.msk.bf16.mxu1 %vm2076_vm13, %v2061_v17  ;;  %4152 = vmatprep.mubr.msk.bf16.mxu0 %vm2076_vm13, %v3061_v58 }
 0x19b   : > { %v2999_v20 = vpop.permute.xlu1 %2998  ;;  %3399 = vperm.xlu0 %4313, %v3329_v21   ;;  %v3350_v21 = vld [vmem:[%s5909_s17 + $0xf0] sm:$0xff] }
 0x19c   : > { %v1871_v48 = vpop.permute.xlu0 %1870  ;;  %3424 = vperm.xlu1 %4314, %v3334_v6   ;;  %v3347_v6 = vld [vmem:[%s5909_s17 + $0xd8] sm:$0xff] }
 0x19d   : > { %v2031_v23 = vsel %vm1392_vm11, %v5502_v12, %v1871_v48 }
 0x19f   : > { %3409 = vperm.xlu0 %4313, %v3331_v8   ;;  %v2873_v27 = vpop.permute.xlu1 %2872 }
 0x1a0   : > { %v2871_v19 = vpop.permute.xlu0 %2870  ;;  %3434 = vperm.xlu1 %4314, %v3336_v49   ;;  %v3033_v12 = vsel %vm1392_vm11, %v6260_v44, %v2873_v27 }
 0x1a1   : > { %v3031_v36 = vsel %vm1392_vm11, %v6259_v22, %v2871_v19  ;;  %v3349_v19 = vld [vmem:[%s5909_s17 + $0xe8] sm:$0xff] }
 0x1a2   : > { %v3063_v59 = vsel %vm1425_vm12, %v3031_v36, %v2999_v20  ;;  %v3351_v36 = vld [vmem:[%s5909_s17 + $0xf8] sm:$0xff] }
 0x1a3   : > { %4153 = vmatmul.mubr.msk.bf16.gmra.mrb[8].mxu0 %vm2076_vm13, %v3063_v59  ;;  %3419 = vperm.xlu0 %4313, %v3333_v43  }
 0x1a4   : > { %v1999_v52 = vpop.permute.xlu0 %1998  ;;  %3444 = vperm.xlu1 %4314, %v3338_v54  }
 0x1a5   : > { %v2063_v35 = vsel %vm1425_vm12, %v2031_v23, %v1999_v52 }
 0x1a6   : > { %4101 = vmatmul.mubr.msk.bf16.gmra.mrb[24].mxu1 %vm2076_vm13, %v2063_v35  ;;  %v2001_v37 = vpop.permute.xlu1 %2000 }
 0x1a7   : > { %3429 = vperm.xlu0 %4313, %v3335_v18  }
 0x1a8   : > { %3454 = vperm.xlu1 %4314, %v3340_v55  }
 0x1aa   : > { %v1873_v34 = vpop.permute.xlu0 %1872  ;;  %v3001_v62 = vpop.permute.xlu1 %3000 }
 0x1ab   : > { %v2033_v46 = vsel %vm1392_vm11, %v5572_v41, %v1873_v34  ;;  %3439 = vperm.xlu0 %4313, %v3337_v14   ;;  %v3065_v53 = vsel %vm1425_vm12, %v3033_v12, %v3001_v62  ;;  %v3341_v41 = vld [vmem:[%s5909_s17 + $0xa8] sm:$0xff] }
 0x1ac   : > { %v2065_v4 = vsel %vm1425_vm12, %v2033_v46, %v2001_v37  ;;  %4156 = vmatprep.mubr.msk.bf16.mxu0 %vm2076_vm13, %v3065_v53  ;;  %3464 = vperm.xlu1 %4314, %v3342_v24  }
 0x1ad   : > { %4104 = vmatprep.mubr.msk.bf16.mxu1 %vm2076_vm13, %v2065_v4 }
 0x1ae   : > { %v3003_v40 = vpop.permute.xlu1 %3002 }
 0x1af   : > { %3449 = vperm.xlu0 %4313, %v3339_v2  }
 0x1b0   : > { %3474 = vperm.xlu1 %4314, %v3344_v63  }
 0x1b1   : > { %v1875_v29 = vpop.permute.xlu0 %1874 }
 0x1b2   : > { %v2877_v38 = vpop.permute.xlu1 %2876  ;;  %v2035_v60 = vsel %vm1392_vm11, %v5608_v42, %v1875_v29 }
 0x1b3   : > { %3459 = vperm.xlu0 %4313, %v3341_v41  }
 0x1b4   : > { %3484 = vperm.xlu1 %4314, %v3346_v5  }
 0x1b5   : > { %v2875_v9 = vpop.permute.xlu0 %2874 }
 0x1b6   : > { %v3035_v47 = vsel %vm1392_vm11, %v5567_v31, %v2875_v9  ;;  %v1377_v15 = vpop.permute.xlu1 %1376  ;;  %v6261_v31 = vld [vmem:[#allocation23_spill] sm:$0xff] }
 0x1b7   : > { %v3067_v51 = vsel %vm1425_vm12, %v3035_v47, %v3003_v40  ;;  %3469 = vperm.xlu0 %4313, %v3343_v10   ;;  %v3037_v17 = vsel %vm1392_vm11, %v6261_v31, %v2877_v38 }
 0x1b8   : > { %4157 = vmatmul.mubr.msk.bf16.gmra.mrb[12].mxu0 %vm2076_vm13, %v3067_v51  ;;  %3494 = vperm.xlu1 %4314, %v3348_v0  }
 0x1b9   : > { %v2003_v13 = vpop.permute.xlu0 %2002 }
 0x1ba   : > { %v2067_v32 = vsel %vm1425_vm12, %v2035_v60, %v2003_v13  ;;  %v3005_v58 = vpop.permute.xlu1 %3004 }
 0x1bb   : > { %4105 = vmatmul.mubr.msk.bf16.gmra.mrb[28].mxu1 %vm2076_vm13, %v2067_v32  ;;  %3479 = vperm.xlu0 %4313, %v3345_v26   ;;  %v3069_v20 = vsel %vm1425_vm12, %v3037_v17, %v3005_v58 }
 0x1bc   : > { %4160 = vmatprep.mubr.msk.bf16.mxu0 %vm2076_vm13, %v3069_v20  ;;  %3504 = vperm.xlu1 %4314, %v3350_v21  }
 0x1bd   : > { %v1248_v48 = vpop.permute.xlu0 %1247 }
 0x1be   : > { %v1410_v42 = vsel %vm1392_vm11, %v5605_v11, %v1248_v48  ;;  %v3007_v49 = vpop.permute.xlu1 %3006 }
 0x1bf   : > { %v1443_v8 = vsel %vm1425_vm12, %v1410_v42, %v1377_v15  ;;  %3489 = vperm.xlu0 %4313, %v3347_v6  }
 0x1c0   : > { %4126 = vmatprep.mubr.msk.bf16.mxu1 %vm2076_vm13, %v1443_v8 }
 0x1c1   : > { %v1250_v43 = vpop.permute.xlu0 %1249 }
 0x1c2   : > { %v2881_v22 = vpop.permute.xlu1 %2880  ;;  %v1412_v11 = vsel %vm1392_vm11, %v5634_v7, %v1250_v43 }
 0x1c3   : > { %3499 = vperm.xlu0 %4313, %v3349_v19   ;;  %v3041_v35 = vsel %vm1392_vm11, %v5685_v57, %v2881_v22 }
 0x1c5   : > { %v2879_v27 = vpop.permute.xlu0 %2878 }
 0x1c6   : > { %v3039_v59 = vsel %vm1392_vm11, %v5659_v25, %v2879_v27  ;;  %v1381_v23 = vpop.permute.xlu1 %1380 }
 0x1c7   : > { %v3071_v54 = vsel %vm1425_vm12, %v3039_v59, %v3007_v49  ;;  %3509 = vperm.xlu0 %4313, %v3351_v36  }
 0x1c8   : > { %4161 = vmatmul.mubr.msk.bf16.gmra.mrb[16].mxu0 %vm2076_vm13, %v3071_v54 }
 0x1c9   : > { %v1379_v52 = vpop.permute.xlu0 %1378 }
 0x1ca   : > { %v1445_v18 = vsel %vm1425_vm12, %v1412_v11, %v1379_v52  ;;  %v3009_v37 = vpop.permute.xlu1 %3008 }
 0x1cb   : > { %4127 = vmatmul.mubr.msk.bf16.vlgmr.msra.gmra.mrb[16].mxu1 %vm2076_vm13, %v1445_v18  ;;  %v3073_v25 = vsel %vm1425_vm12, %v3041_v35, %v3009_v37 }
 0x1cc   : > { %4164 = vmatprep.mubr.msk.bf16.mxu0 %vm2076_vm13, %v3073_v25 }
 0x1cd   : > { %v1252_v55 = vpop.permute.xlu0 %1251 }
 0x1ce   : > { %v1414_v14 = vsel %vm1392_vm11, %v5707_v28, %v1252_v55  ;;  %v3011_v7 = vpop.permute.xlu1 %3010 }
 0x1cf   : > { %v1447_v34 = vsel %vm1425_vm12, %v1414_v14, %v1381_v23 }
 0x1d0   : > { %4130 = vmatprep.mubr.msk.bf16.mxu1 %vm2076_vm13, %v1447_v34 }
 0x1d1   : > { %v1254_v44 = vpop.permute.xlu0 %1253 }
 0x1d2   : > { %v2885_v12 = vpop.permute.xlu1 %2884  ;;  %v1416_v4 = vsel %vm1392_vm11, %v5727_v45, %v1254_v44 }
 0x1d3   : > { %v3045_v2 = vsel %vm1392_vm11, %v5759_v16, %v2885_v12 }
 0x1d5   : > { %v2883_v46 = vpop.permute.xlu0 %2882 }
 0x1d6   : > { %v3043_v57 = vsel %vm1392_vm11, %v5751_v56, %v2883_v46  ;;  %v1385_v24 = vpop.permute.xlu1 %1384 }
 0x1d7   : > { %v3075_v62 = vsel %vm1425_vm12, %v3043_v57, %v3011_v7 }
 0x1d8   : > { %4165 = vmatmul.mubr.msk.bf16.gmra.mrb[20].mxu0 %vm2076_vm13, %v3075_v62 }
 0x1d9   : > { %v1383_v28 = vpop.permute.xlu0 %1382 }
 0x1da   : > { %v1449_v53 = vsel %vm1425_vm12, %v1416_v4, %v1383_v28  ;;  %v3013_v40 = vpop.permute.xlu1 %3012 }
 0x1db   : > { %4131 = vmatmul.mubr.msk.bf16.gmra.mrb[20].mxu1 %vm2076_vm13, %v1449_v53  ;;  %v3077_v63 = vsel %vm1425_vm12, %v3045_v2, %v3013_v40 }
 0x1dc   : > { %4168 = vmatprep.mubr.msk.bf16.mxu0 %vm2076_vm13, %v3077_v63 }
 0x1dd   : > { %v1256_v56 = vpop.permute.xlu0 %1255 }
 0x1de   : > { %v1418_v41 = vsel %vm1392_vm11, %v5779_v61, %v1256_v56  ;;  %v3015_v45 = vpop.permute.xlu1 %3014 }
 0x1df   : > { %v1451_v29 = vsel %vm1425_vm12, %v1418_v41, %v1385_v24 }
 0x1e0   : > { %4134 = vmatprep.mubr.msk.bf16.mxu1 %vm2076_vm13, %v1451_v29 }
 0x1e1   : > { %v1258_v38 = vpop.permute.xlu0 %1257 }
 0x1e2   : > { %v2889_v5 = vpop.permute.xlu1 %2888  ;;  %v1420_v51 = vsel %vm1392_vm11, %v5798_v33, %v1258_v38 }
 0x1e3   : > { %v3049_v0 = vsel %vm1392_vm11, %v5807_v39, %v2889_v5 }
 0x1e5   : > { %v2887_v10 = vpop.permute.xlu0 %2886 }
 0x1e6   : > { %v3047_v16 = vsel %vm1392_vm11, %v5813_v30, %v2887_v10  ;;  %v1389_v47 = vpop.permute.xlu1 %1388 }
 0x1e7   : > { %v3079_v9 = vsel %vm1425_vm12, %v3047_v16, %v3015_v45 }
 0x1e8   : > { %4169 = vmatmul.mubr.msk.bf16.gmra.mrb[24].mxu0 %vm2076_vm13, %v3079_v9 }
 0x1e9   : > { %v1387_v61 = vpop.permute.xlu0 %1386 }
 0x1ea   : > { %v1453_v15 = vsel %vm1425_vm12, %v1420_v51, %v1387_v61  ;;  %v3017_v26 = vpop.permute.xlu1 %3016 }
 0x1eb   : > { %4135 = vmatmul.mubr.msk.bf16.gmra.mrb[24].mxu1 %vm2076_vm13, %v1453_v15  ;;  %v3081_v60 = vsel %vm1425_vm12, %v3049_v0, %v3017_v26 }
 0x1ec   : > { %4172 = vmatprep.mubr.msk.bf16.mxu0 %vm2076_vm13, %v3081_v60 }
 0x1ed   : > { %v1260_v30 = vpop.permute.xlu0 %1259 }
 0x1ee   : > { %v1422_v13 = vsel %vm1392_vm11, %v5839_v3, %v1260_v30  ;;  %v3019_v31 = vpop.permute.xlu1 %3018 }
 0x1ef   : > { %v1455_v32 = vsel %vm1425_vm12, %v1422_v13, %v1389_v47 }
 0x1f0   : > { %4138 = vmatprep.mubr.msk.bf16.mxu1 %vm2076_vm13, %v1455_v32 }
 0x1f1   : > { %v1262_v33 = vpop.permute.xlu0 %1261 }
 0x1f2   : > { %v1424_v21 = vsel %vm1392_vm11, %v5857_v50, %v1262_v33 }
 0x1f5   : > { %v2891_v17 = vpop.permute.xlu0 %2890 }
 0x1f6   : > { %v3051_v58 = vsel %vm1392_vm11, %v5873_v1, %v2891_v17 }
 0x1f7   : > { %v3083_v39 = vsel %vm1425_vm12, %v3051_v58, %v3019_v31 }
 0x1f8   : > { %4173 = vmatmul.mubr.msk.bf16.gmra.mrb[28].mxu0 %vm2076_vm13, %v3083_v39 }
 0x1f9   : > { %v1391_v20 = vpop.permute.xlu0 %1390 }
 0x1fa   : > { %v1457_v3 = vsel %vm1425_vm12, %v1424_v21, %v1391_v20 }
 0x1fb   : > { %4139 = vmatmul.mubr.msk.bf16.gmra.mrb[28].mxu1 %vm2076_vm13, %v1457_v3 }
 0x1ff   : > { %v3360_v52 = vpop.permute.xlu1 %3359 }
 0x203   : > { %v3365_v37 = vpop.permute.xlu1 %3364 }
 0x207   : > { %v3375_v45 = vpop.permute.xlu1 %3374 }
 0x20a   : > { %v3355_v18 = vpop.permute.xlu0 %3354 }
 0x20b   : > { %v3385_v9 = vpop.permute.xlu1 %3384 }
 0x20d   : > { %v4078_v6 = vpop.f32.mrb[0].mxu1 }
 0x20e   : > { %v2147_v48 = vpop.f32.mrb[1].mxu1  ;;  %v3370_v57 = vpop.permute.xlu0 %3369 }
 0x20f   : > { %v4079_v42 = vpop.f32.mrb[2].mxu1 }
 0x210   : > { %v2150_v8 = vpop.f32.mrb[3].mxu1 }
 0x212   : > { %v3380_v38 = vpop.permute.xlu0 %3379 }
 0x216   : > { %v3390_v26 = vpop.permute.xlu0 %3389 }
 0x219   : > { %v4082_v49 = vpop.f32.mrb[4].mxu1 }
 0x21a   : > { %v2163_v19 = vpop.f32.mrb[5].mxu1 }
 0x21b   : > { %v4083_v43 = vpop.f32.mrb[6].mxu1 }
 0x21c   : > { %v2166_v1 = vpop.f32.mrb[7].mxu1 }
 0x222   : > { %v6061_v22 = vpop.f32.mrb[8].mxu1 }
 0x223   : > { %v6063_v36 = vpop.f32.mrb[9].mxu1 }
 0x224   : > { %v6065_v27 = vpop.f32.mrb[10].mxu1 }
 0x225   : > { %v6067_v50 = vpop.f32.mrb[11].mxu1 }
 0x234   : > { %v6069_v59 = vpop.f32.mrb[12].mxu1 }
 0x235   : > { %v6071_v54 = vpop.f32.mrb[13].mxu1 }
 0x236   : > { %v6073_v23 = vpop.f32.mrb[14].mxu1 }
 0x237   : > { %v6075_v11 = vpop.f32.mrb[15].mxu1 }
 0x249   : > { %v4146_v35 = vpop.f32.mrb[0].mxu0 }
 0x24a   : > { %v4178_v25 = vadd.f32 %v4146_v35, %v4078_v6  ;;  %v3161_v55 = vpop.f32.mrb[1].mxu0  ;;  %v3395_v6 = vpop.permute.xlu1 %3394 }
 0x24b   : > { %v4179_v14 = vadd.f32 %v3161_v55, %v2147_v48  ;;  %v4147_v34 = vpop.f32.mrb[2].mxu0  ;;  %v3400_v48 = vpop.permute.xlu0 %3399 }
 0x24c   : > { %v3514_v7 = vadd.f32 %v4178_v25, %v3365_v37  ;;  %v4180_v44 = vadd.f32 %v4147_v34, %v4079_v42  ;;  %v3164_v12 = vpop.f32.mrb[3].mxu0 }
 0x24d   : > { %v3512_v46 = vadd.f32 %v4179_v14, %v3355_v18  ;;  %v4181_v62 = vadd.f32 %v3164_v12, %v2150_v8 }
 0x24e   : > { %vm3546_vm15 = vcmp.ge.f32.partialorder %v3514_v7, 0.0  ;;  %v3578_v24 = vmul.f32 0.2, %v3514_v7  ;;  %v3515_v4 = vadd.f32 %v4180_v44, %v3370_v57 }
 0x24f   : > { %vm3544_vm0 = vcmp.ge.f32.partialorder %v3512_v46, 0.0  ;;  %v3576_v28 = vmul.f32 0.2, %v3512_v46  ;;  %v3513_v53 = vadd.f32 %v4181_v62, %v3360_v52  ;;  %v3410_v37 = vpop.permute.xlu0 %3409 }
 0x250   : > { %v3610_v2 = vsel %vm3546_vm15, %v3514_v7, %v3578_v24  ;;  %vm3547_vm1 = vcmp.ge.f32.partialorder %v3515_v4, 0.0  ;;  %v3579_v40 = vmul.f32 0.2, %v3515_v4 }
 0x251   : > { %3642 = vst.msk [vmem:[%s6079_s27 + $0x10] sm:$0xff] %vm1425_vm12, %v3610_v2  ;;  %v3608_v63 = vsel %vm3544_vm0, %v3512_v46, %v3576_v28  ;;  %vm3545_vm2 = vcmp.ge.f32.partialorder %v3513_v53, 0.0  ;;  %v3577_v56 = vmul.f32 0.2, %v3513_v53 }
 0x252   : > { %3640 = vst.msk [vmem:[%s6079_s27] sm:$0xff] %vm1425_vm12, %v3608_v63  ;;  %v3611_v41 = vsel %vm3547_vm1, %v3515_v4, %v3579_v40 }
 0x253   : > { %3643 = vst.msk [vmem:[%s6079_s27 + $0x18] sm:$0xff] %vm1425_vm12, %v3611_v41  ;;  %v3609_v29 = vsel %vm3545_vm2, %v3513_v53, %v3577_v56  ;;  %v3420_v62 = vpop.permute.xlu0 %3419 }
 0x254   : > { %3641 = vst.msk [vmem:[%s6079_s27 + $0x8] sm:$0xff] %vm1425_vm12, %v3609_v29 }
 0x257   : > { %v3430_v29 = vpop.permute.xlu0 %3429 }
 0x263   : > { %v4150_v5 = vpop.f32.mrb[4].mxu0 }
 0x264   : > { %v4182_v10 = vadd.f32 %v4150_v5, %v4082_v49  ;;  %v3177_v16 = vpop.f32.mrb[5].mxu0 }
 0x265   : > { %v4183_v47 = vadd.f32 %v3177_v16, %v2163_v19  ;;  %v4151_v51 = vpop.f32.mrb[6].mxu0  ;;  %v3405_v19 = vpop.permute.xlu1 %3404 }
 0x266   : > { %v3518_v61 = vadd.f32 %v4182_v10, %v3385_v9  ;;  %v4184_v15 = vadd.f32 %v4151_v51, %v4083_v43  ;;  %v3180_v0 = vpop.f32.mrb[7].mxu0 }
 0x267   : > { %v3516_v60 = vadd.f32 %v4183_v47, %v3375_v45  ;;  %v4185_v30 = vadd.f32 %v3180_v0, %v2166_v1  ;;  %v3440_v0 = vpop.permute.xlu0 %3439 }
 0x268   : > { %vm3550_vm3 = vcmp.ge.f32.partialorder %v3518_v61, 0.0  ;;  %v3582_v13 = vmul.f32 0.2, %v3518_v61  ;;  %v3519_v32 = vadd.f32 %v4184_v15, %v3390_v26 }
 0x269   : > { %vm3548_vm4 = vcmp.ge.f32.partialorder %v3516_v60, 0.0  ;;  %v3580_v33 = vmul.f32 0.2, %v3516_v60  ;;  %v3517_v31 = vadd.f32 %v4185_v30, %v3380_v38  ;;  %v3415_v57 = vpop.permute.xlu1 %3414 }
 0x26a   : > { %v3614_v17 = vsel %vm3550_vm3, %v3518_v61, %v3582_v13  ;;  %vm3551_vm5 = vcmp.ge.f32.partialorder %v3519_v32, 0.0  ;;  %v3583_v58 = vmul.f32 0.2, %v3519_v32 }
 0x26b   : > { %3646 = vst.msk [vmem:[%s6079_s27 + $0x30] sm:$0xff] %vm1425_vm12, %v3614_v17  ;;  %v3612_v39 = vsel %vm3548_vm4, %v3516_v60, %v3580_v33  ;;  %vm3549_vm6 = vcmp.ge.f32.partialorder %v3517_v31, 0.0  ;;  %v3581_v21 = vmul.f32 0.2, %v3517_v31 }
 0x26c   : > { %3644 = vst.msk [vmem:[%s6079_s27 + $0x20] sm:$0xff] %vm1425_vm12, %v3612_v39  ;;  %v3615_v20 = vsel %vm3551_vm5, %v3519_v32, %v3583_v58 }
 0x26d   : > { %3647 = vst.msk [vmem:[%s6079_s27 + $0x38] sm:$0xff] %vm1425_vm12, %v3615_v20  ;;  %v3613_v3 = vsel %vm3549_vm6, %v3517_v31, %v3581_v21  ;;  %v3425_v53 = vpop.permute.xlu1 %3424 }
 0x26e   : > { %3645 = vst.msk [vmem:[%s6079_s27 + $0x28] sm:$0xff] %vm1425_vm12, %v3613_v3  ;;  %v3450_v3 = vpop.permute.xlu0 %3449 }
 0x271   : > { %v3435_v61 = vpop.permute.xlu1 %3434 }
 0x275   : > { %v3445_v31 = vpop.permute.xlu1 %3444 }
 0x276   : > { %v4154_v42 = vpop.f32.mrb[8].mxu0 }
 0x277   : > { %v4186_v8 = vadd.f32 %v4154_v42, %v6061_v22  ;;  %v3193_v49 = vpop.f32.mrb[9].mxu0 }
 0x278   : > { %v4187_v43 = vadd.f32 %v3193_v49, %v6063_v36  ;;  %v4155_v1 = vpop.f32.mrb[10].mxu0 }
 0x279   : > { %v3522_v52 = vadd.f32 %v4186_v8, %v3405_v19  ;;  %v4188_v18 = vadd.f32 %v4155_v1, %v6065_v27  ;;  %v3196_v35 = vpop.f32.mrb[11].mxu0 }
 0x27a   : > { %v3520_v25 = vadd.f32 %v4187_v43, %v3395_v6  ;;  %v4189_v55 = vadd.f32 %v3196_v35, %v6067_v50 }
 0x27b   : > { %vm3554_vm7 = vcmp.ge.f32.partialorder %v3522_v52, 0.0  ;;  %v3586_v14 = vmul.f32 0.2, %v3522_v52  ;;  %v3523_v22 = vadd.f32 %v4188_v18, %v3410_v37 }
 0x27c   : > { %vm3552_vm8 = vcmp.ge.f32.partialorder %v3520_v25, 0.0  ;;  %v3584_v34 = vmul.f32 0.2, %v3520_v25  ;;  %v3521_v7 = vadd.f32 %v4189_v55, %v3400_v48 }
 0x27d   : > { %v3618_v36 = vsel %vm3554_vm7, %v3522_v52, %v3586_v14  ;;  %vm3555_vm9 = vcmp.ge.f32.partialorder %v3523_v22, 0.0  ;;  %v3587_v44 = vmul.f32 0.2, %v3523_v22  ;;  %v3460_v14 = vpop.permute.xlu0 %3459 }
 0x27e   : > { %3650 = vst.msk [vmem:[%s6079_s27 + $0x50] sm:$0xff] %vm1425_vm12, %v3618_v36  ;;  %v3616_v27 = vsel %vm3552_vm8, %v3520_v25, %v3584_v34  ;;  %vm3553_vm10 = vcmp.ge.f32.partialorder %v3521_v7, 0.0  ;;  %v3585_v12 = vmul.f32 0.2, %v3521_v7  ;;  %v3455_v25 = vpop.permute.xlu1 %3454 }
 0x27f   : > { %3648 = vst.msk [vmem:[%s6079_s27 + $0x40] sm:$0xff] %vm1425_vm12, %v3616_v27  ;;  %v3619_v46 = vsel %vm3555_vm9, %v3523_v22, %v3587_v44 }
 0x280   : > { %3651 = vst.msk [vmem:[%s6079_s27 + $0x58] sm:$0xff] %vm1425_vm12, %v3619_v46  ;;  %v3617_v50 = vsel %vm3553_vm10, %v3521_v7, %v3585_v12 }
 0x281   : > { %3649 = vst.msk [vmem:[%s6079_s27 + $0x48] sm:$0xff] %vm1425_vm12, %v3617_v50 }
 0x282   : > { %v3465_v12 = vpop.permute.xlu1 %3464 }
 0x28b   : > { %v4158_v24 = vpop.f32.mrb[12].mxu0 }
 0x28c   : > { %v4190_v4 = vadd.f32 %v4158_v24, %v6069_v59  ;;  %v3209_v28 = vpop.f32.mrb[13].mxu0 }
 0x28d   : > { %v4191_v2 = vadd.f32 %v3209_v28, %v6071_v54  ;;  %v4159_v40 = vpop.f32.mrb[14].mxu0 }
 0x28e   : > { %v3526_v63 = vadd.f32 %v4190_v4, %v3425_v53  ;;  %v4192_v56 = vadd.f32 %v4159_v40, %v6073_v23  ;;  %v3212_v41 = vpop.f32.mrb[15].mxu0  ;;  %v3470_v4 = vpop.permute.xlu0 %3469 }
 0x28f   : > { %v3524_v45 = vadd.f32 %v4191_v2, %v3415_v57  ;;  %v4193_v38 = vadd.f32 %v3212_v41, %v6075_v11 }
 0x290   : > { %vm3558_vm11 = vcmp.ge.f32.partialorder %v3526_v63, 0.0  ;;  %v3590_v5 = vmul.f32 0.2, %v3526_v63  ;;  %v3527_v59 = vadd.f32 %v4192_v56, %v3430_v29 }
 0x291   : > { %vm3556_vm13 = vcmp.ge.f32.partialorder %v3524_v45, 0.0  ;;  %v3588_v10 = vmul.f32 0.2, %v3524_v45  ;;  %v3525_v16 = vadd.f32 %v4193_v38, %v3420_v62 }
 0x292   : > { %v3622_v54 = vsel %vm3558_vm11, %v3526_v63, %v3590_v5  ;;  %vm3559_vm14 = vcmp.ge.f32.partialorder %v3527_v59, 0.0  ;;  %v3591_v9 = vmul.f32 0.2, %v3527_v59 }
 0x293   : > { %3654 = vst.msk [vmem:[%s6079_s27 + $0x70] sm:$0xff] %vm1425_vm12, %v3622_v54  ;;  %v3620_v23 = vsel %vm3556_vm13, %v3524_v45, %v3588_v10  ;;  %vm3557_vm15 = vcmp.ge.f32.partialorder %v3525_v16, 0.0  ;;  %v3589_v47 = vmul.f32 0.2, %v3525_v16  ;;  %v3475_v10 = vpop.permute.xlu1 %3474  ;;  %v3480_v54 = vpop.permute.xlu0 %3479 }
 0x294   : > { %3652 = vst.msk [vmem:[%s6079_s27 + $0x60] sm:$0xff] %vm1425_vm12, %v3620_v23  ;;  %v3623_v51 = vsel %vm3559_vm14, %v3527_v59, %v3591_v9 }
 0x295   : > { %3655 = vst.msk [vmem:[%s6079_s27 + $0x78] sm:$0xff] %vm1425_vm12, %v3623_v51  ;;  %v3621_v11 = vsel %vm3557_vm15, %v3525_v16, %v3589_v47 }
 0x296   : > { %3653 = vst.msk [vmem:[%s6079_s27 + $0x68] sm:$0xff] %vm1425_vm12, %v3621_v11 }
 0x29b   : > { %v4162_v15 = vpop.f32.mrb[16].mxu0 }
 0x29c   : > { %v3225_v26 = vpop.f32.mrb[17].mxu0 }
 0x29d   : > { %v4163_v60 = vpop.f32.mrb[18].mxu0 }
 0x29e   : > { %v4128_v30 = vpop.f32.mrb[16].mxu1  ;;  %v3228_v13 = vpop.f32.mrb[19].mxu0 }
 0x29f   : > { %v4194_v32 = vadd.f32 %v4162_v15, %v4128_v30  ;;  %v2412_v33 = vpop.f32.mrb[17].mxu1  ;;  %v3485_v15 = vpop.permute.xlu1 %3484 }
 0x2a0   : > { %v4195_v17 = vadd.f32 %v3225_v26, %v2412_v33  ;;  %v4129_v58 = vpop.f32.mrb[18].mxu1 }
 0x2a1   : > { %v3530_v39 = vadd.f32 %v4194_v32, %v3445_v31  ;;  %v4196_v21 = vadd.f32 %v4163_v60, %v4129_v58  ;;  %v2415_v20 = vpop.f32.mrb[19].mxu1  ;;  %v3490_v32 = vpop.permute.xlu0 %3489 }
 0x2a2   : > { %v3528_v6 = vadd.f32 %v4195_v17, %v3435_v61  ;;  %v4197_v48 = vadd.f32 %v3228_v13, %v2415_v20 }
 0x2a3   : > { %vm3562_vm0 = vcmp.ge.f32.partialorder %v3530_v39, 0.0  ;;  %v3594_v42 = vmul.f32 0.2, %v3530_v39  ;;  %v3531_v8 = vadd.f32 %v4196_v21, %v3450_v3 }
 0x2a4   : > { %vm3560_vm1 = vcmp.ge.f32.partialorder %v3528_v6, 0.0  ;;  %v3592_v49 = vmul.f32 0.2, %v3528_v6  ;;  %v3529_v19 = vadd.f32 %v4197_v48, %v3440_v0 }
 0x2a5   : > { %v3626_v43 = vsel %vm3562_vm0, %v3530_v39, %v3594_v42  ;;  %vm3563_vm2 = vcmp.ge.f32.partialorder %v3531_v8, 0.0  ;;  %v3595_v1 = vmul.f32 0.2, %v3531_v8 }
 0x2a6   : > { %3658 = vst.msk [vmem:[%s6079_s27 + $0x90] sm:$0xff] %vm1425_vm12, %v3626_v43  ;;  %v3624_v52 = vsel %vm3560_vm1, %v3528_v6, %v3592_v49  ;;  %vm3561_vm3 = vcmp.ge.f32.partialorder %v3529_v19, 0.0  ;;  %v3593_v18 = vmul.f32 0.2, %v3529_v19  ;;  %v3495_v49 = vpop.permute.xlu1 %3494  ;;  %v3500_v43 = vpop.permute.xlu0 %3499 }
 0x2a7   : > { %3656 = vst.msk [vmem:[%s6079_s27 + $0x80] sm:$0xff] %vm1425_vm12, %v3624_v52  ;;  %v3627_v35 = vsel %vm3563_vm2, %v3531_v8, %v3595_v1 }
 0x2a8   : > { %3659 = vst.msk [vmem:[%s6079_s27 + $0x98] sm:$0xff] %vm1425_vm12, %v3627_v35  ;;  %v3625_v37 = vsel %vm3561_vm3, %v3529_v19, %v3593_v18 }
 0x2a9   : > { %3657 = vst.msk [vmem:[%s6079_s27 + $0x88] sm:$0xff] %vm1425_vm12, %v3625_v37 }
 0x2ab   : > { %v4166_v55 = vpop.f32.mrb[20].mxu0 }
 0x2ac   : > { %v3241_v22 = vpop.f32.mrb[21].mxu0 }
 0x2ad   : > { %v4167_v34 = vpop.f32.mrb[22].mxu0 }
 0x2ae   : > { %v4132_v7 = vpop.f32.mrb[20].mxu1  ;;  %v3244_v36 = vpop.f32.mrb[23].mxu0 }
 0x2af   : > { %v4198_v44 = vadd.f32 %v4166_v55, %v4132_v7  ;;  %v2428_v27 = vpop.f32.mrb[21].mxu1  ;;  %v3505_v55 = vpop.permute.xlu1 %3504 }
 0x2b0   : > { %v4199_v46 = vadd.f32 %v3241_v22, %v2428_v27  ;;  %v4133_v50 = vpop.f32.mrb[22].mxu1 }
 0x2b1   : > { %v3534_v57 = vadd.f32 %v4198_v44, %v3465_v12  ;;  %v4200_v62 = vadd.f32 %v4167_v34, %v4133_v50  ;;  %v2431_v24 = vpop.f32.mrb[23].mxu1  ;;  %v3510_v44 = vpop.permute.xlu0 %3509 }
 0x2b2   : > { %v3532_v28 = vadd.f32 %v4199_v46, %v3455_v25  ;;  %v4201_v53 = vadd.f32 %v3244_v36, %v2431_v24 }
 0x2b3   : > { %vm3566_vm4 = vcmp.ge.f32.partialorder %v3534_v57, 0.0  ;;  %v3598_v2 = vmul.f32 0.2, %v3534_v57  ;;  %v3535_v40 = vadd.f32 %v4200_v62, %v3470_v4 }
 0x2b4   : > { %vm3564_vm5 = vcmp.ge.f32.partialorder %v3532_v28, 0.0  ;;  %v3596_v63 = vmul.f32 0.2, %v3532_v28  ;;  %v3533_v56 = vadd.f32 %v4201_v53, %v3460_v14 }
 0x2b5   : > { %v3630_v41 = vsel %vm3566_vm4, %v3534_v57, %v3598_v2  ;;  %vm3567_vm6 = vcmp.ge.f32.partialorder %v3535_v40, 0.0  ;;  %v3599_v29 = vmul.f32 0.2, %v3535_v40 }
 0x2b6   : > { %3662 = vst.msk [vmem:[%s6079_s27 + $0xb0] sm:$0xff] %vm1425_vm12, %v3630_v41  ;;  %v3628_v45 = vsel %vm3564_vm5, %v3532_v28, %v3596_v63  ;;  %vm3565_vm7 = vcmp.ge.f32.partialorder %v3533_v56, 0.0  ;;  %v3597_v38 = vmul.f32 0.2, %v3533_v56 }
 0x2b7   : > { %3660 = vst.msk [vmem:[%s6079_s27 + $0xa0] sm:$0xff] %vm1425_vm12, %v3628_v45  ;;  %v3631_v5 = vsel %vm3567_vm6, %v3535_v40, %v3599_v29 }
 0x2b8   : > { %3663 = vst.msk [vmem:[%s6079_s27 + $0xb8] sm:$0xff] %vm1425_vm12, %v3631_v5  ;;  %v3629_v59 = vsel %vm3565_vm7, %v3533_v56, %v3597_v38 }
 0x2b9   : > { %3661 = vst.msk [vmem:[%s6079_s27 + $0xa8] sm:$0xff] %vm1425_vm12, %v3629_v59 }
 0x2bb   : > { %v4170_v16 = vpop.f32.mrb[24].mxu0 }
 0x2bc   : > { %v3257_v9 = vpop.f32.mrb[25].mxu0 }
 0x2bd   : > { %v4171_v23 = vpop.f32.mrb[26].mxu0 }
 0x2be   : > { %v4136_v47 = vpop.f32.mrb[24].mxu1  ;;  %v3260_v51 = vpop.f32.mrb[27].mxu0 }
 0x2bf   : > { %v4202_v11 = vadd.f32 %v4170_v16, %v4136_v47  ;;  %v2444_v61 = vpop.f32.mrb[25].mxu1 }
 0x2c0   : > { %v4203_v0 = vadd.f32 %v3257_v9, %v2444_v61  ;;  %v4137_v26 = vpop.f32.mrb[26].mxu1 }
 0x2c1   : > { %v3538_v60 = vadd.f32 %v4202_v11, %v3485_v15  ;;  %v4204_v30 = vadd.f32 %v4171_v23, %v4137_v26  ;;  %v2447_v13 = vpop.f32.mrb[27].mxu1 }
 0x2c2   : > { %v3536_v33 = vadd.f32 %v4203_v0, %v3475_v10  ;;  %v4205_v31 = vadd.f32 %v3260_v51, %v2447_v13 }
 0x2c3   : > { %vm3570_vm8 = vcmp.ge.f32.partialorder %v3538_v60, 0.0  ;;  %v3602_v17 = vmul.f32 0.2, %v3538_v60  ;;  %v3539_v58 = vadd.f32 %v4204_v30, %v3490_v32 }
 0x2c4   : > { %vm3568_vm9 = vcmp.ge.f32.partialorder %v3536_v33, 0.0  ;;  %v3600_v39 = vmul.f32 0.2, %v3536_v33  ;;  %v3537_v21 = vadd.f32 %v4205_v31, %v3480_v54 }
 0x2c5   : > { %v3634_v20 = vsel %vm3570_vm8, %v3538_v60, %v3602_v17  ;;  %vm3571_vm10 = vcmp.ge.f32.partialorder %v3539_v58, 0.0  ;;  %v3603_v3 = vmul.f32 0.2, %v3539_v58 }
 0x2c6   : > { %3666 = vst.msk [vmem:[%s6079_s27 + $0xd0] sm:$0xff] %vm1425_vm12, %v3634_v20  ;;  %v3632_v6 = vsel %vm3568_vm9, %v3536_v33, %v3600_v39  ;;  %vm3569_vm11 = vcmp.ge.f32.partialorder %v3537_v21, 0.0  ;;  %v3601_v48 = vmul.f32 0.2, %v3537_v21 }
 0x2c7   : > { %3664 = vst.msk [vmem:[%s6079_s27 + $0xc0] sm:$0xff] %vm1425_vm12, %v3632_v6  ;;  %v3635_v42 = vsel %vm3571_vm10, %v3539_v58, %v3603_v3 }
 0x2c8   : > { %3667 = vst.msk [vmem:[%s6079_s27 + $0xd8] sm:$0xff] %vm1425_vm12, %v3635_v42  ;;  %v3633_v8 = vsel %vm3569_vm11, %v3537_v21, %v3601_v48 }
 0x2c9   : > { %3665 = vst.msk [vmem:[%s6079_s27 + $0xc8] sm:$0xff] %vm1425_vm12, %v3633_v8 }
 0x2cb   : > { %v4174_v19 = vpop.f32.mrb[28].mxu0 }
 0x2cc   : > { %v3273_v1 = vpop.f32.mrb[29].mxu0 }
 0x2cd   : > { %v4175_v52 = vpop.f32.mrb[30].mxu0 }
 0x2ce   : > { %v4140_v18 = vpop.f32.mrb[28].mxu1  ;;  %v3276_v35 = vpop.f32.mrb[31].mxu0 }
 0x2cf   : > { %v4206_v37 = vadd.f32 %v4174_v19, %v4140_v18  ;;  %v2460_v25 = vpop.f32.mrb[29].mxu1 }
 0x2d0   : > { %v4207_v14 = vadd.f32 %v3273_v1, %v2460_v25  ;;  %v4141_v22 = vpop.f32.mrb[30].mxu1 }
 0x2d1   : > { %v3542_v34 = vadd.f32 %v4206_v37, %v3505_v55  ;;  %v4208_v7 = vadd.f32 %v4175_v52, %v4141_v22  ;;  %v2463_v36 = vpop.f32.mrb[31].mxu1 }
 0x2d2   : > { %v3540_v27 = vadd.f32 %v4207_v14, %v3495_v49  ;;  %v4209_v12 = vadd.f32 %v3276_v35, %v2463_v36 }
 0x2d3   : > { %vm3574_vm13 = vcmp.ge.f32.partialorder %v3542_v34, 0.0  ;;  %v3606_v46 = vmul.f32 0.2, %v3542_v34  ;;  %v3543_v50 = vadd.f32 %v4208_v7, %v3510_v44 }
 0x2d4   : > { %vm3572_vm14 = vcmp.ge.f32.partialorder %v3540_v27, 0.0  ;;  %v3604_v57 = vmul.f32 0.2, %v3540_v27  ;;  %v3541_v62 = vadd.f32 %v4209_v12, %v3500_v43 }
 0x2d5   : > { %v3638_v24 = vsel %vm3574_vm13, %v3542_v34, %v3606_v46  ;;  %vm3575_vm15 = vcmp.ge.f32.partialorder %v3543_v50, 0.0  ;;  %v3607_v4 = vmul.f32 0.2, %v3543_v50 }
 0x2d6   : > { %3670 = vst.msk [vmem:[%s6079_s27 + $0xf0] sm:$0xff] %vm1425_vm12, %v3638_v24  ;;  %v3636_v28 = vsel %vm3572_vm14, %v3540_v27, %v3604_v57  ;;  %vm3573_vm0 = vcmp.ge.f32.partialorder %v3541_v62, 0.0  ;;  %v3605_v53 = vmul.f32 0.2, %v3541_v62 }
 0x2d7   : > { %3668 = vst.msk [vmem:[%s6079_s27 + $0xe0] sm:$0xff] %vm1425_vm12, %v3636_v28  ;;  %v3639_v2 = vsel %vm3575_vm15, %v3543_v50, %v3607_v4 }
 0x2d8   : > { %3671 = vst.msk [vmem:[%s6079_s27 + $0xf8] sm:$0xff] %vm1425_vm12, %v3639_v2  ;;  %v3637_v40 = vsel %vm3573_vm0, %v3541_v62, %v3605_v53 }
 0x2d9   : > { %3669 = vst.msk [vmem:[%s6079_s27 + $0xe8] sm:$0xff] %vm1425_vm12, %v3637_v40 }
 0x2da   : > { %4558 = shalt.err (!%p4555_p2)
}
 0x2db   : > { %s4559_s1 = scalar_lea.hbm %s6152_s16, 4096  ;;  %s4563_s9 = scalar_lea.hbm %s6208_s3, 8192 }
 0x2dc   : > { %p4560_p11 = scmp.ne.s32.totalorder %s6152_s16, %s4559_s1  ;;  %p4564_p3 = scmp.lt.u32.totalorder %s6152_s16, %s6208_s3 }
 0x2dd   : > { %p4565_p4 = scmp.lt.u32.totalorder %s4563_s9, %s4559_s1  ;;  %p4567_p13 = scmp.lt.u32.totalorder %s4559_s1, %s6152_s16 }
 0x2de   : > { %p4561_p7 = pnand %p4560_p11, %p6262_p5 }
 0x2df   : > { %p4566_p1 = por %p4565_p4, %p4564_p3 }
 0x2e0   : > { %p4562_p0 = pneg %p4561_p7 }
 0x2e1   : > { %p4568_p8 = por %p4567_p13, %p4566_p1 }
 0x2e3   : > { %p4569_p10 = pnand %p4568_p8, %p4562_p0 }
 0x2e5   : > { %4572 = shalt.err (!%p4569_p10)
}
 0x2e6   : > { %s4628_s10 = smov 128  }
 0x2e7   : > { %4255 = dma.vmem_to_hbm [thread:$0]  (%p6262_p5), %s6156_s25, 4096, %s6152_s16, %s3673_s21, %s4628_s10, %s4628_s10, %s4625_s22  }
 0x2e8 PF: > { %s3701_s17 = sand.u32 1, %s4603_s12   ;;  %p6263_p6 = scmp.ne.s32.totalorder %s6225_s24, 0 }
 0x2e9   : > { %p6264_p9 = scmp.ge.s32.totalorder %s4615_s15, 2  ;;  %s3702_s27 = scalar_lea.sflag [#allocation5], %s3701_s17 }
 0x2eb   : > { %p4268_p12 = pnand %p6264_p9, %p6263_p6 }
 0x2ed   : > { %4598 = dma.done.wait (!%p4268_p12), %s3702_s27, 4096  }
 0x2ee   : > { %4600 = vsyncadd (!%p4268_p12), %s3702_s27, 4294963200  ;;  %s6265_s23 = sld [smem:[#allocation13_spill]]  ;;  %p19_p2 = scmp.ge.s32.totalorder %s4674_s18, 4  }
 0x2ef   : > { %s6266_s12 = smov %s4607_s13  ;;  %s6267_s13 = smov %s4611_s14 }
 0x2f0   : > { %s6269_s15 = smov %s4674_s18  ;;  %21 = sbr.rel (!%p19_p2) target bundleno = 9 (0x9), region = 106 }
 0x2f4   : > { %s6268_s14 = smov %s6265_s23 }
 0x2f7   :  { %3707 = vsyncpa [#allocation4], 1 }
 0x2f8   :  { %3709 = vsyncpa [#allocation4 + $0x1], 1 }
 0x2f9   :  { %3710 = vsyncpa [#allocation7], 1 }
 0x2fa   :  { %3712 = vsyncpa [#allocation7 + $0x1], 1 }
 0x2fb   :  { %3713 = vsyncpa [#allocation5], 1 }
 0x2fc   :  { %3715 = vsyncpa [#allocation5 + $0x1], 1 }

</bundles_post_ra>
